<compile_context>
chip_gen: v6e
topology: v6e:2x2x1
jax: 0.10.0
libtpu: 0.0.40
codegen_flags: <defaults>
</compile_context>

<pallas_src>
import functools

import jax
import jax.numpy as jnp
from jax.experimental import pallas as pl
from jax.experimental.pallas import tpu as pltpu

_MASK_VALUE = -1e30  # large finite negative: NaN-safe stand-in for float('-inf')


# ---------------- shared math helpers (used by kernel AND reference) ----------------
def _layernorm(z, w, b):
    mu = jnp.mean(z, axis=-1, keepdims=True)
    var = jnp.mean((z - mu) ** 2, axis=-1, keepdims=True)
    return (z - mu) * jax.lax.rsqrt(var + 1e-5) * w + b


def _gelu(f):
    # TODO(synk): nn.GELU() default is the exact erf formulation; using the tanh
    # approximation because erf lowering is not guaranteed in Mosaic (~1e-3 deviation).
    return 0.5 * f * (1.0 + jnp.tanh(0.7978845608028654 * (f + 0.044715 * f * f * f)))


def _softmax(a):
    m = jnp.max(a, axis=-1, keepdims=True)
    e = jnp.exp(a - m)
    # approx reciprocal runs on the EUP slot instead of the (busier) VALU divide path.
    return e * pl.reciprocal(jnp.sum(e, axis=-1, keepdims=True), approx=True)


# ---------------- fused decoder kernel: grid = (batch_blocks, n_layers) ----------------
def decoder_kernel(x_ref, kv_ref, w_ref, ff2_ref, vec_ref, ff1b_ref, o_ref, *, n_heads):
    f32, bf16 = jnp.float32, jnp.bfloat16
    Bb, T, C = x_ref.shape
    S = kv_ref.shape[1]
    H = n_heads
    hd = C // H
    M = Bb * T
    layer = pl.program_id(1)

    # The residual stream lives in the layer-resident output block: init at layer 0.
    @pl.when(layer == 0)
    def _():
        o_ref[...] = x_ref[...]

    x = o_ref[...].astype(f32).reshape(M, C)             # (Bb*T, C) rows for all matmuls
    kvx = kv_ref[...].astype(bf16).reshape(Bb * S, C)

    w = w_ref[0]         # (C, 12C) bf16: [qkv(3C) | q(C) | kv(2C) | out1(C) | out2(C) | ff1(4C)]
    ff2_w = ff2_ref[0]   # (4C, C) bf16
    vec = vec_ref[0]     # (9, C)  f32: ln1w,ln1b,ln2w,ln2b,ln3w,ln3b,out1b,out2b,ff2b
    ff1_b = ff1b_ref[0]  # (1, 4C) f32

    # Head split/merge built from lane slices + leading-axis concat (known-good Mosaic
    # ops); matmuls are then single batched dot_generals over n = head*Bb + batch.
    # TODO(synk): a single pltpu.einshape relayout could replace the per-head lane slices.
    def split_heads(z, L_):
        # (Bb*L_, H*hd) -> (H*Bb, L_, hd)
        z3 = z.reshape(Bb, L_, C)
        return jnp.concatenate([z3[:, :, h * hd:(h + 1) * hd] for h in range(H)], axis=0)

    def merge_heads(ctx):
        # (H*Bb, T, hd) -> (Bb*T, H*hd)
        return jnp.concatenate([ctx[h * Bb:(h + 1) * Bb] for h in range(H)],
                               axis=-1).reshape(M, C)

    row = jax.lax.broadcasted_iota(jnp.int32, (T, T), 0)
    col = jax.lax.broadcasted_iota(jnp.int32, (T, T), 1)
    causal = (col <= row)[None, :, :]                      # (1, T, T), broadcast over H*Bb

    # ---------------- masked self-attention ----------------
    # (the 1/sqrt(hd) query scale is folded into the q weight columns at build time)
    h1 = _layernorm(x, vec[0:1], vec[1:2])
    qkv = jnp.dot(h1.astype(bf16), w[:, :3 * C], preferred_element_type=f32)     # (M, 3C)
    q = split_heads(qkv[:, :C], T).astype(bf16)            # (N, T, hd), N = H*Bb
    k = split_heads(qkv[:, C:2 * C], T).astype(bf16)
    v = split_heads(qkv[:, 2 * C:], T).astype(bf16)
    # TODO(synk): for long T/S, tile the KV axis with flash-style online softmax instead
    # of materializing the full (H*Bb, T, S) score tensor (v7x has only 64 MiB VMEM).
    s = jnp.einsum("nqd,nkd->nqk", q, k, preferred_element_type=f32)             # (N, T, T)
    s = jnp.where(causal, s, _MASK_VALUE)
    p = _softmax(s)
    ctx = jnp.einsum("nqk,nkd->nqd", p.astype(bf16), v, preferred_element_type=f32)
    sa = jnp.dot(merge_heads(ctx).astype(bf16), w[:, 6 * C:7 * C],
                 preferred_element_type=f32) + vec[6:7]
    x = x + sa

    # ---------------- cross-attention ----------------
    h2 = _layernorm(x, vec[2:3], vec[3:4])
    qx = jnp.dot(h2.astype(bf16), w[:, 3 * C:4 * C], preferred_element_type=f32)  # (M, C)
    kvp = jnp.dot(kvx, w[:, 4 * C:6 * C], preferred_element_type=f32)             # (Bb*S, 2C)
    q2 = split_heads(qx, T).astype(bf16)
    k2 = split_heads(kvp[:, :C], S).astype(bf16)
    v2 = split_heads(kvp[:, C:], S).astype(bf16)
    s2 = jnp.einsum("nqd,nkd->nqk", q2, k2, preferred_element_type=f32)            # (N, T, S)
    p2 = _softmax(s2)
    ctx2 = jnp.einsum("nqk,nkd->nqd", p2.astype(bf16), v2, preferred_element_type=f32)
    ca = jnp.dot(merge_heads(ctx2).astype(bf16), w[:, 7 * C:8 * C],
                 preferred_element_type=f32) + vec[7:8]
    x = x + ca

    # ---------------- feed-forward ----------------
    h3 = _layernorm(x, vec[4:5], vec[5:6])
    f = jnp.dot(h3.astype(bf16), w[:, 8 * C:12 * C], preferred_element_type=f32) + ff1_b
    f = _gelu(f)
    f = jnp.dot(f.astype(bf16), ff2_w, preferred_element_type=f32) + vec[8:9]
    x = x + f

    o_ref[...] = x.reshape(Bb, T, C).astype(o_ref.dtype)


def _vmem_limit_bytes(Bb, T, S, C, n_heads):
    # Right-sized estimate: one layer's packed weights (double-buffered across the layer
    # axis), the x/kv/out blocks, and the in-kernel f32 working set.  Clamped to
    # [16 MiB, 48 MiB] so it leaves headroom on v7x (64 MiB physical per TensorCore).
    w = 2 * (12 * C * C + 4 * C * C) + 4 * (9 * C + 4 * C)        # bytes, one layer
    io = 4 * (2 * Bb * T * C + Bb * S * C)                        # x, out, kv blocks (f32)
    M, N = Bb * T, Bb * n_heads
    act = 4 * (M * 3 * C + 6 * M * C + 2 * M * 4 * C + 3 * N * T * max(T, S) + Bb * S * 2 * C)
    est = 2 * w + 2 * io + 2 * act + (4 << 20)
    return int(min(48 * 1024 * 1024, max(16 * 1024 * 1024, est)))


def decoder_forward(x, kv, packed, n_heads, *, batch_block=None):
    """Runs all decoder layers in one fused pallas_call.

    packed: dict of layer-stacked operands from pack_decoder_params().
    """
    B, T, C = x.shape
    S = kv.shape[1]
    L = packed["w_in"].shape[0]
    Bb = B if batch_block is None else batch_block
    assert B % Bb == 0 and C % n_heads == 0
    # NOTE: lane/sublane alignment assumes C a multiple of 128 and T, S multiples of 8;
    # pad inputs in the caller otherwise.

    grid = (B // Bb, L)
    call = pl.pallas_call(
        functools.partial(decoder_kernel, n_heads=n_heads),
        out_shape=jax.ShapeDtypeStruct((B, T, C), x.dtype),
        grid_spec=pltpu.PrefetchScalarGridSpec(
            num_scalar_prefetch=0,
            grid=grid,
            in_specs=[
                pl.BlockSpec((Bb, T, C), lambda b, l: (b, 0, 0)),        # x (layer-invariant)
                pl.BlockSpec((Bb, S, C), lambda b, l: (b, 0, 0)),        # kv (layer-invariant)
                pl.BlockSpec((1, C, 12 * C), lambda b, l: (l, 0, 0)),    # packed matrices
                pl.BlockSpec((1, 4 * C, C), lambda b, l: (l, 0, 0)),     # ff2 weight
                pl.BlockSpec((1, 9, C), lambda b, l: (l, 0, 0)),         # LN params + biases
                pl.BlockSpec((1, 1, 4 * C), lambda b, l: (l, 0, 0)),     # ff1 bias
            ],
            out_specs=pl.BlockSpec((Bb, T, C), lambda b, l: (b, 0, 0)),  # residual stream
        ),
        compiler_params=pltpu.CompilerParams(
            # batch blocks are independent -> shard across TensorCores on v7x;
            # the layer axis carries the residual stream -> "arbitrary".
            dimension_semantics=("parallel", "arbitrary"),
            vmem_limit_bytes=_vmem_limit_bytes(Bb, T, S, C, n_heads),
        ),
    )
    return call(x, kv, packed["w_in"], packed["w_ff2"], packed["vecs"], packed["ff1_b"])


# ---------------- parameter construction ----------------
def init_block_params(key, n_embed, n_heads):
    """Per-layer params.  Matmul weights are stored bf16 (MXU operand dtype) with the
    PyTorch q * hd**-0.5 scale folded into the q columns; LN params / biases stay f32."""
    C = n_embed
    hd = C // n_heads
    scale = float(hd) ** (-0.5)
    ks = jax.random.split(key, 12)
    s = 0.02

    def nrm(k, shape):
        return jax.random.normal(k, shape, jnp.float32) * s

    qkv_w = nrm(ks[0], (C, 3 * C))
    qkv_w = qkv_w.at[:, :C].multiply(scale)          # fold q scale
    q_w = nrm(ks[4], (C, C)) * scale                 # fold q scale

    return dict(
        ln1_w=jnp.ones((C,), jnp.float32), ln1_b=jnp.zeros((C,), jnp.float32),
        qkv_w=qkv_w.astype(jnp.bfloat16),
        out1_w=nrm(ks[1], (C, C)).astype(jnp.bfloat16), out1_b=nrm(ks[2], (C,)),
        ln2_w=jnp.ones((C,), jnp.float32), ln2_b=jnp.zeros((C,), jnp.float32),
        kv_w=nrm(ks[3], (C, 2 * C)).astype(jnp.bfloat16),
        q_w=q_w.astype(jnp.bfloat16),
        out2_w=nrm(ks[5], (C, C)).astype(jnp.bfloat16), out2_b=nrm(ks[6], (C,)),
        ln3_w=jnp.ones((C,), jnp.float32), ln3_b=jnp.zeros((C,), jnp.float32),
        ff1_w=nrm(ks[7], (C, 4 * C)).astype(jnp.bfloat16), ff1_b=nrm(ks[8], (4 * C,)),
        ff2_w=nrm(ks[9], (4 * C, C)).astype(jnp.bfloat16), ff2_b=nrm(ks[10], (C,)),
    )


def pack_decoder_params(layer_params):
    """Stacks per-layer params into 4 layer-indexed operands for the fused kernel."""
    w_in, w_ff2, vecs, ff1_b = [], [], [], []
    for p in layer_params:
        w_in.append(jnp.concatenate(
            [p["qkv_w"], p["q_w"], p["kv_w"], p["out1_w"], p["out2_w"], p["ff1_w"]], axis=-1))
        w_ff2.append(p["ff2_w"])
        vecs.append(jnp.stack([p["ln1_w"], p["ln1_b"], p["ln2_w"], p["ln2_b"],
                               p["ln3_w"], p["ln3_b"], p["out1_b"], p["out2_b"], p["ff2_b"]]))
        ff1_b.append(p["ff1_b"][None, :])
    return dict(
        w_in=jnp.stack(w_in).astype(jnp.bfloat16),        # (L, C, 12C)
        w_ff2=jnp.stack(w_ff2).astype(jnp.bfloat16),      # (L, 4C, C)
        vecs=jnp.stack(vecs).astype(jnp.float32),         # (L, 9, C)
        ff1_b=jnp.stack(ff1_b).astype(jnp.float32),       # (L, 1, 4C)
    )


# ---------------- pure-JAX reference (mirrors the kernel's bf16 operand casts) ----------------
def ref_block(x, kv, p, n_heads):
    B, T, C = x.shape
    hd = C // n_heads
    bf16, f32 = jnp.bfloat16, jnp.float32

    def proj(z, w, b=None):
        out = jnp.einsum("btc,cd->btd", z.astype(bf16), w, preferred_element_type=f32)
        return out if b is None else out + b

    def split(z):
        return z.reshape(B, z.shape[1], n_heads, hd).transpose(0, 2, 1, 3)

    def mha(q2, k2, v2, masked):
        q = split(q2).astype(bf16)   # q scale already folded into the weights
        k = split(k2).astype(bf16)
        v = split(v2).astype(bf16)
        a = jnp.einsum("bhtd,bhsd->bhts", q, k, preferred_element_type=f32)
        if masked:
            m = jnp.tril(jnp.ones((q2.shape[1], k2.shape[1]), bool))
            a = jnp.where(m, a, _MASK_VALUE)
        a = jax.nn.softmax(a, axis=-1)
        o = jnp.einsum("bhts,bhsd->bhtd", a.astype(bf16), v, preferred_element_type=f32)
        return o.transpose(0, 2, 1, 3).reshape(B, q2.shape[1], C)

    h1 = _layernorm(x, p["ln1_w"], p["ln1_b"])
    qkv = proj(h1, p["qkv_w"])
    sa = mha(qkv[..., :C], qkv[..., C:2 * C], qkv[..., 2 * C:], True)
    x = x + proj(sa, p["out1_w"], p["out1_b"])

    h2 = _layernorm(x, p["ln2_w"], p["ln2_b"])
    kvp = proj(kv, p["kv_w"])
    ca = mha(proj(h2, p["q_w"]), kvp[..., :C], kvp[..., C:], False)
    x = x + proj(ca, p["out2_w"], p["out2_b"])

    h3 = _layernorm(x, p["ln3_w"], p["ln3_b"])
    f = _gelu(proj(h3, p["ff1_w"], p["ff1_b"]))
    return x + proj(f, p["ff2_w"], p["ff2_b"])


if __name__ == "__main__":
    # Small but (8,128)-aligned shapes: C=128 (lane-dense), T=S=16, 4 heads, 2 layers.
    N_layers, n_heads, block_size, n_embed = 2, 4, 16, 128
    B, T, S = 2, block_size, block_size

    key = jax.random.PRNGKey(0)
    kx, kkv, kp = jax.random.split(key, 3)
    x = jax.random.normal(kx, (B, T, n_embed), jnp.float32)
    kv = jax.random.normal(kkv, (B, S, n_embed), jnp.float32)

    layer_params = [init_block_params(k, n_embed, n_heads)
                    for k in jax.random.split(kp, N_layers)]
    packed = pack_decoder_params(layer_params)

    out = jax.block_until_ready(decoder_forward(x, kv, packed, n_heads))

    # sanity check vs pure-JAX reference
    ref = x
    for p in layer_params:
        ref = ref_block(ref, kv, p, n_heads)
    ref = jax.block_until_ready(ref)

    assert out.shape == (B, T, n_embed)
    max_err = float(jnp.max(jnp.abs(out - ref)))
    assert jnp.allclose(out, ref, atol=1e-2, rtol=1e-2), f"mismatch vs reference: {max_err}"

    print("KERNEL_OK")
</pallas_src>

<mosaic_0001>
module attributes {stable_mosaic.version = 11 : i64} {
  func.func @decoder_kernel(%arg0: i32, %arg1: i32, %arg2: memref<2x16x128xf32, #tpu.memory_space<vmem>>, %arg3: memref<2x16x128xf32, #tpu.memory_space<vmem>>, %arg4: memref<1x128x1536xbf16, #tpu.memory_space<vmem>>, %arg5: memref<1x512x128xbf16, #tpu.memory_space<vmem>>, %arg6: memref<1x9x128xf32, #tpu.memory_space<vmem>>, %arg7: memref<1x1x512xf32, #tpu.memory_space<vmem>>, %arg8: memref<2x16x128xf32, #tpu.memory_space<vmem>>) attributes {dimension_semantics = [#tpu.dimension_semantics<parallel>, #tpu.dimension_semantics<arbitrary>], iteration_bounds = array<i64: 1, 2>, scalar_prefetch = 0 : i64, scratch_operands = 0 : i64, tpu.core_type = #tpu.core_type<tc>, window_params = [{transform_indices = @transform_0, window_bounds = array<i64: 2, 16, 128>}, {transform_indices = @transform_1, window_bounds = array<i64: 2, 16, 128>}, {transform_indices = @transform_2, window_bounds = array<i64: 1, 128, 1536>}, {transform_indices = @transform_3, window_bounds = array<i64: 1, 512, 128>}, {transform_indices = @transform_4, window_bounds = array<i64: 1, 9, 128>}, {transform_indices = @transform_5, window_bounds = array<i64: 1, 1, 512>}, {transform_indices = @transform_6, window_bounds = array<i64: 2, 16, 128>}]} {
    %c0_i32 = arith.constant 0 : i32
    %0 = arith.cmpi eq, %arg1, %c0_i32 : i32
    %1 = arith.extui %0 : i1 to i32
    %c0_i32_0 = arith.constant 0 : i32
    %2 = arith.cmpi ne, %1, %c0_i32_0 : i32
    scf.if %2 {
      %c0_55 = arith.constant 0 : index
      %c0_56 = arith.constant 0 : index
      %c0_57 = arith.constant 0 : index
      %229 = vector.load %arg2[%c0_55, %c0_56, %c0_57] : memref<2x16x128xf32, #tpu.memory_space<vmem>>, vector<2x16x128xf32>
      %c0_58 = arith.constant 0 : index
      %c0_59 = arith.constant 0 : index
      %c0_60 = arith.constant 0 : index
      %230 = vector.load %arg8[%c0_58, %c0_59, %c0_60] : memref<2x16x128xf32, #tpu.memory_space<vmem>>, vector<2x16x128xf32>
      tpu.vector_store %arg8[%c0_58, %c0_59, %c0_60], %229 {strides = array<i32>} : memref<2x16x128xf32, #tpu.memory_space<vmem>>, vector<2x16x128xf32>,
    } else {
    }
    %c0 = arith.constant 0 : index
    %c0_1 = arith.constant 0 : index
    %c0_2 = arith.constant 0 : index
    %3 = vector.load %arg8[%c0, %c0_1, %c0_2] : memref<2x16x128xf32, #tpu.memory_space<vmem>>, vector<2x16x128xf32>
    %4 = vector.shape_cast %3 : vector<2x16x128xf32> to vector<32x128xf32>
    %c0_3 = arith.constant 0 : index
    %c0_4 = arith.constant 0 : index
    %c0_5 = arith.constant 0 : index
    %5 = vector.load %arg3[%c0_3, %c0_4, %c0_5] : memref<2x16x128xf32, #tpu.memory_space<vmem>>, vector<2x16x128xf32>
    %6 = arith.truncf %5 : vector<2x16x128xf32> to vector<2x16x128xbf16>
    %7 = vector.shape_cast %6 : vector<2x16x128xbf16> to vector<32x128xbf16>
    %c0_6 = arith.constant 0 : index
    %c0_7 = arith.constant 0 : index
    %c0_8 = arith.constant 0 : index
    %8 = vector.load %arg4[%c0_6, %c0_7, %c0_8] : memref<1x128x1536xbf16, #tpu.memory_space<vmem>>, vector<1x128x1536xbf16>
    %9 = vector.shape_cast %8 : vector<1x128x1536xbf16> to vector<128x1536xbf16>
    %c0_9 = arith.constant 0 : index
    %c0_10 = arith.constant 0 : index
    %c0_11 = arith.constant 0 : index
    %10 = vector.load %arg5[%c0_9, %c0_10, %c0_11] : memref<1x512x128xbf16, #tpu.memory_space<vmem>>, vector<1x512x128xbf16>
    %11 = vector.shape_cast %10 : vector<1x512x128xbf16> to vector<512x128xbf16>
    %c0_12 = arith.constant 0 : index
    %c0_13 = arith.constant 0 : index
    %c0_14 = arith.constant 0 : index
    %12 = vector.load %arg6[%c0_12, %c0_13, %c0_14] : memref<1x9x128xf32, #tpu.memory_space<vmem>>, vector<1x9x128xf32>
    %13 = vector.shape_cast %12 : vector<1x9x128xf32> to vector<9x128xf32>
    %c0_15 = arith.constant 0 : index
    %c0_16 = arith.constant 0 : index
    %c0_17 = arith.constant 0 : index
    %14 = vector.load %arg7[%c0_15, %c0_16, %c0_17] : memref<1x1x512xf32, #tpu.memory_space<vmem>>, vector<1x1x512xf32>
    %15 = vector.shape_cast %14 : vector<1x1x512xf32> to vector<1x512xf32>
    %16 = tpu.iota {dimensions = array<i32: 0>} : vector<16x16xi32>
    %17 = tpu.iota {dimensions = array<i32: 1>} : vector<16x16xi32>
    %18 = arith.cmpi sle, %17, %16 : vector<16x16xi32>
    %19 = vector.shape_cast %18 : vector<16x16xi1> to vector<1x16x16xi1>
    %20 = vector.extract_strided_slice %13 {offsets = [0, 0], sizes = [1, 128], strides = [1, 1]} : vector<9x128xf32> to vector<1x128xf32>
    %21 = vector.extract_strided_slice %13 {offsets = [1, 0], sizes = [1, 128], strides = [1, 1]} : vector<9x128xf32> to vector<1x128xf32>
    %cst = arith.constant dense<0.000000e+00> : vector<32xf32>
    %22 = vector.multi_reduction <add>, %4, %cst [1] : vector<32x128xf32> to vector<32xf32>
    %23 = vector.shape_cast %22 : vector<32xf32> to vector<32x1xf32>
    %cst_18 = arith.constant 1.280000e+02 : f32
    %24 = vector.broadcast %cst_18 : f32 to vector<32x1xf32>
    %25 = arith.divf %23, %24 : vector<32x1xf32>
    %26 = vector.broadcast %25 : vector<32x1xf32> to vector<32x128xf32>
    %27 = arith.subf %4, %26 : vector<32x128xf32>
    %28 = arith.mulf %27, %27 : vector<32x128xf32>
    %cst_19 = arith.constant dense<0.000000e+00> : vector<32xf32>
    %29 = vector.multi_reduction <add>, %28, %cst_19 [1] : vector<32x128xf32> to vector<32xf32>
    %30 = vector.shape_cast %29 : vector<32xf32> to vector<32x1xf32>
    %cst_20 = arith.constant 1.280000e+02 : f32
    %31 = vector.broadcast %cst_20 : f32 to vector<32x1xf32>
    %32 = arith.divf %30, %31 : vector<32x1xf32>
    %33 = vector.broadcast %25 : vector<32x1xf32> to vector<32x128xf32>
    %34 = arith.subf %4, %33 : vector<32x128xf32>
    %cst_21 = arith.constant 9.99999974E-6 : f32
    %35 = vector.broadcast %cst_21 : f32 to vector<32x1xf32>
    %36 = arith.addf %32, %35 : vector<32x1xf32>
    %37 = math.rsqrt %36 : vector<32x1xf32>
    %38 = vector.broadcast %37 : vector<32x1xf32> to vector<32x128xf32>
    %39 = arith.mulf %34, %38 : vector<32x128xf32>
    %40 = vector.broadcast %20 : vector<1x128xf32> to vector<32x128xf32>
    %41 = arith.mulf %39, %40 : vector<32x128xf32>
    %42 = vector.broadcast %21 : vector<1x128xf32> to vector<32x128xf32>
    %43 = arith.addf %41, %42 : vector<32x128xf32>
    %44 = arith.truncf %43 : vector<32x128xf32> to vector<32x128xbf16>
    %45 = vector.extract_strided_slice %9 {offsets = [0, 0], sizes = [128, 384], strides = [1, 1]} : vector<128x1536xbf16> to vector<128x384xbf16>
    %cst_22 = arith.constant dense<0.000000e+00> : vector<32x384xf32>
    %46 = tpu.matmul %44, %45, %cst_22 {dimension_numbers = #tpu.dot_dimension_numbers<[1], [0], [0], [1], [0, 0, 1, 1], [], []>} : vector<32x128xbf16>, vector<128x384xbf16>, vector<32x384xf32> -> vector<32x384xf32>
    %47 = vector.extract_strided_slice %46 {offsets = [0, 0], sizes = [32, 128], strides = [1, 1]} : vector<32x384xf32> to vector<32x128xf32>
    %48 = vector.shape_cast %47 : vector<32x128xf32> to vector<2x16x128xf32>
    %49 = vector.extract_strided_slice %48 {offsets = [0, 0, 0], sizes = [2, 16, 32], strides = [1, 1, 1]} : vector<2x16x128xf32> to vector<2x16x32xf32>
    %50 = vector.extract_strided_slice %48 {offsets = [0, 0, 32], sizes = [2, 16, 32], strides = [1, 1, 1]} : vector<2x16x128xf32> to vector<2x16x32xf32>
    %51 = vector.extract_strided_slice %48 {offsets = [0, 0, 64], sizes = [2, 16, 32], strides = [1, 1, 1]} : vector<2x16x128xf32> to vector<2x16x32xf32>
    %52 = vector.extract_strided_slice %48 {offsets = [0, 0, 96], sizes = [2, 16, 32], strides = [1, 1, 1]} : vector<2x16x128xf32> to vector<2x16x32xf32>
    %53 = tpu.concatenate %49, %50, %51, %52 in 0 : vector<2x16x32xf32>, vector<2x16x32xf32>, vector<2x16x32xf32>, vector<2x16x32xf32> -> vector<8x16x32xf32>
    %54 = arith.truncf %53 : vector<8x16x32xf32> to vector<8x16x32xbf16>
    %55 = vector.extract_strided_slice %46 {offsets = [0, 128], sizes = [32, 128], strides = [1, 1]} : vector<32x384xf32> to vector<32x128xf32>
    %56 = vector.shape_cast %55 : vector<32x128xf32> to vector<2x16x128xf32>
    %57 = vector.extract_strided_slice %56 {offsets = [0, 0, 0], sizes = [2, 16, 32], strides = [1, 1, 1]} : vector<2x16x128xf32> to vector<2x16x32xf32>
    %58 = vector.extract_strided_slice %56 {offsets = [0, 0, 32], sizes = [2, 16, 32], strides = [1, 1, 1]} : vector<2x16x128xf32> to vector<2x16x32xf32>
    %59 = vector.extract_strided_slice %56 {offsets = [0, 0, 64], sizes = [2, 16, 32], strides = [1, 1, 1]} : vector<2x16x128xf32> to vector<2x16x32xf32>
    %60 = vector.extract_strided_slice %56 {offsets = [0, 0, 96], sizes = [2, 16, 32], strides = [1, 1, 1]} : vector<2x16x128xf32> to vector<2x16x32xf32>
    %61 = tpu.concatenate %57, %58, %59, %60 in 0 : vector<2x16x32xf32>, vector<2x16x32xf32>, vector<2x16x32xf32>, vector<2x16x32xf32> -> vector<8x16x32xf32>
    %62 = arith.truncf %61 : vector<8x16x32xf32> to vector<8x16x32xbf16>
    %63 = vector.extract_strided_slice %46 {offsets = [0, 256], sizes = [32, 128], strides = [1, 1]} : vector<32x384xf32> to vector<32x128xf32>
    %64 = vector.shape_cast %63 : vector<32x128xf32> to vector<2x16x128xf32>
    %65 = vector.extract_strided_slice %64 {offsets = [0, 0, 0], sizes = [2, 16, 32], strides = [1, 1, 1]} : vector<2x16x128xf32> to vector<2x16x32xf32>
    %66 = vector.extract_strided_slice %64 {offsets = [0, 0, 32], sizes = [2, 16, 32], strides = [1, 1, 1]} : vector<2x16x128xf32> to vector<2x16x32xf32>
    %67 = vector.extract_strided_slice %64 {offsets = [0, 0, 64], sizes = [2, 16, 32], strides = [1, 1, 1]} : vector<2x16x128xf32> to vector<2x16x32xf32>
    %68 = vector.extract_strided_slice %64 {offsets = [0, 0, 96], sizes = [2, 16, 32], strides = [1, 1, 1]} : vector<2x16x128xf32> to vector<2x16x32xf32>
    %69 = tpu.concatenate %65, %66, %67, %68 in 0 : vector<2x16x32xf32>, vector<2x16x32xf32>, vector<2x16x32xf32>, vector<2x16x32xf32> -> vector<8x16x32xf32>
    %70 = arith.truncf %69 : vector<8x16x32xf32> to vector<8x16x32xbf16>
    "tpu.trace_start"() <{level = 10 : i32, message = "nqd,nkd->nqk"}> : () -> ()
    %cst_23 = arith.constant dense<0.000000e+00> : vector<8x16x16xf32>
    %71 = tpu.matmul %54, %62, %cst_23 {dimension_numbers = #tpu.dot_dimension_numbers<[2], [2], [1], [1], [0, 0, 0, 1, 1, 1], [0], [0]>} : vector<8x16x32xbf16>, vector<8x16x32xbf16>, vector<8x16x16xf32> -> vector<8x16x16xf32>
    %cst_24 = arith.constant -1.000000e+30 : f32
    "tpu.trace_stop"() : () -> ()
    %72 = vector.shape_cast %19 : vector<1x16x16xi1> to vector<1x16x16xi1>
    %73 = vector.broadcast %72 : vector<1x16x16xi1> to vector<8x16x16xi1>
    %74 = vector.broadcast %cst_24 : f32 to vector<8x16x16xf32>
    %75 = arith.select %73, %71, %74 : vector<8x16x16xi1>, vector<8x16x16xf32>
    %cst_25 = arith.constant dense<0xFF800000> : vector<8x16xf32>
    %76 = vector.multi_reduction <maximumf>, %75, %cst_25 [2] : vector<8x16x16xf32> to vector<8x16xf32>
    %77 = vector.shape_cast %76 : vector<8x16xf32> to vector<8x16x1xf32>
    %78 = vector.broadcast %77 : vector<8x16x1xf32> to vector<8x16x16xf32>
    %79 = arith.subf %75, %78 : vector<8x16x16xf32>
    %80 = math.exp %79 : vector<8x16x16xf32>
    %cst_26 = arith.constant dense<0.000000e+00> : vector<8x16xf32>
    %81 = vector.multi_reduction <add>, %80, %cst_26 [2] : vector<8x16x16xf32> to vector<8x16xf32>
    %82 = vector.shape_cast %81 : vector<8x16xf32> to vector<8x16x1xf32>
    %83 = tpu.reciprocal %82 {approx = true} : vector<8x16x1xf32> -> vector<8x16x1xf32>
    %84 = vector.broadcast %83 : vector<8x16x1xf32> to vector<8x16x16xf32>
    %85 = arith.mulf %80, %84 : vector<8x16x16xf32>
    %86 = arith.truncf %85 : vector<8x16x16xf32> to vector<8x16x16xbf16>
    "tpu.trace_start"() <{level = 10 : i32, message = "nqk,nkd->nqd"}> : () -> ()
    %cst_27 = arith.constant dense<0.000000e+00> : vector<8x16x32xf32>
    %87 = tpu.matmul %86, %70, %cst_27 {dimension_numbers = #tpu.dot_dimension_numbers<[2], [1], [1], [2], [0, 0, 0, 1, 1, 2], [0], [0]>} : vector<8x16x16xbf16>, vector<8x16x32xbf16>, vector<8x16x32xf32> -> vector<8x16x32xf32>
    "tpu.trace_stop"() : () -> ()
    %88 = vector.extract_strided_slice %87 {offsets = [0, 0, 0], sizes = [2, 16, 32], strides = [1, 1, 1]} : vector<8x16x32xf32> to vector<2x16x32xf32>
    %89 = vector.extract_strided_slice %87 {offsets = [2, 0, 0], sizes = [2, 16, 32], strides = [1, 1, 1]} : vector<8x16x32xf32> to vector<2x16x32xf32>
    %90 = vector.extract_strided_slice %87 {offsets = [4, 0, 0], sizes = [2, 16, 32], strides = [1, 1, 1]} : vector<8x16x32xf32> to vector<2x16x32xf32>
    %91 = vector.extract_strided_slice %87 {offsets = [6, 0, 0], sizes = [2, 16, 32], strides = [1, 1, 1]} : vector<8x16x32xf32> to vector<2x16x32xf32>
    %92 = tpu.concatenate %88, %89, %90, %91 in 2 : vector<2x16x32xf32>, vector<2x16x32xf32>, vector<2x16x32xf32>, vector<2x16x32xf32> -> vector<2x16x128xf32>
    %93 = vector.shape_cast %92 : vector<2x16x128xf32> to vector<32x128xf32>
    %94 = arith.truncf %93 : vector<32x128xf32> to vector<32x128xbf16>
    %95 = vector.extract_strided_slice %9 {offsets = [0, 768], sizes = [128, 128], strides = [1, 1]} : vector<128x1536xbf16> to vector<128x128xbf16>
    %cst_28 = arith.constant dense<0.000000e+00> : vector<32x128xf32>
    %96 = tpu.matmul %94, %95, %cst_28 {dimension_numbers = #tpu.dot_dimension_numbers<[1], [0], [0], [1], [0, 0, 1, 1], [], []>} : vector<32x128xbf16>, vector<128x128xbf16>, vector<32x128xf32> -> vector<32x128xf32>
    %97 = vector.extract_strided_slice %13 {offsets = [6, 0], sizes = [1, 128], strides = [1, 1]} : vector<9x128xf32> to vector<1x128xf32>
    %98 = vector.broadcast %97 : vector<1x128xf32> to vector<32x128xf32>
    %99 = arith.addf %96, %98 : vector<32x128xf32>
    %100 = arith.addf %4, %99 : vector<32x128xf32>
    %101 = vector.extract_strided_slice %13 {offsets = [2, 0], sizes = [1, 128], strides = [1, 1]} : vector<9x128xf32> to vector<1x128xf32>
    %102 = vector.extract_strided_slice %13 {offsets = [3, 0], sizes = [1, 128], strides = [1, 1]} : vector<9x128xf32> to vector<1x128xf32>
    %cst_29 = arith.constant dense<0.000000e+00> : vector<32xf32>
    %103 = vector.multi_reduction <add>, %100, %cst_29 [1] : vector<32x128xf32> to vector<32xf32>
    %104 = vector.shape_cast %103 : vector<32xf32> to vector<32x1xf32>
    %cst_30 = arith.constant 1.280000e+02 : f32
    %105 = vector.broadcast %cst_30 : f32 to vector<32x1xf32>
    %106 = arith.divf %104, %105 : vector<32x1xf32>
    %107 = vector.broadcast %106 : vector<32x1xf32> to vector<32x128xf32>
    %108 = arith.subf %100, %107 : vector<32x128xf32>
    %109 = arith.mulf %108, %108 : vector<32x128xf32>
    %cst_31 = arith.constant dense<0.000000e+00> : vector<32xf32>
    %110 = vector.multi_reduction <add>, %109, %cst_31 [1] : vector<32x128xf32> to vector<32xf32>
    %111 = vector.shape_cast %110 : vector<32xf32> to vector<32x1xf32>
    %cst_32 = arith.constant 1.280000e+02 : f32
    %112 = vector.broadcast %cst_32 : f32 to vector<32x1xf32>
    %113 = arith.divf %111, %112 : vector<32x1xf32>
    %114 = vector.broadcast %106 : vector<32x1xf32> to vector<32x128xf32>
    %115 = arith.subf %100, %114 : vector<32x128xf32>
    %cst_33 = arith.constant 9.99999974E-6 : f32
    %116 = vector.broadcast %cst_33 : f32 to vector<32x1xf32>
    %117 = arith.addf %113, %116 : vector<32x1xf32>
    %118 = math.rsqrt %117 : vector<32x1xf32>
    %119 = vector.broadcast %118 : vector<32x1xf32> to vector<32x128xf32>
    %120 = arith.mulf %115, %119 : vector<32x128xf32>
    %121 = vector.broadcast %101 : vector<1x128xf32> to vector<32x128xf32>
    %122 = arith.mulf %120, %121 : vector<32x128xf32>
    %123 = vector.broadcast %102 : vector<1x128xf32> to vector<32x128xf32>
    %124 = arith.addf %122, %123 : vector<32x128xf32>
    %125 = arith.truncf %124 : vector<32x128xf32> to vector<32x128xbf16>
    %126 = vector.extract_strided_slice %9 {offsets = [0, 384], sizes = [128, 128], strides = [1, 1]} : vector<128x1536xbf16> to vector<128x128xbf16>
    %cst_34 = arith.constant dense<0.000000e+00> : vector<32x128xf32>
    %127 = tpu.matmul %125, %126, %cst_34 {dimension_numbers = #tpu.dot_dimension_numbers<[1], [0], [0], [1], [0, 0, 1, 1], [], []>} : vector<32x128xbf16>, vector<128x128xbf16>, vector<32x128xf32> -> vector<32x128xf32>
    %128 = vector.extract_strided_slice %9 {offsets = [0, 512], sizes = [128, 256], strides = [1, 1]} : vector<128x1536xbf16> to vector<128x256xbf16>
    %cst_35 = arith.constant dense<0.000000e+00> : vector<32x256xf32>
    %129 = tpu.matmul %7, %128, %cst_35 {dimension_numbers = #tpu.dot_dimension_numbers<[1], [0], [0], [1], [0, 0, 1, 1], [], []>} : vector<32x128xbf16>, vector<128x256xbf16>, vector<32x256xf32> -> vector<32x256xf32>
    %130 = vector.shape_cast %127 : vector<32x128xf32> to vector<2x16x128xf32>
    %131 = vector.extract_strided_slice %130 {offsets = [0, 0, 0], sizes = [2, 16, 32], strides = [1, 1, 1]} : vector<2x16x128xf32> to vector<2x16x32xf32>
    %132 = vector.extract_strided_slice %130 {offsets = [0, 0, 32], sizes = [2, 16, 32], strides = [1, 1, 1]} : vector<2x16x128xf32> to vector<2x16x32xf32>
    %133 = vector.extract_strided_slice %130 {offsets = [0, 0, 64], sizes = [2, 16, 32], strides = [1, 1, 1]} : vector<2x16x128xf32> to vector<2x16x32xf32>
    %134 = vector.extract_strided_slice %130 {offsets = [0, 0, 96], sizes = [2, 16, 32], strides = [1, 1, 1]} : vector<2x16x128xf32> to vector<2x16x32xf32>
    %135 = tpu.concatenate %131, %132, %133, %134 in 0 : vector<2x16x32xf32>, vector<2x16x32xf32>, vector<2x16x32xf32>, vector<2x16x32xf32> -> vector<8x16x32xf32>
    %136 = arith.truncf %135 : vector<8x16x32xf32> to vector<8x16x32xbf16>
    %137 = vector.extract_strided_slice %129 {offsets = [0, 0], sizes = [32, 128], strides = [1, 1]} : vector<32x256xf32> to vector<32x128xf32>
    %138 = vector.shape_cast %137 : vector<32x128xf32> to vector<2x16x128xf32>
    %139 = vector.extract_strided_slice %138 {offsets = [0, 0, 0], sizes = [2, 16, 32], strides = [1, 1, 1]} : vector<2x16x128xf32> to vector<2x16x32xf32>
    %140 = vector.extract_strided_slice %138 {offsets = [0, 0, 32], sizes = [2, 16, 32], strides = [1, 1, 1]} : vector<2x16x128xf32> to vector<2x16x32xf32>
    %141 = vector.extract_strided_slice %138 {offsets = [0, 0, 64], sizes = [2, 16, 32], strides = [1, 1, 1]} : vector<2x16x128xf32> to vector<2x16x32xf32>
    %142 = vector.extract_strided_slice %138 {offsets = [0, 0, 96], sizes = [2, 16, 32], strides = [1, 1, 1]} : vector<2x16x128xf32> to vector<2x16x32xf32>
    %143 = tpu.concatenate %139, %140, %141, %142 in 0 : vector<2x16x32xf32>, vector<2x16x32xf32>, vector<2x16x32xf32>, vector<2x16x32xf32> -> vector<8x16x32xf32>
    %144 = arith.truncf %143 : vector<8x16x32xf32> to vector<8x16x32xbf16>
    %145 = vector.extract_strided_slice %129 {offsets = [0, 128], sizes = [32, 128], strides = [1, 1]} : vector<32x256xf32> to vector<32x128xf32>
    %146 = vector.shape_cast %145 : vector<32x128xf32> to vector<2x16x128xf32>
    %147 = vector.extract_strided_slice %146 {offsets = [0, 0, 0], sizes = [2, 16, 32], strides = [1, 1, 1]} : vector<2x16x128xf32> to vector<2x16x32xf32>
    %148 = vector.extract_strided_slice %146 {offsets = [0, 0, 32], sizes = [2, 16, 32], strides = [1, 1, 1]} : vector<2x16x128xf32> to vector<2x16x32xf32>
    %149 = vector.extract_strided_slice %146 {offsets = [0, 0, 64], sizes = [2, 16, 32], strides = [1, 1, 1]} : vector<2x16x128xf32> to vector<2x16x32xf32>
    %150 = vector.extract_strided_slice %146 {offsets = [0, 0, 96], sizes = [2, 16, 32], strides = [1, 1, 1]} : vector<2x16x128xf32> to vector<2x16x32xf32>
    %151 = tpu.concatenate %147, %148, %149, %150 in 0 : vector<2x16x32xf32>, vector<2x16x32xf32>, vector<2x16x32xf32>, vector<2x16x32xf32> -> vector<8x16x32xf32>
    %152 = arith.truncf %151 : vector<8x16x32xf32> to vector<8x16x32xbf16>
    "tpu.trace_start"() <{level = 10 : i32, message = "nqd,nkd->nqk"}> : () -> ()
    %cst_36 = arith.constant dense<0.000000e+00> : vector<8x16x16xf32>
    %153 = tpu.matmul %136, %144, %cst_36 {dimension_numbers = #tpu.dot_dimension_numbers<[2], [2], [1], [1], [0, 0, 0, 1, 1, 1], [0], [0]>} : vector<8x16x32xbf16>, vector<8x16x32xbf16>, vector<8x16x16xf32> -> vector<8x16x16xf32>
    "tpu.trace_stop"() : () -> ()
    %cst_37 = arith.constant dense<0xFF800000> : vector<8x16xf32>
    %154 = vector.multi_reduction <maximumf>, %153, %cst_37 [2] : vector<8x16x16xf32> to vector<8x16xf32>
    %155 = vector.shape_cast %154 : vector<8x16xf32> to vector<8x16x1xf32>
    %156 = vector.broadcast %155 : vector<8x16x1xf32> to vector<8x16x16xf32>
    %157 = arith.subf %153, %156 : vector<8x16x16xf32>
    %158 = math.exp %157 : vector<8x16x16xf32>
    %cst_38 = arith.constant dense<0.000000e+00> : vector<8x16xf32>
    %159 = vector.multi_reduction <add>, %158, %cst_38 [2] : vector<8x16x16xf32> to vector<8x16xf32>
    %160 = vector.shape_cast %159 : vector<8x16xf32> to vector<8x16x1xf32>
    %161 = tpu.reciprocal %160 {approx = true} : vector<8x16x1xf32> -> vector<8x16x1xf32>
    %162 = vector.broadcast %161 : vector<8x16x1xf32> to vector<8x16x16xf32>
    %163 = arith.mulf %158, %162 : vector<8x16x16xf32>
    %164 = arith.truncf %163 : vector<8x16x16xf32> to vector<8x16x16xbf16>
    "tpu.trace_start"() <{level = 10 : i32, message = "nqk,nkd->nqd"}> : () -> ()
    %cst_39 = arith.constant dense<0.000000e+00> : vector<8x16x32xf32>
    %165 = tpu.matmul %164, %152, %cst_39 {dimension_numbers = #tpu.dot_dimension_numbers<[2], [1], [1], [2], [0, 0, 0, 1, 1, 2], [0], [0]>} : vector<8x16x16xbf16>, vector<8x16x32xbf16>, vector<8x16x32xf32> -> vector<8x16x32xf32>
    "tpu.trace_stop"() : () -> ()
    %166 = vector.extract_strided_slice %165 {offsets = [0, 0, 0], sizes = [2, 16, 32], strides = [1, 1, 1]} : vector<8x16x32xf32> to vector<2x16x32xf32>
    %167 = vector.extract_strided_slice %165 {offsets = [2, 0, 0], sizes = [2, 16, 32], strides = [1, 1, 1]} : vector<8x16x32xf32> to vector<2x16x32xf32>
    %168 = vector.extract_strided_slice %165 {offsets = [4, 0, 0], sizes = [2, 16, 32], strides = [1, 1, 1]} : vector<8x16x32xf32> to vector<2x16x32xf32>
    %169 = vector.extract_strided_slice %165 {offsets = [6, 0, 0], sizes = [2, 16, 32], strides = [1, 1, 1]} : vector<8x16x32xf32> to vector<2x16x32xf32>
    %170 = tpu.concatenate %166, %167, %168, %169 in 2 : vector<2x16x32xf32>, vector<2x16x32xf32>, vector<2x16x32xf32>, vector<2x16x32xf32> -> vector<2x16x128xf32>
    %171 = vector.shape_cast %170 : vector<2x16x128xf32> to vector<32x128xf32>
    %172 = arith.truncf %171 : vector<32x128xf32> to vector<32x128xbf16>
    %173 = vector.extract_strided_slice %9 {offsets = [0, 896], sizes = [128, 128], strides = [1, 1]} : vector<128x1536xbf16> to vector<128x128xbf16>
    %cst_40 = arith.constant dense<0.000000e+00> : vector<32x128xf32>
    %174 = tpu.matmul %172, %173, %cst_40 {dimension_numbers = #tpu.dot_dimension_numbers<[1], [0], [0], [1], [0, 0, 1, 1], [], []>} : vector<32x128xbf16>, vector<128x128xbf16>, vector<32x128xf32> -> vector<32x128xf32>
    %175 = vector.extract_strided_slice %13 {offsets = [7, 0], sizes = [1, 128], strides = [1, 1]} : vector<9x128xf32> to vector<1x128xf32>
    %176 = vector.broadcast %175 : vector<1x128xf32> to vector<32x128xf32>
    %177 = arith.addf %174, %176 : vector<32x128xf32>
    %178 = arith.addf %100, %177 : vector<32x128xf32>
    %179 = vector.extract_strided_slice %13 {offsets = [4, 0], sizes = [1, 128], strides = [1, 1]} : vector<9x128xf32> to vector<1x128xf32>
    %180 = vector.extract_strided_slice %13 {offsets = [5, 0], sizes = [1, 128], strides = [1, 1]} : vector<9x128xf32> to vector<1x128xf32>
    %cst_41 = arith.constant dense<0.000000e+00> : vector<32xf32>
    %181 = vector.multi_reduction <add>, %178, %cst_41 [1] : vector<32x128xf32> to vector<32xf32>
    %182 = vector.shape_cast %181 : vector<32xf32> to vector<32x1xf32>
    %cst_42 = arith.constant 1.280000e+02 : f32
    %183 = vector.broadcast %cst_42 : f32 to vector<32x1xf32>
    %184 = arith.divf %182, %183 : vector<32x1xf32>
    %185 = vector.broadcast %184 : vector<32x1xf32> to vector<32x128xf32>
    %186 = arith.subf %178, %185 : vector<32x128xf32>
    %187 = arith.mulf %186, %186 : vector<32x128xf32>
    %cst_43 = arith.constant dense<0.000000e+00> : vector<32xf32>
    %188 = vector.multi_reduction <add>, %187, %cst_43 [1] : vector<32x128xf32> to vector<32xf32>
    %189 = vector.shape_cast %188 : vector<32xf32> to vector<32x1xf32>
    %cst_44 = arith.constant 1.280000e+02 : f32
    %190 = vector.broadcast %cst_44 : f32 to vector<32x1xf32>
    %191 = arith.divf %189, %190 : vector<32x1xf32>
    %192 = vector.broadcast %184 : vector<32x1xf32> to vector<32x128xf32>
    %193 = arith.subf %178, %192 : vector<32x128xf32>
    %cst_45 = arith.constant 9.99999974E-6 : f32
    %194 = vector.broadcast %cst_45 : f32 to vector<32x1xf32>
    %195 = arith.addf %191, %194 : vector<32x1xf32>
    %196 = math.rsqrt %195 : vector<32x1xf32>
    %197 = vector.broadcast %196 : vector<32x1xf32> to vector<32x128xf32>
    %198 = arith.mulf %193, %197 : vector<32x128xf32>
    %199 = vector.broadcast %179 : vector<1x128xf32> to vector<32x128xf32>
    %200 = arith.mulf %198, %199 : vector<32x128xf32>
    %201 = vector.broadcast %180 : vector<1x128xf32> to vector<32x128xf32>
    %202 = arith.addf %200, %201 : vector<32x128xf32>
    %203 = arith.truncf %202 : vector<32x128xf32> to vector<32x128xbf16>
    %204 = vector.extract_strided_slice %9 {offsets = [0, 1024], sizes = [128, 512], strides = [1, 1]} : vector<128x1536xbf16> to vector<128x512xbf16>
    %cst_46 = arith.constant dense<0.000000e+00> : vector<32x512xf32>
    %205 = tpu.matmul %203, %204, %cst_46 {dimension_numbers = #tpu.dot_dimension_numbers<[1], [0], [0], [1], [0, 0, 1, 1], [], []>} : vector<32x128xbf16>, vector<128x512xbf16>, vector<32x512xf32> -> vector<32x512xf32>
    %206 = vector.broadcast %15 : vector<1x512xf32> to vector<32x512xf32>
    %207 = arith.addf %205, %206 : vector<32x512xf32>
    %cst_47 = arith.constant 5.000000e-01 : f32
    %208 = vector.broadcast %cst_47 : f32 to vector<32x512xf32>
    %209 = arith.mulf %208, %207 : vector<32x512xf32>
    %cst_48 = arith.constant 4.471500e-02 : f32
    %210 = vector.broadcast %cst_48 : f32 to vector<32x512xf32>
    %211 = arith.mulf %210, %207 : vector<32x512xf32>
    %212 = arith.mulf %211, %207 : vector<32x512xf32>
    %213 = arith.mulf %212, %207 : vector<32x512xf32>
    %214 = arith.addf %207, %213 : vector<32x512xf32>
    %cst_49 = arith.constant 0.797884583 : f32
    %215 = vector.broadcast %cst_49 : f32 to vector<32x512xf32>
    %216 = arith.mulf %215, %214 : vector<32x512xf32>
    %217 = math.tanh %216 : vector<32x512xf32>
    %cst_50 = arith.constant 1.000000e+00 : f32
    %218 = vector.broadcast %cst_50 : f32 to vector<32x512xf32>
    %219 = arith.addf %218, %217 : vector<32x512xf32>
    %220 = arith.mulf %209, %219 : vector<32x512xf32>
    %221 = arith.truncf %220 : vector<32x512xf32> to vector<32x512xbf16>
    %cst_51 = arith.constant dense<0.000000e+00> : vector<32x128xf32>
    %222 = tpu.matmul %221, %11, %cst_51 {dimension_numbers = #tpu.dot_dimension_numbers<[1], [0], [0], [1], [0, 0, 1, 1], [], []>} : vector<32x512xbf16>, vector<512x128xbf16>, vector<32x128xf32> -> vector<32x128xf32>
    %223 = vector.extract_strided_slice %13 {offsets = [8, 0], sizes = [1, 128], strides = [1, 1]} : vector<9x128xf32> to vector<1x128xf32>
    %224 = vector.broadcast %223 : vector<1x128xf32> to vector<32x128xf32>
    %225 = arith.addf %222, %224 : vector<32x128xf32>
    %226 = arith.addf %178, %225 : vector<32x128xf32>
    %227 = vector.shape_cast %226 : vector<32x128xf32> to vector<2x16x128xf32>
    %c0_52 = arith.constant 0 : index
    %c0_53 = arith.constant 0 : index
    %c0_54 = arith.constant 0 : index
    %228 = vector.load %arg8[%c0_52, %c0_53, %c0_54] : memref<2x16x128xf32, #tpu.memory_space<vmem>>, vector<2x16x128xf32>
    tpu.vector_store %arg8[%c0_52, %c0_53, %c0_54], %227 {strides = array<i32>} : memref<2x16x128xf32, #tpu.memory_space<vmem>>, vector<2x16x128xf32>,
    return
  }
  func.func @transform_0(%arg0: i32, %arg1: i32) -> (i32, i32, i32) {
    %c0_i32 = arith.constant 0 : i32
    %c0_i32_0 = arith.constant 0 : i32
    %c0_i32_1 = arith.constant 0 : i32
    return %arg0, %c0_i32, %c0_i32_0 : i32, i32, i32
  }
  func.func @transform_1(%arg0: i32, %arg1: i32) -> (i32, i32, i32) {
    %c0_i32 = arith.constant 0 : i32
    %c0_i32_0 = arith.constant 0 : i32
    %c0_i32_1 = arith.constant 0 : i32
    return %arg0, %c0_i32, %c0_i32_0 : i32, i32, i32
  }
  func.func @transform_2(%arg0: i32, %arg1: i32) -> (i32, i32, i32) {
    %c0_i32 = arith.constant 0 : i32
    %c0_i32_0 = arith.constant 0 : i32
    %c0_i32_1 = arith.constant 0 : i32
    return %arg1, %c0_i32, %c0_i32_0 : i32, i32, i32
  }
  func.func @transform_3(%arg0: i32, %arg1: i32) -> (i32, i32, i32) {
    %c0_i32 = arith.constant 0 : i32
    %c0_i32_0 = arith.constant 0 : i32
    %c0_i32_1 = arith.constant 0 : i32
    return %arg1, %c0_i32, %c0_i32_0 : i32, i32, i32
  }
  func.func @transform_4(%arg0: i32, %arg1: i32) -> (i32, i32, i32) {
    %c0_i32 = arith.constant 0 : i32
    %c0_i32_0 = arith.constant 0 : i32
    %c0_i32_1 = arith.constant 0 : i32
    return %arg1, %c0_i32, %c0_i32_0 : i32, i32, i32
  }
  func.func @transform_5(%arg0: i32, %arg1: i32) -> (i32, i32, i32) {
    %c0_i32 = arith.constant 0 : i32
    %c0_i32_0 = arith.constant 0 : i32
    %c0_i32_1 = arith.constant 0 : i32
    return %arg1, %c0_i32, %c0_i32_0 : i32, i32, i32
  }
  func.func @transform_6(%arg0: i32, %arg1: i32) -> (i32, i32, i32) {
    %c0_i32 = arith.constant 0 : i32
    %c0_i32_0 = arith.constant 0 : i32
    %c0_i32_1 = arith.constant 0 : i32
    return %arg0, %c0_i32, %c0_i32_0 : i32, i32, i32
  }
}

</mosaic_0001>

<bundles_post_ra>
// kernel: tpu_custom_call.1
= control target key start
LH: loop header
LB: loop body
LE: loop exit
PB: predicated region body
PF: predicated region fallthrough
CT: control target
= control target key end

     0   :  { %11 = vsyncpa [#allocation3], 0  ;;  %s7373_s0 = inlined_call_operand.vmem [shape: f32[2,16,128], index: 0, kind: input, shape index: {}]   ;;  %s7374_s1 = inlined_call_operand.hbm [shape: f32[2,16,128], index: 1, kind: input, shape index: {}]   ;;  %s7375_s2 = inlined_call_operand.hbm [shape: bf16[2,128,1536], index: 2, kind: input, shape index: {}]   ;;  %s7376_s3 = inlined_call_operand.hbm [shape: bf16[2,512,128], index: 3, kind: input, shape index: {}]   ;;  %s7377_s4 = inlined_call_operand.vmem [shape: f32[2,9,128], index: 4, kind: input, shape index: {}]   ;;  %s7378_s5 = inlined_call_operand.vmem [shape: f32[2,1,512], index: 5, kind: input, shape index: {}]   ;;  %s7379_s6 = inlined_call_operand.hbm [shape: f32[2,16,128], index: 6, kind: output, shape index: {}]  }
   0x1   :  { %12 = vsyncpa [#allocation6], 0 }
   0x2   :  { %14 = vsyncpa [#allocation6 + $0x1], 0 }
   0x3   :  { %15 = vsyncpa [#allocation4], 0  ;;  %s6101_s21 = smov 0   ;;  %s6103_s22 = smov 0  }
   0x4   :  { %s6105_s23 = smov 0   ;;  %s6107_s24 = smov 0  }
   0x5   :  { %s6109_s25 = smov 0   ;;  %s6111_s26 = smov 0  }
   0x6 LB: > { %s30_s27 = sadd.s32 1, %s6042_s25  ;;  %s92_s28 = sadd.s32 1, %s6034_s23  ;;  %s6046_s26 = sphi %s6111_s26, %s21_s26   ;;  %s6042_s25 = sphi %s6109_s25, %s7392_s25   ;;  %s6038_s24 = sphi %s6107_s24, %s7391_s24   ;;  %s6034_s23 = sphi %s6105_s23, %s7390_s23   ;;  %s6030_s22 = sphi %s6103_s22, %s7389_s22   ;;  %s6026_s21 = sphi %s6101_s21, %s7388_s21  }
   0x7   : > { %p31_p0 = scmp.ge.s32.totalorder %s30_s27, 2  ;;  %p99_p1 = scmp.ne.s32.totalorder %s6034_s23, %s6030_s22 }
   0x8   : > { %p100_p2 = scmp.eq.s32.totalorder %s6046_s26, 0  ;;  %p5208_p4 = scmp.lt.s32.totalorder %s6046_s26, 2 }
   0x9   : > { %s7394_s27 = smov (%p31_p0, %s30_s27), 0  ;;  %s260_s30 = sand.u32 1, %s6046_s26  }
   0xa   : > { %p101_p3 = por %p100_p2, %p99_p1  ;;  %s89_s29 = ssub.s32 %s6042_s25, %s7394_s27 }
   0xb   : > { %p90_p5 = scmp.eq.s32.totalorder %s89_s29, 0  ;;  %s262_s7 = sand.u32 1, %s6034_s23  }
   0xc   : > { %s5182_s8 = smul.u32 12288, %s6042_s25  ;;  %p6150_p6 = pnand %p5208_p4, %p101_p3 }
   0xd   : > { %s6145_s9 = scalar_select %p90_p5, %s6034_s23, %s92_s28  }
   0xe   : > { %s5181_s10 = smul.u32 768, %s262_s7  ;;  %s270_s13 = scalar_lea.hbm %s7375_s2, %s5182_s8 }
   0xf   : > { %s6154_s17 = sshll.u32 %s262_s7, 8  ;;  %s6156_s18 = scalar_lea.sflag [#allocation6], %s260_s30 }
  0x10   : > { %s264_s15 = scalar_lea.vmem [#allocation5], %s5181_s10  ;;  %p5884_p7 = pneg %p6150_p6 }
  0x11   : > { %s271_s16 = sshll.u32 %s264_s15, 4  ;;  %s6048_s20 = smov [#allocation5]   ;;  %s272_s16 = int_to_ptr.vmem [resolvable:$true] %s271_s16 }
  0x12   : > { %s5895_s19 = scalar_lea.vmem %s272_s16, 12288  ;;  %s5900_s28 = sshll.u32 %s6048_s20, 4  ;;  %s5901_s28 = int_to_ptr.vmem [resolvable:$false] %s5900_s28 }
  0x13   : > { %p5896_p8 = scmp.ne.s32.totalorder %s272_s16, %s5895_s19  ;;  %s5902_s29 = scalar_lea.vmem %s5901_s28, 24576 }
  0x14   : > { %p5903_p11 = scmp.lt.s32.totalorder %s272_s16, %s5901_s28  ;;  %p5904_p12 = scmp.lt.s32.totalorder %s5902_s29, %s5895_s19 }
  0x15   : > { %p5898_p9 = pnand %p5896_p8, %p5884_p7 }
  0x16   : > { %p5905_p13 = por %p5904_p12, %p5903_p11 }
  0x17   : > { %p5899_p10 = pneg %p5898_p9 }
  0x19   : > { %p5906_p0 = pnand %p5905_p13, %p5899_p10 }
  0x1b   : > { %5909 = shalt.err (!%p5906_p0)
}
  0x1c   : > { %s6049_s7 = smov 768   ;;  %s6050_s30 = smov 48  }
  0x1d   : > { %5203 = dma.hbm_to_vmem [thread:$0]  (!%p6150_p6), %s270_s13, 12288, %s272_s16, %s6156_s18, %s6049_s7, %s6049_s7, %s6050_s30  }
  0x1e   : > { %s6167_s8 = sadd.s32 4294967295, %s6046_s26   ;;  %p105_p1 = scmp.ne.s32.totalorder %s6030_s22, %s6026_s21 }
  0x1f   : > { %p106_p2 = scmp.eq.s32.totalorder %s6167_s8, 0  ;;  %p4567_p3 = scmp.ge.s32.totalorder %s6046_s26, 1 }
  0x20   : > { %p220_p4 = scmp.lt.s32.totalorder %s6046_s26, 3  ;;  %s6051_s12 = smov [#allocation2]  }
  0x21   : > { %p6176_p5 = por %p106_p2, %p105_p1  ;;  %s246_s13 = sshll.u32 %s6051_s12, 4  ;;  %s247_s13 = int_to_ptr.vmem [resolvable:$true] %s246_s13 }
  0x22   : > { %p6180_p8 = pnand %p4567_p3, %p220_p4  ;;  %s4747_s15 = sshll.u32 %s6042_s25, 12 }
  0x23   : > { %s6196_s20 = scalar_lea.hbm %s7376_s3, %s4747_s15  ;;  %s285_s28 = scalar_lea.vmem [#allocation7], %s6154_s17 }
  0x24   : > { %p5196_p9 = pneg %p6180_p8  ;;  %s292_s29 = sshll.u32 %s285_s28, 4  ;;  %s6199_s29 = int_to_ptr.vmem [resolvable:$true] %s292_s29 }
  0x25   : > { %s5921_s7 = scalar_lea.vmem %s247_s13, 512  ;;  %p5929_p1 = scmp.lt.s32.totalorder %s247_s13, %s247_s13 }
  0x26   : > { %p6189_p10 = pnand %p5196_p9, %p106_p2  ;;  %p5922_p12 = scmp.ne.s32.totalorder %s247_s13, %s5921_s7 }
  0x27   : > { %p5930_p3 = scmp.lt.s32.totalorder %s5921_s7, %s5921_s7 }
  0x28   : > { %p5912_p11 = pneg %p6189_p10 }
  0x29   : > { %p5931_p4 = por %p5930_p3, %p5929_p1 }
  0x2a   : > { %p5924_p13 = pnand %p5922_p12, %p5912_p11 }
  0x2c   : > { %p5925_p0 = pneg %p5924_p13 }
  0x2e   : > { %p5932_p9 = pnand %p5931_p4, %p5925_p0 }
  0x30   : > { %5935 = shalt.err (!%p5932_p9)
}
  0x31   : > { %s6052_s30 = smov 128   ;;  %s6053_s17 = smov 8  }
  0x32   : > { %5199 = dma.hbm_to_vmem [thread:$0]  (!%p6189_p10), %s7374_s1, 512, %s247_s13, [#allocation3], %s6052_s30, %s6052_s30, %s6053_s17  }
  0x33   : > { %s5949_s16 = scalar_lea.vmem %s6199_s29, 4096  ;;  %s6054_s19 = smov [#allocation7]  }
  0x34   : > { %p5950_p11 = scmp.ne.s32.totalorder %s6199_s29, %s5949_s16  ;;  %s5954_s28 = sshll.u32 %s6054_s19, 4  ;;  %s5955_s28 = int_to_ptr.vmem [resolvable:$false] %s5954_s28 }
  0x35   : > { %s5956_s7 = scalar_lea.vmem %s5955_s28, 8192  ;;  %p5957_p0 = scmp.lt.s32.totalorder %s6199_s29, %s5955_s28 }
  0x36   : > { %p5952_p12 = pnand %p5950_p11, %p5884_p7  ;;  %p5958_p1 = scmp.lt.s32.totalorder %s5956_s7, %s5949_s16 }
  0x38   : > { %p5953_p13 = pneg %p5952_p12  ;;  %p5959_p3 = por %p5958_p1, %p5957_p0 }
  0x3a   : > { %p5960_p4 = pnand %p5959_p3, %p5953_p13 }
  0x3c   : > { %5963 = shalt.err (!%p5960_p4)
}
  0x3d   : > { %s6055_s21 = smov 64   ;;  %s6056_s13 = smov 4  }
  0x3e   : > { %5206 = dma.hbm_to_vmem [thread:$0]  (!%p6150_p6), %s6196_s20, 4096, %s6199_s29, %s6156_s18, %s6055_s21, %s6055_s21, %s6056_s13  }
  0x3f   : > { %319 = sbr.rel (%p6180_p8) target bundleno = 4384 (0x1120), region = 44 }
  0x44   : > { %6013 = dma.done.wait (%p106_p2), [#allocation3], 512  }
  0x45   : > { %6015 = vsyncadd (%p106_p2), [#allocation3], 4294966784  ;;  %s325_s30 = sand.u32 1, %s6167_s8   ;;  %s327_s17 = sand.u32 1, %s6030_s22  }
  0x46   : > { %s5183_s12 = smul.u32 768, %s327_s17  ;;  %s326_s15 = scalar_lea.sflag [#allocation6], %s325_s30 }
  0x48   : > { %s6227_s16 = scalar_lea.vmem [#allocation5], %s5183_s12 }
  0x49   : > { %6017 = dma.done.wait (%p6176_p5), %s326_s15, 16384  }
  0x4a   : > { %6019 = vsyncadd (%p6176_p5), %s326_s15, 4294950912  ;;  %s4577_s14 = sshll.u32 %s327_s17, 8  ;;  %p390_p6 = scmp.lt.s32.totalorder %s6038_s24, 1 }
  0x4b   : > { %s6245_s30 = scalar_lea.vmem [#allocation7], %s4577_s14  ;;  %p4581_p7 = scmp.ne.s32.totalorder %s6038_s24, 0 }
  0x4c   : > { %s391_s18 = scalar_select %p390_p6, %s6038_s24, 1 }
  0x4d   : > { %404 = sbr.rel (%p4581_p7) target bundleno = 85 (0x55), region = 60 }
  0x4e   : > { %s4748_s11 = sshll.u32 %s391_s18, 4  ;;  %s4580_s20 = sshll.u32 %s391_s18, 2 }
  0x4f   : > { %s6238_s28 = scalar_lea.vmem %s7377_s4, %s4748_s11  ;;  %s6243_s13 = scalar_lea.vmem %s7378_s5, %s4580_s20 }
  0x52   : > { %v405_v0 = vld [vmem:[%s7373_s0] sm:$0xff]  ;;  %v406_v1 = vld [vmem:[%s7373_s0 + $0x8] sm:$0xff]  ;;  %v407_v2 = vld [vmem:[%s7373_s0 + $0x10] sm:$0xff] }
  0x53   : > { %409 = vst [vmem:[#allocation8] sm:$0xff] %v405_v0  ;;  %410 = vst [vmem:[#allocation8 + $0x8] sm:$0xff] %v406_v1  ;;  %v408_v3 = vld [vmem:[%s7373_s0 + $0x18] sm:$0xff] }
  0x54   : > { %411 = vst [vmem:[#allocation8 + $0x10] sm:$0xff] %v407_v2  ;;  %412 = vst [vmem:[#allocation8 + $0x18] sm:$0xff] %v408_v3 }
  0x55 PF: > { %v5516_v8 = vld [vmem:[%s6227_s16 + $0x2a4] ss:$48 sps:$4 sm:$0xff]   ;;  %v5518_v9 = vld [vmem:[%s6227_s16 + $0x2a0] ss:$48 sps:$4 sm:$0xff]   ;;  %v5521_v27 = vld [vmem:[%s6227_s16 + $0x2a8] ss:$48 sps:$4 sm:$0xff]   ;;  %v586_v58 = vlaneseq }
  0x56   : > { %784 = vmatprep.subr.bf16.mxu0 %v5516_v8  ;;  %v5519_v26 = vld [vmem:[%s6227_s16 + $0x244] ss:$48 sps:$4 sm:$0xff]   ;;  %v5524_v28 = vld [vmem:[%s6227_s16 + $0x240] ss:$48 sps:$4 sm:$0xff]   ;;  %4909 = vmatprep.subr.bf16.mxu1 %v5521_v27  ;;  %v5527_v30 = vld [vmem:[%s6227_s16 + $0x248] ss:$48 sps:$4 sm:$0xff]  }
  0x57   : > { %785 = vmatpush1.bf16.msra.mxu0 %v5518_v9  ;;  %4910 = vmatpush3.bf16.msra.mxu1 %v5521_v27  ;;  %v5525_v29 = vld [vmem:[%s6227_s16 + $0x1e4] ss:$48 sps:$4 sm:$0xff]   ;;  %v5529_v31 = vld [vmem:[%s6227_s16 + $0x1e0] ss:$48 sps:$4 sm:$0xff]   ;;  %v5532_v33 = vld [vmem:[%s6227_s16 + $0x1e8] ss:$48 sps:$4 sm:$0xff]  }
  0x58   : > { %786 = vmatprep.subr.bf16.mxu0 %v5519_v26  ;;  %4911 = vmatprep.subr.bf16.mxu1 %v5527_v30  ;;  %v5530_v32 = vld [vmem:[%s6227_s16 + $0x184] ss:$48 sps:$4 sm:$0xff]   ;;  %v5534_v34 = vld [vmem:[%s6227_s16 + $0x180] ss:$48 sps:$4 sm:$0xff]   ;;  %v5537_v36 = vld [vmem:[%s6227_s16 + $0x188] ss:$48 sps:$4 sm:$0xff]  }
  0x59   : > { %v5535_v35 = vld [vmem:[%s6227_s16 + $0x124] ss:$48 sps:$4 sm:$0xff]   ;;  %v5539_v37 = vld [vmem:[%s6227_s16 + $0x120] ss:$48 sps:$4 sm:$0xff]   ;;  %v5542_v39 = vld [vmem:[%s6227_s16 + $0x128] ss:$48 sps:$4 sm:$0xff]  }
  0x5a   : > { %v413_v4 = vld [vmem:[#allocation8] sm:$0xff]  ;;  %v414_v6 = vld [vmem:[#allocation8 + $0x8] sm:$0xff]  ;;  %v6057_v43 = vmov 0   ;;  %v6302_v62 = vshrl.u32 %v586_v58, 7  ;;  %vm6059_vm0 = vmmov 0   ;;  %vm1030_vm1 = vcmask 261120  }
  0x5b   : > { %v415_v5 = vld [vmem:[#allocation8 + $0x10] sm:$0xff]  ;;  %593 = vadd.xlane.f32.xlu0 %v413_v4  ;;  %v416_v7 = vld [vmem:[#allocation8 + $0x18] sm:$0xff]  ;;  %787 = vmatpush1.bf16.msra.mxu0 %v5524_v28  ;;  %v583_v0 = vld [vmem:[%s6238_s28] sm:$0xff]  ;;  %s6060_s24 = smov 96   ;;  %s6061_s29 = smov 64   ;;  %vm1427_vm3 = vcmask 130048  }
  0x5c   : > { %597 = vadd.xlane.f32.xlu1 %v415_v5  ;;  %788 = vmatprep.subr.bf16.mxu0 %v5525_v29  ;;  %v5540_v38 = vld [vmem:[%s6227_s16 + $0xc4] ss:$48 sps:$4 sm:$0xff]   ;;  %v5544_v40 = vld [vmem:[%s6227_s16 + $0xc0] ss:$48 sps:$4 sm:$0xff]   ;;  %v5547_v42 = vld [vmem:[%s6227_s16 + $0xc8] ss:$48 sps:$4 sm:$0xff]  }
  0x5d   : > { %4912 = vmatpush3.bf16.msra.mxu1 %v5527_v30  ;;  %v5545_v41 = vld [vmem:[%s6227_s16 + $0x64] ss:$48 sps:$4 sm:$0xff]   ;;  %816 = vmatprep.mubr.bf16.mxu0 %v6057_v43  ;;  %v5549_v44 = vld [vmem:[%s6227_s16 + $0x60] ss:$48 sps:$4 sm:$0xff]   ;;  %v5552_v46 = vld [vmem:[%s6227_s16 + $0x68] ss:$48 sps:$4 sm:$0xff]  }
  0x5e   : > { %4913 = vmatprep.subr.bf16.mxu1 %v5532_v33  ;;  %v5550_v45 = vld [vmem:[%s6227_s16 + $0x4] ss:$48 sps:$4 sm:$0xff]   ;;  %v5554_v47 = vld [vmem:[%s6227_s16] ss:$48 sps:$4 sm:$0xff]   ;;  %v5555_v48 = vld [vmem:[%s6227_s16 + $0x8] ss:$48 sps:$4 sm:$0xff]  }
  0x5f   : > { %595 = vadd.xlane.f32.xlu0 %v414_v6  ;;  %789 = vmatpush1.bf16.msra.mxu0 %v5529_v31  ;;  %v640_v63 = vsub.s32 0, %v6302_v62  ;;  %s6062_s19 = smov 32   ;;  %vm2016_vm5 = vcmask 523264   ;;  %vm2021_vm6 = vcmask 785408   ;;  %p5210_p2 = scmp.eq.s32.totalorder %s6167_s8, 1 }
  0x60   : > { %599 = vadd.xlane.f32.xlu1 %v416_v7  ;;  %790 = vmatprep.subr.bf16.mxu0 %v5530_v32 }
  0x61   : > { %4914 = vmatpush3.bf16.msra.mxu1 %v5532_v33  ;;  %v641_v3 = vrot.slane %v583_v0, %v640_v63 }
  0x62   : > { %4915 = vmatprep.subr.bf16.mxu1 %v5537_v36 }
  0x63   : > { %791 = vmatpush1.bf16.msra.mxu0 %v5534_v34 }
  0x64   : > { %792 = vmatprep.subr.bf16.mxu0 %v5535_v35 }
  0x65   : > { %4916 = vmatpush3.bf16.msra.mxu1 %v5537_v36 }
  0x66   : > { %4917 = vmatprep.subr.bf16.mxu1 %v5542_v39 }
  0x67   : > { %793 = vmatpush1.bf16.msra.mxu0 %v5539_v37 }
  0x68   : > { %794 = vmatprep.subr.bf16.mxu0 %v5540_v38 }
  0x69   : > { %4918 = vmatpush3.bf16.msra.mxu1 %v5542_v39 }
  0x6a   : > { %4919 = vmatprep.subr.bf16.mxu1 %v5547_v42 }
  0x6b   : > { %795 = vmatpush1.bf16.msra.mxu0 %v5544_v40 }
  0x6c   : > { %796 = vmatprep.subr.bf16.mxu0 %v5545_v41 }
  0x6d   : > { %4920 = vmatpush3.bf16.msra.mxu1 %v5547_v42 }
  0x6e   : > { %4921 = vmatprep.subr.bf16.mxu1 %v5552_v46 }
  0x6f   : > { %797 = vmatpush1.bf16.msra.mxu0 %v5549_v44 }
  0x70   : > { %798 = vmatprep.subr.bf16.mxu0 %v5550_v45 }
  0x71   : > { %4922 = vmatpush3.bf16.msra.mxu1 %v5552_v46 }
  0x72   : > { %4923 = vmatprep.subr.bf16.mxu1 %v5555_v48 }
  0x73   : > { %799 = vmatpush1.bf16.msra.mxu0 %v5554_v47 }
  0x75   : > { %4924 = vmatpush3.bf16.msra.mxu1 %v5555_v48 }
  0xe4   : > { %v594_v10 = vpop.xlane.xlu0 %593 }
  0xe5   : > { %v598_v11 = vpop.xlane.xlu1 %597  ;;  %v602_v12 = vmul.f32 0.0078125, %v594_v10 }
  0xe6   : > { %v604_v13 = vmul.f32 0.0078125, %v598_v11 }
  0xe7   : > { %v6262_v14 = vsub.f32 %v413_v4, %v602_v12  ;;  %v648_v4 = vsub.s32 1, %v6302_v62 }
  0xe8   : > { %v6264_v15 = vsub.f32 %v415_v5, %v604_v13  ;;  %v596_v16 = vpop.xlane.xlu0 %595 }
  0xe9   : > { %v600_v17 = vpop.xlane.xlu1 %599  ;;  %v603_v18 = vmul.f32 0.0078125, %v596_v16  ;;  %v610_v19 = vmul.f32 %v6262_v14, %v6262_v14  ;;  %v649_v9 = vrot.slane %v583_v0, %v648_v4 }
  0xea   : > { %v605_v20 = vmul.f32 0.0078125, %v600_v17  ;;  %v612_v21 = vmul.f32 %v6264_v15, %v6264_v15 }
  0xeb   : > { %614 = vadd.xlane.f32.xlu0 %v610_v19  ;;  %v6270_v22 = vsub.f32 %v414_v6, %v603_v18 }
  0xec   : > { %v6272_v23 = vsub.f32 %v416_v7, %v605_v20 }
  0xed   : > { %v611_v24 = vmul.f32 %v6270_v22, %v6270_v22 }
  0xee   : > { %v613_v25 = vmul.f32 %v6272_v23, %v6272_v23 }
  0xef   : > { %618 = vadd.xlane.f32.xlu0 %v612_v21  ;;  %616 = vadd.xlane.f32.xlu1 %v611_v24  ;;  %v6058_v24 = vmov 0.0  }
  0xf0   : > { %4929 = vmatprep.subr.bf16.mxu1 %v6058_v24  ;;  %4959 = vmatprep.subr.bf16.mxu0 %v6058_v24 }
  0xf3   : > { %620 = vadd.xlane.f32.xlu1 %v613_v25 }
 0x174   : > { %v615_v49 = vpop.xlane.xlu0 %614 }
 0x175   : > { %v622_v50 = vmul.f32 0.0078125, %v615_v49 }
 0x177   : > { %v626_v51 = vadd.f32 1e-05, %v622_v50 }
 0x178   : > { %v617_v52 = vpop.xlane.xlu1 %616  ;;  %v619_v53 = vpop.xlane.xlu0 %618 }
 0x179   : > { %5692 = vrsqrt.f32 %v626_v51  ;;  %v623_v54 = vmul.f32 0.0078125, %v617_v52  ;;  %v624_v55 = vmul.f32 0.0078125, %v619_v53 }
 0x17b   : > { %v627_v56 = vadd.f32 1e-05, %v623_v54  ;;  %v628_v57 = vadd.f32 1e-05, %v624_v55 }
 0x17c   : > { %v621_v59 = vpop.xlane.xlu1 %620 }
 0x17d   : > { %5694 = vrsqrt.f32 %v627_v56  ;;  %v625_v60 = vmul.f32 0.0078125, %v621_v59 }
 0x17e   : > { %5696 = vrsqrt.f32 %v628_v57 }
 0x17f   : > { %v629_v61 = vadd.f32 1e-05, %v625_v60 }
 0x181   : > { %5698 = vrsqrt.f32 %v629_v61 }
 0x186   : > { %v5693_v1 = vpop.eup %5692 }
 0x187   : > { %v634_v2 = vmul.f32 %v5693_v1, %v6262_v14 }
 0x189   : > { %v642_v8 = vmul.f32 %v641_v3, %v634_v2 }
 0x18a   : > { %v5695_v5 = vpop.eup %5694 }
 0x18b   : > { %v5697_v6 = vpop.eup %5696  ;;  %v635_v7 = vmul.f32 %v5695_v5, %v6270_v22  ;;  %v650_v13 = vadd.f32 %v649_v9, %v642_v8 }
 0x18c   : > { %v636_v10 = vmul.f32 %v5697_v6, %v6264_v15 }
 0x18d   : > { %v643_v11 = vmul.f32 %v641_v3, %v635_v7 }
 0x18e   : > { %v5699_v12 = vpop.eup %5698  ;;  %v644_v17 = vmul.f32 %v641_v3, %v636_v10 }
 0x18f   : > { %v651_v16 = vadd.f32 %v649_v9, %v643_v11  ;;  %v637_v14 = vmul.f32 %v5699_v12, %v6272_v23 }
 0x190   : > { %v652_v20 = vadd.f32 %v649_v9, %v644_v17 }
 0x191   : > { %v654_v18 = vpack.c.bf16 %v651_v16, %v650_v13  ;;  %v645_v19 = vmul.f32 %v641_v3, %v637_v14 }
 0x193   : > { %817 = vmatmul.mubr.bf16.vlgmr.msra.gmra.mxu0 %v654_v18  ;;  %4925 = vmatprep.mubr.bf16.mxu1 %v654_v18  ;;  %v653_v21 = vadd.f32 %v649_v9, %v645_v19 }
 0x194   : > { %826 = vmatprep.mubr.bf16.mxu0 %v6057_v43 }
 0x195   : > { %v655_v22 = vpack.c.bf16 %v653_v21, %v652_v20 }
 0x197   : > { %4926 = vmatmul.mubr.bf16.vlgmr.msra.gmra.mxu1 %v655_v22 }
 0x198   : > { %4931 = vmatprep.mubr.msk.bf16.mxu1 %vm6059_vm0, %v6058_v24 }
 0x19b   : > { %827 = vmatmul.mubr.bf16.gmra.mxu0 %v655_v22 }
 0x19c   : > { %4961 = vmatprep.mubr.msk.bf16.mxu0 %vm6059_vm0, %v6058_v24 }
 0x253   : > { %v818_v15 = vpop.f32.mrf.mxu0 }
 0x255   : > { %v820_v23 = vpop.f32.mrf.mxu0 }
 0x257   : > { %v822_v25 = vpop.f32.mrf.mxu0  ;;  %v6322_v26 = vpop.f32.mrf.mxu1 }
 0x258   : > { %v5281_v27 = vpack.i.bf16 %v822_v25, %v818_v15  ;;  %v926_v39 = vpack.c.bf16 %v822_v25, %v818_v15 }
 0x259   : > { %v824_v28 = vpop.f32.mrf.mxu0  ;;  %v6324_v29 = vpop.f32.mrf.mxu1 }
 0x25a   : > { %5282 = vrot.lane.b32.xlu1 %v5281_v27, %s6060_s24  ;;  %v5276_v30 = vpack.i.bf16 %v824_v28, %v820_v23  ;;  %v974_v31 = vpack.c.bf16 %v824_v28, %v820_v23 }
 0x25b   : > { %v828_v32 = vpop.f32.mrf.mxu0  ;;  %v6327_v33 = vpop.f32.mrf.mxu1 }
 0x25c   : > { %5277 = vrot.lane.b32.xlu0 %v5276_v30, %s6060_s24  ;;  %v1035_v34 = vsel %vm1030_vm1, %v974_v31, 0  ;;  %v6333_v35 = vpack.i.bf16 %v6327_v33, %v6322_v26 }
 0x25d   : > { %v830_v36 = vpop.f32.mrf.mxu0  ;;  %4930 = vmatpush3.bf16.xpose.msra.mxu1 %v1035_v34 }
 0x25e   : > { %4935 = vmatprep.subr.bf16.mxu1 %v6058_v24 }
 0x25f   : > { %v832_v37 = vpop.f32.mrf.mxu0 }
 0x260   : > { %5297 = vrot.lane.b32.xlu0 %v5276_v30, %s6061_s29  ;;  %v5316_v44 = vpack.i.bf16 %v832_v37, %v828_v32  ;;  %v927_v45 = vpack.c.bf16 %v832_v37, %v828_v32 }
 0x261   : > { %v834_v38 = vpop.f32.mrf.mxu0 }
 0x262   : > { %v5286_v40 = vpack.i.bf16 %v834_v38, %v830_v36  ;;  %v975_v41 = vpack.c.bf16 %v834_v38, %v830_v36 }
 0x264   : > { %5302 = vrot.lane.b32.xlu0 %v5281_v27, %s6061_s29  ;;  %4932 = vmatmul.mubr.msk.bf16.vlgmr.msra.gmra.mxu1 %vm1030_vm1, %v926_v39  ;;  %v1082_v42 = vsel %vm1030_vm1, %v975_v41, 0 }
 0x265   : > { %5287 = vrot.lane.b32.xlu1 %v5286_v40, %s6060_s24  ;;  %4936 = vmatpush3.bf16.xpose.msra.mxu1 %v1082_v42 }
 0x266   : > { %4937 = vmatprep.mubr.msk.bf16.mxu1 %vm6059_vm0, %v6058_v24  ;;  %4941 = vmatprep.subr.bf16.mxu1 %v6058_v24 }
 0x268   : > { %5317 = vrot.lane.b32.xlu0 %v5316_v44, %s6061_s29 }
 0x269   : > { %5292 = vrot.lane.b32.xlu1 %v5316_v44, %s6060_s24 }
 0x26c   : > { %5327 = vrot.lane.b32.xlu0 %v5281_v27, %s6062_s19  ;;  %4938 = vmatmul.mubr.msk.bf16.vlgmr.msra.gmra.mxu1 %vm1030_vm1, %v927_v45 }
 0x26d   : > { %5307 = vrot.lane.b32.xlu1 %v5286_v40, %s6061_s29  ;;  %4943 = vmatprep.mubr.msk.bf16.mxu1 %vm6059_vm0, %v6058_v24 }
 0x271   : > { %5312 = vrot.lane.b32.xlu1 %v5276_v30, %s6062_s19 }
 0x275   : > { %5322 = vrot.lane.b32.xlu1 %v5286_v40, %s6062_s19 }
 0x279   : > { %5332 = vrot.lane.b32.xlu1 %v5316_v44, %s6062_s19  ;;  %v6378_v44 = vpop.f32.mrf.mxu1 }
 0x2cc   : > { %v5283_v50 = vpop.permute.xlu1 %5282 }
 0x2cd   : > { %v5285_v52 = vunpack.i.h.bf16 %v5283_v50  ;;  %v5284_v53 = vunpack.i.l.bf16 %v5283_v50 }
 0x2ce   : > { %v5278_v46 = vpop.permute.xlu0 %5277 }
 0x2cf   : > { %v5280_v47 = vunpack.i.h.bf16 %v5278_v46  ;;  %v5279_v48 = vunpack.i.l.bf16 %v5278_v46  ;;  %v928_v59 = vpack.c.bf16 %v5285_v52, %v5284_v53 }
 0x2d1   : > { %v976_v49 = vpack.c.bf16 %v5280_v47, %v5279_v48  ;;  %v1023_v47 = vpack.c.bf16 %v6327_v33, %v6322_v26  ;;  %v1022_v48 = vpack.c.bf16 %v6378_v44, %v6324_v29  ;;  %v590_v26 = vand.u32 127, %v586_v58 }
 0x2d2   : > { %v5298_v54 = vpop.permute.xlu0 %5297  ;;  %v6497_v33 = vpack.i.bf16 %v6378_v44, %v6324_v29 }
 0x2d3   : > { %v1129_v51 = vsel %vm1030_vm1, %v976_v49, 0  ;;  %v5300_v0 = vunpack.i.h.bf16 %v5298_v54  ;;  %v5299_v1 = vunpack.i.l.bf16 %v5298_v54  ;;  %vm6394_vm2 = vcmp.le.s32.totalorder %v590_v26, %v6302_v62 }
 0x2d4   : > { %4942 = vmatpush3.bf16.xpose.msra.mxu1 %v1129_v51  ;;  %v588_v49 = vadd.s32 8, %v6302_v62 }
 0x2d5   : > { %4947 = vmatprep.subr.bf16.mxu1 %v6058_v24  ;;  %v978_v10 = vpack.c.bf16 %v5300_v0, %v5299_v1 }
 0x2d6   : > { %v5303_v3 = vpop.permute.xlu0 %5302  ;;  %vm6405_vm4 = vcmp.le.s32.totalorder %v590_v26, %v588_v49 }
 0x2d7   : > { %v5288_v55 = vpop.permute.xlu1 %5287  ;;  %v1223_v18 = vsel %vm1030_vm1, %v978_v10, 0  ;;  %v5305_v20 = vunpack.i.h.bf16 %v5303_v3  ;;  %v5304_v21 = vunpack.i.l.bf16 %v5303_v3 }
 0x2d8   : > { %v5290_v56 = vunpack.i.h.bf16 %v5288_v55  ;;  %v5289_v57 = vunpack.i.l.bf16 %v5288_v55 }
 0x2d9   : > { %v930_v30 = vpack.c.bf16 %v5305_v20, %v5304_v21 }
 0x2da   : > { %v977_v60 = vpack.c.bf16 %v5290_v56, %v5289_v57  ;;  %v5318_v13 = vpop.permute.xlu0 %5317 }
 0x2db   : > { %v5293_v61 = vpop.permute.xlu1 %5292  ;;  %4944 = vmatmul.mubr.msk.bf16.vlgmr.msra.gmra.mxu1 %vm1030_vm1, %v928_v59  ;;  %v5320_v22 = vunpack.i.h.bf16 %v5318_v13  ;;  %v5319_v15 = vunpack.i.l.bf16 %v5318_v13 }
 0x2dc   : > { %v1176_v2 = vsel %vm1030_vm1, %v977_v60, 0  ;;  %4949 = vmatprep.mubr.msk.bf16.mxu1 %vm6059_vm0, %v6058_v24  ;;  %v5295_v5 = vunpack.i.h.bf16 %v5293_v61  ;;  %v5294_v6 = vunpack.i.l.bf16 %v5293_v61 }
 0x2dd   : > { %4948 = vmatpush3.bf16.xpose.msra.mxu1 %v1176_v2  ;;  %v931_v31 = vpack.c.bf16 %v5320_v22, %v5319_v15 }
 0x2de   : > { %4953 = vmatprep.subr.bf16.mxu1 %v6058_v24  ;;  %v929_v11 = vpack.c.bf16 %v5295_v5, %v5294_v6  ;;  %v5328_v34 = vpop.permute.xlu0 %5327 }
 0x2df   : > { %v5308_v7 = vpop.permute.xlu1 %5307  ;;  %v5330_v39 = vunpack.i.h.bf16 %v5328_v34  ;;  %v5329_v40 = vunpack.i.l.bf16 %v5328_v34 }
 0x2e0   : > { %v5310_v8 = vunpack.i.h.bf16 %v5308_v7  ;;  %v5309_v9 = vunpack.i.l.bf16 %v5308_v7 }
 0x2e1   : > { %v932_v45 = vpack.c.bf16 %v5330_v39, %v5329_v40 }
 0x2e2   : > { %v979_v12 = vpack.c.bf16 %v5310_v8, %v5309_v9 }
 0x2e3   : > { %v5313_v16 = vpop.permute.xlu1 %5312 }
 0x2e4   : > { %v5315_v14 = vunpack.i.h.bf16 %v5313_v16  ;;  %v5314_v17 = vunpack.i.l.bf16 %v5313_v16  ;;  %4950 = vmatmul.mubr.msk.bf16.vlgmr.msra.gmra.mxu1 %vm1030_vm1, %v929_v11  ;;  %v1270_v19 = vsel %vm1030_vm1, %v979_v12, 0 }
 0x2e5   : > { %4954 = vmatpush3.bf16.xpose.msra.mxu1 %v1223_v18  ;;  %4960 = vmatpush3.bf16.xpose.msra.mxu0 %v1270_v19 }
 0x2e6   : > { %4955 = vmatprep.mubr.msk.bf16.mxu1 %vm6059_vm0, %v6058_v24  ;;  %4965 = vmatprep.subr.bf16.mxu1 %v6058_v24  ;;  %v980_v28 = vpack.c.bf16 %v5315_v14, %v5314_v17 }
 0x2e7   : > { %v5323_v23 = vpop.permute.xlu1 %5322  ;;  %4971 = vmatprep.subr.bf16.mxu0 %v6058_v24 }
 0x2e8   : > { %v5325_v25 = vunpack.i.h.bf16 %v5323_v23  ;;  %v5324_v27 = vunpack.i.l.bf16 %v5323_v23  ;;  %v1317_v37 = vsel %vm1030_vm1, %v980_v28, 0 }
 0x2ea   : > { %v981_v32 = vpack.c.bf16 %v5325_v25, %v5324_v27 }
 0x2eb   : > { %v5333_v36 = vpop.permute.xlu1 %5332 }
 0x2ec   : > { %4956 = vmatmul.mubr.msk.bf16.vlgmr.msra.gmra.mxu1 %vm1030_vm1, %v930_v30  ;;  %4962 = vmatmul.mubr.msk.bf16.vlgmr.msra.gmra.mxu0 %vm1030_vm1, %v931_v31  ;;  %v1364_v38 = vsel %vm1030_vm1, %v981_v32, 0  ;;  %v5335_v41 = vunpack.i.h.bf16 %v5333_v36  ;;  %v5334_v42 = vunpack.i.l.bf16 %v5333_v36 }
 0x2ed   : > { %4966 = vmatpush3.bf16.xpose.msra.mxu1 %v1317_v37  ;;  %4972 = vmatpush3.bf16.xpose.msra.mxu0 %v1364_v38 }
 0x2ee   : > { %4967 = vmatprep.mubr.msk.bf16.mxu1 %vm6059_vm0, %v6058_v24  ;;  %4973 = vmatprep.mubr.msk.bf16.mxu0 %vm6059_vm0, %v6058_v24  ;;  %v933_v46 = vpack.c.bf16 %v5335_v41, %v5334_v42 }
 0x2ef   : > { %4977 = vmatprep.subr.bf16.mxu1 %v6058_v24  ;;  %4983 = vmatprep.subr.bf16.mxu0 %v6058_v24 }
 0x2f4   : > { %4968 = vmatmul.mubr.msk.bf16.vlgmr.msra.gmra.mxu1 %vm1030_vm1, %v932_v45  ;;  %4974 = vmatmul.mubr.msk.bf16.vlgmr.msra.gmra.mxu0 %vm1030_vm1, %v933_v46 }
 0x2f5   : > { %4978 = vmatpush3.bf16.msra.mxu1 %v1022_v48  ;;  %4984 = vmatpush3.bf16.msra.mxu0 %v1023_v47 }
 0x2f6   : > { %4979 = vmatprep.mubr.msk.bf16.mxu1 %vm6059_vm0, %v6058_v24  ;;  %4989 = vmatprep.subr.bf16.mxu1 %v6058_v24 }
 0x2f7   : > { %4985 = vmatprep.mubr.msk.bf16.mxu0 %vm6059_vm0, %v6058_v24  ;;  %4995 = vmatprep.subr.bf16.mxu0 %v6058_v24 }
 0x324   : > { %v1071_v50 = vpop.f32.mrf.mxu1 }
 0x325   : > { %v6401_v51 = vsel %vm6394_vm2, %v1071_v50, -1e+30 }
 0x326   : > { %v4933_v52 = vpop.f32.mrf.mxu1  ;;  %v1428_v53 = vsel %vm1427_vm3, %v6401_v51, -inf }
 0x327   : > { %1429 = vmax.xlane.f32.xlu0 %v1428_v53 }
 0x328   : > { %v1074_v58 = vpop.f32.mrf.mxu1 }
 0x329   : > { %v6411_v55 = vsel %vm6405_vm4, %v1074_v58, -1e+30 }
 0x32a   : > { %v4934_v56 = vpop.f32.mrf.mxu1  ;;  %v1431_v57 = vsel %vm1427_vm3, %v6411_v55, -inf }
 0x32b   : > { %1432 = vmax.xlane.f32.xlu1 %v1431_v57 }
 0x32c   : > { %v1118_v59 = vpop.f32.mrf.mxu1 }
 0x32d   : > { %v6417_v60 = vsel %vm6394_vm2, %v1118_v59, -1e+30 }
 0x32e   : > { %v4939_v61 = vpop.f32.mrf.mxu1  ;;  %v1434_v0 = vsel %vm1427_vm3, %v6417_v60, -inf }
 0x32f   : > { %1435 = vmax.xlane.f32.xlu0 %v1434_v0 }
 0x330   : > { %v1121_v1 = vpop.f32.mrf.mxu1 }
 0x331   : > { %v6423_v2 = vsel %vm6405_vm4, %v1121_v1, -1e+30 }
 0x332   : > { %v4940_v3 = vpop.f32.mrf.mxu1  ;;  %v1437_v5 = vsel %vm1427_vm3, %v6423_v2, -inf }
 0x333   : > { %1438 = vmax.xlane.f32.xlu0 %v1437_v5 }
 0x39b   : > { %v1165_v6 = vpop.f32.mrf.mxu1 }
 0x39c   : > { %v6429_v7 = vsel %vm6394_vm2, %v1165_v6, -1e+30 }
 0x39d   : > { %v4945_v8 = vpop.f32.mrf.mxu1  ;;  %v1440_v9 = vsel %vm1427_vm3, %v6429_v7, -inf }
 0x39e   : > { %1441 = vmax.xlane.f32.xlu0 %v1440_v9 }
 0x39f   : > { %v1168_v10 = vpop.f32.mrf.mxu1 }
 0x3a0   : > { %v6435_v11 = vsel %vm6405_vm4, %v1168_v10, -1e+30 }
 0x3a1   : > { %v4946_v12 = vpop.f32.mrf.mxu1  ;;  %v1443_v13 = vsel %vm1427_vm3, %v6435_v11, -inf }
 0x3a2   : > { %1444 = vmax.xlane.f32.xlu1 %v1443_v13 }
 0x3a4   : > { %v1212_v16 = vpop.f32.mrf.mxu1 }
 0x3a5   : > { %v6441_v14 = vsel %vm6394_vm2, %v1212_v16, -1e+30 }
 0x3a6   : > { %v4951_v17 = vpop.f32.mrf.mxu1  ;;  %v1446_v18 = vsel %vm1427_vm3, %v6441_v14, -inf }
 0x3a7   : > { %1447 = vmax.xlane.f32.xlu0 %v1446_v18 }
 0x3a8   : > { %v1215_v19 = vpop.f32.mrf.mxu1 }
 0x3a9   : > { %v6447_v20 = vsel %vm6405_vm4, %v1215_v19, -1e+30 }
 0x3aa   : > { %v4952_v21 = vpop.f32.mrf.mxu1  ;;  %v1449_v22 = vsel %vm1427_vm3, %v6447_v20, -inf }
 0x3ab   : > { %1450 = vmax.xlane.f32.xlu1 %v1449_v22 }
 0x3ac   : > { %v1259_v15 = vpop.f32.mrf.mxu1  ;;  %v1306_v23 = vpop.f32.mrf.mxu0 }
 0x3ad   : > { %v6453_v25 = vsel %vm6394_vm2, %v1259_v15, -1e+30  ;;  %v6459_v31 = vsel %vm6394_vm2, %v1306_v23, -1e+30 }
 0x3ae   : > { %v4957_v27 = vpop.f32.mrf.mxu1  ;;  %v4963_v28 = vpop.f32.mrf.mxu0  ;;  %v1452_v30 = vsel %vm1427_vm3, %v6453_v25, -inf  ;;  %v1458_v40 = vsel %vm1427_vm3, %v6459_v31, -inf }
 0x3af   : > { %1453 = vmax.xlane.f32.xlu0 %v1452_v30 }
 0x3b0   : > { %v1262_v32 = vpop.f32.mrf.mxu1  ;;  %v1309_v34 = vpop.f32.mrf.mxu0 }
 0x3b1   : > { %v6463_v36 = vsel %vm6405_vm4, %v1309_v34, -1e+30  ;;  %v6471_v41 = vsel %vm6405_vm4, %v1262_v32, -1e+30  ;;  %v1430_v0 = vpop.xlane.xlu0 %1429 }
 0x3b2   : > { %v4958_v37 = vpop.f32.mrf.mxu1  ;;  %v4964_v38 = vpop.f32.mrf.mxu0  ;;  %v1461_v39 = vsel %vm1427_vm3, %v6463_v36, -inf  ;;  %v1455_v26 = vsel %vm1427_vm3, %v6471_v41, -inf  ;;  %v1476_v1 = vsub.f32 %v6401_v51, %v1430_v0 }
 0x3b3   : > { %1462 = vmax.xlane.f32.xlu1 %v1461_v39  ;;  %1459 = vmax.xlane.f32.xlu0 %v1458_v40 }
 0x3b4   : > { %v1353_v42 = vpop.f32.mrf.mxu1  ;;  %v1400_v45 = vpop.f32.mrf.mxu0  ;;  %v1492_v5 = vmul.f32 1.442695, %v1476_v1 }
 0x3b5   : > { %v6475_v46 = vsel %vm6394_vm2, %v1353_v42, -1e+30  ;;  %v6483_v50 = vsel %vm6394_vm2, %v1400_v45, -1e+30  ;;  %v1433_v12 = vpop.xlane.xlu1 %1432 }
 0x3b6   : > { %v4969_v47 = vpop.f32.mrf.mxu1  ;;  %v4975_v48 = vpop.f32.mrf.mxu0  ;;  %v1464_v49 = vsel %vm1427_vm3, %v6475_v46, -inf  ;;  %v1470_v61 = vsel %vm1427_vm3, %v6483_v50, -inf  ;;  %5700 = vpow2.f32 %v1492_v5  ;;  %v1477_v13 = vsub.f32 %v6411_v55, %v1433_v12 }
 0x3b7   : > { %1456 = vmax.xlane.f32.xlu1 %v1455_v26  ;;  %1465 = vmax.xlane.f32.xlu0 %v1464_v49 }
 0x3b8   : > { %v1356_v52 = vpop.f32.mrf.mxu1  ;;  %v1403_v53 = vpop.f32.mrf.mxu0  ;;  %v1494_v17 = vmul.f32 1.442695, %v1477_v13 }
 0x3b9   : > { %v6487_v58 = vsel %vm6405_vm4, %v1403_v53, -1e+30  ;;  %v1436_v3 = vpop.xlane.xlu0 %1435  ;;  %v6513_v10 = vsel %vm6405_vm4, %v1356_v52, -1e+30 }
 0x3ba   : > { %v4970_v56 = vpop.f32.mrf.mxu1  ;;  %v4976_v57 = vpop.f32.mrf.mxu0  ;;  %v1473_v59 = vsel %vm1427_vm3, %v6487_v58, -inf  ;;  %v1478_v6 = vsub.f32 %v6417_v60, %v1436_v3  ;;  %v1467_v60 = vsel %vm1427_vm3, %v6513_v10, -inf }
 0x3bb   : > { %1474 = vmax.xlane.f32.xlu1 %v1473_v59  ;;  %1471 = vmax.xlane.f32.xlu0 %v1470_v61 }
 0x3bc   : > { %v1496_v8 = vmul.f32 1.442695, %v1478_v6 }
 0x3bd   : > { %v1439_v16 = vpop.xlane.xlu0 %1438 }
 0x3be   : > { %5702 = vpow2.f32 %v1496_v8  ;;  %v1479_v54 = vsub.f32 %v6423_v2, %v1439_v16 }
 0x3bf   : > { %5704 = vpow2.f32 %v1494_v17 }
 0x3c0   : > { %v1498_v18 = vmul.f32 1.442695, %v1479_v54 }
 0x3c2   : > { %5706 = vpow2.f32 %v1498_v18 }
 0x3c3   : > { %v6505_v9 = vpop.eup %5700 }
 0x3c4   : > { %v1524_v29 = vsel %vm1427_vm3, %v6505_v9, 0.0 }
 0x3cb   : > { %v6509_v44 = vpop.eup %5702 }
 0x3cc   : > { %5342 = vrot.lane.b32.xlu1 %v6333_v35, %s6060_s24  ;;  %v1530_v51 = vsel %vm1427_vm3, %v6509_v44, 0.0  ;;  %v6523_v19 = vpop.eup %5704 }
 0x3cd   : > { %v1527_v15 = vsel %vm1427_vm3, %v6523_v19, 0.0 }
 0x3cf   : > { %v6528_v23 = vpop.eup %5706 }
 0x3d0   : > { %5347 = vrot.lane.b32.xlu1 %v6497_v33, %s6061_s29  ;;  %v1533_v2 = vsel %vm1427_vm3, %v6528_v23, 0.0 }
 0x3d1   : > { %5337 = vrot.lane.b32.xlu0 %v6497_v33, %s6060_s24 }
 0x3f0   : > { %1525 = vadd.xlane.f32.xlu0 %v1524_v29 }
 0x3f4   : > { %1531 = vadd.xlane.f32.xlu0 %v1530_v51  ;;  %1468 = vmax.xlane.f32.xlu1 %v1467_v60 }
 0x405   : > { %5352 = vrot.lane.b32.xlu1 %v6333_v35, %s6061_s29 }
 0x427   : > { %v1442_v21 = vpop.xlane.xlu0 %1441 }
 0x428   : > { %v1480_v22 = vsub.f32 %v6429_v7, %v1442_v21 }
 0x429   : > { %1528 = vadd.xlane.f32.xlu1 %v1527_v15 }
 0x42a   : > { %v1500_v27 = vmul.f32 1.442695, %v1480_v22 }
 0x42b   : > { %v1445_v55 = vpop.xlane.xlu1 %1444 }
 0x42c   : > { %5708 = vpow2.f32 %v1500_v27  ;;  %v1481_v28 = vsub.f32 %v6435_v11, %v1445_v55 }
 0x42d   : > { %1534 = vadd.xlane.f32.xlu1 %v1533_v2 }
 0x42e   : > { %v1502_v30 = vmul.f32 1.442695, %v1481_v28 }
 0x430   : > { %5710 = vpow2.f32 %v1502_v30  ;;  %v1448_v32 = vpop.xlane.xlu0 %1447 }
 0x431   : > { %v1482_v7 = vsub.f32 %v6441_v14, %v1448_v32 }
 0x433   : > { %v1504_v34 = vmul.f32 1.442695, %v1482_v7 }
 0x434   : > { %v1451_v37 = vpop.xlane.xlu1 %1450 }
 0x435   : > { %5712 = vpow2.f32 %v1504_v34  ;;  %v1483_v38 = vsub.f32 %v6447_v20, %v1451_v37 }
 0x437   : > { %v1506_v39 = vmul.f32 1.442695, %v1483_v38 }
 0x438   : > { %v1454_v40 = vpop.xlane.xlu0 %1453 }
 0x439   : > { %v6535_v42 = vpop.eup %5708  ;;  %5714 = vpow2.f32 %v1506_v39  ;;  %v1484_v45 = vsub.f32 %v6453_v25, %v1454_v40 }
 0x43a   : > { %v1536_v11 = vsel %vm1427_vm3, %v6535_v42, 0.0 }
 0x43b   : > { %1537 = vadd.xlane.f32.xlu0 %v1536_v11  ;;  %v1508_v56 = vmul.f32 1.442695, %v1484_v45 }
 0x43c   : > { %v1463_v47 = vpop.xlane.xlu1 %1462  ;;  %v1460_v48 = vpop.xlane.xlu0 %1459 }
 0x43d   : > { %v6540_v26 = vpop.eup %5710  ;;  %v1487_v14 = vsub.f32 %v6463_v36, %v1463_v47  ;;  %v1486_v49 = vsub.f32 %v6459_v31, %v1460_v48 }
 0x43e   : > { %v1539_v20 = vsel %vm1427_vm3, %v6540_v26, 0.0 }
 0x43f   : > { %v1514_v52 = vmul.f32 1.442695, %v1487_v14  ;;  %v1512_v53 = vmul.f32 1.442695, %v1486_v49  ;;  %1540 = vadd.xlane.f32.xlu1 %v1539_v20 }
 0x440   : > { %v1457_v57 = vpop.xlane.xlu1 %1456  ;;  %v1466_v59 = vpop.xlane.xlu0 %1465 }
 0x441   : > { %5716 = vpow2.f32 %v1514_v52  ;;  %v1485_v25 = vsub.f32 %v6471_v41, %v1457_v57  ;;  %v1488_v31 = vsub.f32 %v6475_v46, %v1466_v59 }
 0x442   : > { %v6547_v61 = vpop.eup %5712  ;;  %5718 = vpow2.f32 %v1512_v53 }
 0x443   : > { %v1510_v0 = vmul.f32 1.442695, %v1485_v25  ;;  %v1542_v36 = vsel %vm1427_vm3, %v6547_v61, 0.0  ;;  %5720 = vpow2.f32 %v1508_v56  ;;  %v1516_v60 = vmul.f32 1.442695, %v1488_v31 }
 0x444   : > { %v1475_v1 = vpop.xlane.xlu1 %1474  ;;  %1543 = vadd.xlane.f32.xlu0 %v1542_v36  ;;  %v1472_v3 = vpop.xlane.xlu0 %1471 }
 0x445   : > { %5722 = vpow2.f32 %v1510_v0  ;;  %v1491_v5 = vsub.f32 %v6487_v58, %v1475_v1  ;;  %v1490_v6 = vsub.f32 %v6483_v50, %v1472_v3 }
 0x446   : > { %v6554_v8 = vpop.eup %5714 }
 0x447   : > { %v1522_v41 = vmul.f32 1.442695, %v1491_v5  ;;  %v1520_v29 = vmul.f32 1.442695, %v1490_v6  ;;  %v1545_v51 = vsel %vm1427_vm3, %v6554_v8, 0.0 }
 0x448   : > { %1546 = vadd.xlane.f32.xlu1 %v1545_v51  ;;  %v5343_v28 = vpop.permute.xlu1 %5342  ;;  %v5338_v38 = vpop.permute.xlu0 %5337 }
 0x449   : > { %5724 = vpow2.f32 %v1522_v41  ;;  %v5340_v48 = vunpack.i.h.bf16 %v5338_v38  ;;  %v5339_v14 = vunpack.i.l.bf16 %v5338_v38  ;;  %v5345_v56 = vunpack.i.h.bf16 %v5343_v28 }
 0x44a   : > { %5726 = vpow2.f32 %v1520_v29  ;;  %v5344_v57 = vunpack.i.l.bf16 %v5343_v28 }
 0x44b   : > { %5728 = vpow2.f32 %v1516_v60  ;;  %v1024_v59 = vpack.c.bf16 %v5340_v48, %v5339_v14 }
 0x44c   : > { %v5348_v2 = vpop.permute.xlu1 %5347 }
 0x44d   : > { %v5350_v5 = vunpack.i.h.bf16 %v5348_v2  ;;  %v5349_v6 = vunpack.i.l.bf16 %v5348_v2 }
 0x44e   : > { %v6558_v46 = vpop.eup %5716 }
 0x44f   : > { %v6560_v12 = vpop.eup %5718  ;;  %v1557_v58 = vsel %vm1427_vm3, %v6558_v46, 0.0 }
 0x450   : > { %v1554_v50 = vsel %vm1427_vm3, %v6560_v12, 0.0  ;;  %1558 = vadd.xlane.f32.xlu1 %v1557_v58  ;;  %v6566_v13 = vpop.eup %5720  ;;  %v1026_v58 = vpack.c.bf16 %v5350_v5, %v5349_v6 }
 0x451   : > { %1555 = vadd.xlane.f32.xlu0 %v1554_v50  ;;  %v1548_v54 = vsel %vm1427_vm3, %v6566_v13, 0.0 }
 0x452   : > { %v6568_v16 = vpop.eup %5722 }
 0x453   : > { %v1551_v17 = vsel %vm1427_vm3, %v6568_v16, 0.0 }
 0x454   : > { %1552 = vadd.xlane.f32.xlu1 %v1551_v17 }
 0x455   : > { %1549 = vadd.xlane.f32.xlu0 %v1548_v54 }
 0x456   : > { %v6574_v18 = vpop.eup %5724 }
 0x457   : > { %v6576_v21 = vpop.eup %5726  ;;  %v1569_v22 = vsel %vm1427_vm3, %v6574_v18, 0.0 }
 0x458   : > { %v1566_v15 = vsel %vm1427_vm3, %v6576_v21, 0.0  ;;  %1570 = vadd.xlane.f32.xlu1 %v1569_v22  ;;  %v6582_v27 = vpop.eup %5728 }
 0x459   : > { %1567 = vadd.xlane.f32.xlu0 %v1566_v15  ;;  %v1560_v55 = vsel %vm1427_vm3, %v6582_v27, 0.0 }
 0x45d   : > { %1561 = vadd.xlane.f32.xlu0 %v1560_v55 }
 0x473   : > { %5357 = vrot.lane.b32.xlu0 %v6497_v33, %s6062_s19 }
 0x479   : > { %v1526_v39 = vpop.xlane.xlu0 %1525 }
 0x47d   : > { %v1469_v30 = vpop.xlane.xlu1 %1468  ;;  %v1532_v33 = vpop.xlane.xlu0 %1531 }
 0x47e   : > { %v1489_v32 = vsub.f32 %v6513_v10, %v1469_v30 }
 0x480   : > { %v1518_v7 = vmul.f32 1.442695, %v1489_v32 }
 0x481   : > { %v6595_v40 = vpop.permute.xlu1 %5352 }
 0x482   : > { %5730 = vpow2.f32 %v1518_v7  ;;  %v5354_v15 = vunpack.i.l.bf16 %v6595_v40 }
 0x483   : > { %5732 = vrcp.f32 %v1526_v39 }
 0x48f   : > { %v6589_v34 = vpop.eup %5730 }
 0x490   : > { %v1563_v37 = vsel %vm1427_vm3, %v6589_v34, 0.0  ;;  %v5733_v45 = vpop.eup %5732 }
 0x491   : > { %1564 = vadd.xlane.f32.xlu1 %v1563_v37  ;;  %v1588_v49 = vmul.f32 %v5733_v45, %v6505_v9 }
 0x4a2   : > { %5362 = vrot.lane.b32.xlu1 %v6333_v35, %s6062_s19 }
 0x4b2   : > { %v1529_v11 = vpop.xlane.xlu1 %1528 }
 0x4b3   : > { %5734 = vrcp.f32 %v1529_v11 }
 0x4b4   : > { %5736 = vrcp.f32 %v1532_v33 }
 0x4b6   : > { %v1535_v10 = vpop.xlane.xlu1 %1534 }
 0x4b7   : > { %5738 = vrcp.f32 %v1535_v10 }
 0x4c0   : > { %v5735_v47 = vpop.eup %5734 }
 0x4c1   : > { %v1589_v20 = vmul.f32 %v5735_v47, %v6523_v19  ;;  %v5737_v35 = vpop.eup %5736  ;;  %v1025_v19 = vpack.c.bf16 %v5345_v56, %v5344_v57 }
 0x4c2   : > { %v1590_v0 = vmul.f32 %v5737_v35, %v6509_v44 }
 0x4c3   : > { %v1604_v52 = vpack.c.bf16 %v1589_v20, %v1588_v49 }
 0x4c4   : > { %v5739_v53 = vpop.eup %5738  ;;  %v1538_v25 = vpop.xlane.xlu0 %1537 }
 0x4c5   : > { %4980 = vmatmul.mubr.msk.bf16.vlgmr.msra.gmra.mxu1 %vm1427_vm3, %v1604_v52  ;;  %v1591_v36 = vmul.f32 %v5739_v53, %v6528_v23  ;;  %5740 = vrcp.f32 %v1538_v25  ;;  %v5523_v53 = vld [vmem:[%s6227_s16 + $0x2ac] ss:$48 sps:$4 sm:$0xff]  }
 0x4c6   : > { %4990 = vmatpush3.bf16.msra.mxu1 %v1024_v59  ;;  %4991 = vmatprep.mubr.msk.bf16.mxu1 %vm6059_vm0, %v6058_v24 }
 0x4c7   : > { %v1605_v9 = vpack.c.bf16 %v1591_v36, %v1590_v0  ;;  %5001 = vmatprep.subr.bf16.mxu1 %v6058_v24 }
 0x4c8   : > { %v1541_v31 = vpop.xlane.xlu1 %1540 }
 0x4c9   : > { %4986 = vmatmul.mubr.msk.bf16.vlgmr.msra.gmra.mxu0 %vm1427_vm3, %v1605_v9  ;;  %5742 = vrcp.f32 %v1541_v31 }
 0x4ca   : > { %4996 = vmatpush3.bf16.msra.mxu0 %v1025_v19  ;;  %4997 = vmatprep.mubr.msk.bf16.mxu0 %vm6059_vm0, %v6058_v24 }
 0x4cb   : > { %5007 = vmatprep.subr.bf16.mxu0 %v6058_v24 }
 0x4cd   : > { %v1544_v44 = vpop.xlane.xlu0 %1543 }
 0x4ce   : > { %5744 = vrcp.f32 %v1544_v44 }
 0x4d1   : > { %v1547_v23 = vpop.xlane.xlu1 %1546 }
 0x4d2   : > { %5746 = vrcp.f32 %v1547_v23  ;;  %v5741_v1 = vpop.eup %5740 }
 0x4d3   : > { %v1592_v41 = vmul.f32 %v5741_v1, %v6535_v42 }
 0x4d6   : > { %v5743_v3 = vpop.eup %5742 }
 0x4d7   : > { %v1593_v29 = vmul.f32 %v5743_v3, %v6540_v26  ;;  %v5355_v26 = vunpack.i.h.bf16 %v6595_v40 }
 0x4d9   : > { %v1559_v51 = vpop.xlane.xlu1 %1558  ;;  %v1606_v60 = vpack.c.bf16 %v1593_v29, %v1592_v41  ;;  %v1027_v32 = vpack.c.bf16 %v5355_v26, %v5354_v15  ;;  %v5559_v26 = vld [vmem:[%s6227_s16 + $0x258] ss:$48 sps:$4 sm:$0xff]  }
 0x4da   : > { %v1556_v50 = vpop.xlane.xlu0 %1555  ;;  %5748 = vrcp.f32 %v1559_v51 }
 0x4db   : > { %5750 = vrcp.f32 %v1556_v50  ;;  %4992 = vmatmul.mubr.msk.bf16.vlgmr.msra.gmra.mxu1 %vm1427_vm3, %v1606_v60  ;;  %v5745_v17 = vpop.eup %5744 }
 0x4dc   : > { %5002 = vmatpush3.bf16.msra.mxu1 %v1026_v58  ;;  %5003 = vmatprep.mubr.msk.bf16.mxu1 %vm6059_vm0, %v6058_v24  ;;  %v1594_v55 = vmul.f32 %v5745_v17, %v6547_v61 }
 0x4dd   : > { %v1553_v54 = vpop.xlane.xlu1 %1552  ;;  %5013 = vmatprep.subr.bf16.mxu1 %v6058_v24 }
 0x4de   : > { %v1550_v22 = vpop.xlane.xlu0 %1549  ;;  %5752 = vrcp.f32 %v1553_v54 }
 0x4df   : > { %v5747_v42 = vpop.eup %5746  ;;  %5754 = vrcp.f32 %v1550_v22 }
 0x4e0   : > { %v1595_v28 = vmul.f32 %v5747_v42, %v6554_v8  ;;  %v5557_v42 = vld [vmem:[%s6227_s16 + $0x2b8] ss:$48 sps:$4 sm:$0xff]  }
 0x4e2   : > { %v1568_v2 = vpop.xlane.xlu0 %1567  ;;  %v1607_v30 = vpack.c.bf16 %v1595_v28, %v1594_v55 }
 0x4e4   : > { %4998 = vmatmul.mubr.msk.bf16.vlgmr.msra.gmra.mxu0 %vm1427_vm3, %v1607_v30 }
 0x4e5   : > { %5008 = vmatpush3.bf16.msra.mxu0 %v1027_v32  ;;  %5009 = vmatprep.mubr.msk.bf16.mxu0 %vm6059_vm0, %v6058_v24 }
 0x4e6   : > { %v1562_v7 = vpop.xlane.xlu0 %1561  ;;  %5019 = vmatprep.subr.bf16.mxu0 %v6058_v24 }
 0x4e7   : > { %v5749_v37 = vpop.eup %5748 }
 0x4e8   : > { %v5751_v38 = vpop.eup %5750  ;;  %v1599_v39 = vmul.f32 %v5749_v37, %v6558_v46 }
 0x4e9   : > { %v1598_v61 = vmul.f32 %v5751_v38, %v6560_v12  ;;  %v1571_v12 = vpop.xlane.xlu1 %1570  ;;  %v5563_v38 = vld [vmem:[%s6227_s16 + $0x198] ss:$48 sps:$4 sm:$0xff]  }
 0x4ea   : > { %v5358_v40 = vpop.permute.xlu0 %5357  ;;  %5756 = vrcp.f32 %v1571_v12 }
 0x4eb   : > { %v5753_v8 = vpop.eup %5752  ;;  %v1609_v33 = vpack.c.bf16 %v1599_v39, %v1598_v61  ;;  %v5360_v10 = vunpack.i.h.bf16 %v5358_v40  ;;  %v5359_v45 = vunpack.i.l.bf16 %v5358_v40  ;;  %5758 = vrcp.f32 %v1568_v2  ;;  %v5561_v2 = vld [vmem:[%s6227_s16 + $0x1f8] ss:$48 sps:$4 sm:$0xff]  }
 0x4ec   : > { %v5755_v11 = vpop.eup %5754  ;;  %v1597_v47 = vmul.f32 %v5753_v8, %v6568_v16  ;;  %5760 = vrcp.f32 %v1562_v7  ;;  %v5565_v40 = vld [vmem:[%s6227_s16 + $0x138] ss:$48 sps:$4 sm:$0xff]  }
 0x4ed   : > { %5010 = vmatmul.mubr.msk.bf16.vlgmr.msra.gmra.mxu0 %vm1427_vm3, %v1609_v33  ;;  %v1596_v48 = vmul.f32 %v5755_v11, %v6566_v13  ;;  %v1028_v46 = vpack.c.bf16 %v5360_v10, %v5359_v45  ;;  %v5567_v8 = vld [vmem:[%s6227_s16 + $0xd8] ss:$48 sps:$4 sm:$0xff]  }
 0x4ee   : > { %5021 = vmatprep.mubr.msk.bf16.mxu0 %vm6059_vm0, %v6058_v24  ;;  %v5569_v33 = vld [vmem:[%s6227_s16 + $0x78] ss:$48 sps:$4 sm:$0xff]  }
 0x4ef   : > { %v1608_v14 = vpack.c.bf16 %v1597_v47, %v1596_v48  ;;  %v5571_v10 = vld [vmem:[%s6227_s16 + $0x18] ss:$48 sps:$4 sm:$0xff]  }
 0x4f1   : > { %5004 = vmatmul.mubr.msk.bf16.vlgmr.msra.gmra.mxu1 %vm1427_vm3, %v1608_v14 }
 0x4f2   : > { %5014 = vmatpush3.bf16.msra.mxu1 %v1028_v46  ;;  %5015 = vmatprep.mubr.msk.bf16.mxu1 %vm6059_vm0, %v6058_v24 }
 0x4f3   : > { %5025 = vmatprep.subr.bf16.mxu1 %v5557_v42 }
 0x4f7   : > { %v5757_v49 = vpop.eup %5756 }
 0x4f8   : > { %v5759_v13 = vpop.eup %5758  ;;  %v1603_v57 = vmul.f32 %v5757_v49, %v6574_v18 }
 0x4f9   : > { %v1602_v56 = vmul.f32 %v5759_v13, %v6576_v21  ;;  %v5761_v0 = vpop.eup %5760 }
 0x4fa   : > { %v1600_v9 = vmul.f32 %v5761_v0, %v6582_v27 }
 0x4fb   : > { %v1611_v25 = vpack.c.bf16 %v1603_v57, %v1602_v56 }
 0x51a   : > { %v1565_v16 = vpop.xlane.xlu1 %1564 }
 0x51b   : > { %5762 = vrcp.f32 %v1565_v16 }
 0x51e   : > { %v5363_v20 = vpop.permute.xlu1 %5362 }
 0x51f   : > { %v5365_v35 = vunpack.i.h.bf16 %v5363_v20  ;;  %v5364_v52 = vunpack.i.l.bf16 %v5363_v20 }
 0x521   : > { %v1029_v59 = vpack.c.bf16 %v5365_v35, %v5364_v52 }
 0x523   : > { %5020 = vmatpush3.bf16.msra.mxu0 %v1029_v59 }
 0x524   : > { %5045 = vmatprep.subr.bf16.mxu0 %v5523_v53 }
 0x526   : > { %5022 = vmatmul.mubr.msk.bf16.vlgmr.msra.gmra.mxu0 %vm1427_vm3, %v1611_v25 }
 0x527   : > { %5046 = vmatpush3.bf16.msra.mxu0 %v5523_v53 }
 0x528   : > { %v5763_v36 = vpop.eup %5762 }
 0x529   : > { %v1601_v19 = vmul.f32 %v5763_v36, %v6589_v34 }
 0x52b   : > { %v1610_v31 = vpack.c.bf16 %v1601_v19, %v1600_v9 }
 0x52d   : > { %5016 = vmatmul.mubr.msk.bf16.vlgmr.msra.gmra.mxu1 %vm1427_vm3, %v1610_v31 }
 0x52e   : > { %5026 = vmatpush3.bf16.msra.mxu1 %v5557_v42  ;;  %v2030_v42 = vsub.s32 6, %v6302_v62 }
 0x52f   : > { %5027 = vmatprep.subr.bf16.mxu1 %v5559_v26 }
 0x532   : > { %5028 = vmatpush3.bf16.msra.mxu1 %v5559_v26 }
 0x533   : > { %5029 = vmatprep.subr.bf16.mxu1 %v5561_v2 }
 0x536   : > { %5030 = vmatpush3.bf16.msra.mxu1 %v5561_v2 }
 0x537   : > { %5031 = vmatprep.subr.bf16.mxu1 %v5563_v38 }
 0x53a   : > { %5032 = vmatpush3.bf16.msra.mxu1 %v5563_v38 }
 0x53b   : > { %5033 = vmatprep.subr.bf16.mxu1 %v5565_v40 }
 0x53e   : > { %5034 = vmatpush3.bf16.msra.mxu1 %v5565_v40 }
 0x53f   : > { %5035 = vmatprep.subr.bf16.mxu1 %v5567_v8 }
 0x542   : > { %5036 = vmatpush3.bf16.msra.mxu1 %v5567_v8 }
 0x543   : > { %5037 = vmatprep.subr.bf16.mxu1 %v5569_v33 }
 0x546   : > { %5038 = vmatpush3.bf16.msra.mxu1 %v5569_v33  ;;  %v5879_v33 = vld [vmem:[#allocation8 + $0x8] sm:$0xff] }
 0x547   : > { %5039 = vmatprep.subr.bf16.mxu1 %v5571_v10 }
 0x54a   : > { %5040 = vmatpush3.bf16.msra.mxu1 %v5571_v10  ;;  %v5880_v10 = vld [vmem:[#allocation8 + $0x18] sm:$0xff] }
 0x585   : > { %v6640_v44 = vpop.f32.mrf.mxu1 }
 0x587   : > { %v4981_v21 = vpop.f32.mrf.mxu1 }
 0x589   : > { %v6642_v18 = vpop.f32.mrf.mxu1  ;;  %v6644_v23 = vpop.f32.mrf.mxu0 }
 0x58b   : > { %v4982_v1 = vpop.f32.mrf.mxu1  ;;  %v4987_v3 = vpop.f32.mrf.mxu0 }
 0x58d   : > { %v6646_v5 = vpop.f32.mrf.mxu0 }
 0x58f   : > { %v4988_v6 = vpop.f32.mrf.mxu0 }
 0x59b   : > { %v1737_v27 = vpop.f32.mrf.mxu1 }
 0x59d   : > { %v4993_v41 = vpop.f32.mrf.mxu1 }
 0x59f   : > { %v1740_v34 = vpop.f32.mrf.mxu1 }
 0x5a0   : > { %v5366_v29 = vpack.i.bf16 %v1740_v34, %v1737_v27 }
 0x5a1   : > { %v4994_v51 = vpop.f32.mrf.mxu1 }
 0x5a2   : > { %5367 = vrot.lane.b32.xlu0 %v5366_v29, %s6062_s19 }
 0x5a4   : > { %v1781_v60 = vpop.f32.mrf.mxu0 }
 0x5a6   : > { %v4999_v58 = vpop.f32.mrf.mxu0 }
 0x5a8   : > { %v1784_v50 = vpop.f32.mrf.mxu0 }
 0x5a9   : > { %v5371_v17 = vpack.i.bf16 %v1784_v50, %v1781_v60 }
 0x5aa   : > { %v5000_v54 = vpop.f32.mrf.mxu0 }
 0x5ab   : > { %5372 = vrot.lane.b32.xlu1 %v5371_v17, %s6062_s19 }
 0x5ad   : > { %v1869_v22 = vpop.f32.mrf.mxu0 }
 0x5af   : > { %v5011_v15 = vpop.f32.mrf.mxu0 }
 0x5b0   : > { %v6681_v15 = vld [vmem:[%s6238_s28] sm:$0xff] }
 0x5b1   : > { %v1825_v55 = vpop.f32.mrf.mxu1  ;;  %v1872_v28 = vpop.f32.mrf.mxu0 }
 0x5b2   : > { %v5381_v30 = vpack.i.bf16 %v1872_v28, %v1869_v22 }
 0x5b3   : > { %v5005_v32 = vpop.f32.mrf.mxu1  ;;  %v5012_v7 = vpop.f32.mrf.mxu0 }
 0x5b4   : > { %5382 = vrot.lane.b32.xlu1 %v5381_v30, %s6061_s29  ;;  %v5877_v7 = vld [vmem:[#allocation8] sm:$0xff] }
 0x5b5   : > { %v1828_v37 = vpop.f32.mrf.mxu1 }
 0x5b6   : > { %v5376_v39 = vpack.i.bf16 %v1828_v37, %v1825_v55  ;;  %v2031_v55 = vrot.slane %v6681_v15, %v2030_v42  ;;  %v5602_v42 = vld [vmem:[%s6227_s16 + $0x6c] ss:$48 sps:$4 sm:$0xff]  }
 0x5b7   : > { %v5006_v61 = vpop.f32.mrf.mxu1 }
 0x5b8   : > { %5377 = vrot.lane.b32.xlu0 %v5376_v39, %s6061_s29  ;;  %v5878_v61 = vld [vmem:[#allocation8 + $0x10] sm:$0xff] }
 0x5e6   : > { %v1957_v11 = vpop.f32.mrf.mxu0 }
 0x5e8   : > { %v5023_v45 = vpop.f32.mrf.mxu0 }
 0x5ea   : > { %v1960_v47 = vpop.f32.mrf.mxu0 }
 0x5eb   : > { %v5391_v48 = vpack.i.bf16 %v1960_v47, %v1957_v11  ;;  %v5573_v47 = vld [vmem:[%s6227_s16 + $0x2b0] ss:$48 sps:$4 sm:$0xff]  }
 0x5ec   : > { %v5024_v14 = vpop.f32.mrf.mxu0 }
 0x5ed   : > { %5392 = vrot.lane.b32.xlu1 %v5391_v48, %s6060_s24  ;;  %v1913_v46 = vpop.f32.mrf.mxu1  ;;  %v5575_v48 = vld [vmem:[%s6227_s16 + $0x2b4] ss:$48 sps:$4 sm:$0xff]  }
 0x5ee   : > { %v5578_v14 = vld [vmem:[%s6227_s16 + $0x254] ss:$48 sps:$4 sm:$0xff]   ;;  %2356 = vmatprep.subr.bf16.mxu1 %v5575_v48 }
 0x5ef   : > { %v5017_v12 = vpop.f32.mrf.mxu1 }
 0x5f1   : > { %v1916_v16 = vpop.f32.mrf.mxu1 }
 0x5f2   : > { %v5386_v49 = vpack.i.bf16 %v1916_v16, %v1913_v46  ;;  %v5576_v46 = vld [vmem:[%s6227_s16 + $0x250] ss:$48 sps:$4 sm:$0xff]  }
 0x5f3   : > { %v5018_v13 = vpop.f32.mrf.mxu1 }
 0x5f4   : > { %5387 = vrot.lane.b32.xlu0 %v5386_v49, %s6060_s24 }
 0x614   : > { %v5368_v35 = vpop.permute.xlu0 %5367 }
 0x615   : > { %v5370_v57 = vunpack.i.h.bf16 %v5368_v35  ;;  %v5369_v59 = vunpack.i.l.bf16 %v5368_v35 }
 0x617   : > { %v2013_v3 = vsel %vm1030_vm1, %v6642_v18, %v5370_v57  ;;  %v2012_v6 = vsel %vm1030_vm1, %v6640_v44, %v5369_v59 }
 0x61d   : > { %v5373_v20 = vpop.permute.xlu1 %5372 }
 0x61e   : > { %v5375_v25 = vunpack.i.h.bf16 %v5373_v20  ;;  %v5374_v0 = vunpack.i.l.bf16 %v5373_v20 }
 0x620   : > { %v2015_v27 = vsel %vm1030_vm1, %v6646_v5, %v5375_v25  ;;  %v2014_v41 = vsel %vm1030_vm1, %v6644_v23, %v5374_v0 }
 0x626   : > { %v5383_v52 = vpop.permute.xlu1 %5382 }
 0x627   : > { %v5385_v36 = vunpack.i.h.bf16 %v5383_v52  ;;  %v5384_v9 = vunpack.i.l.bf16 %v5383_v52 }
 0x629   : > { %v2020_v29 = vsel %vm2016_vm5, %v2015_v27, %v5385_v36  ;;  %v2019_v51 = vsel %vm2016_vm5, %v2014_v41, %v5384_v9  ;;  %v5588_v27 = vld [vmem:[%s6227_s16 + $0x134] ss:$48 sps:$4 sm:$0xff]   ;;  %v5586_v41 = vld [vmem:[%s6227_s16 + $0x130] ss:$48 sps:$4 sm:$0xff]  }
 0x62a   : > { %v5378_v53 = vpop.permute.xlu0 %5377 }
 0x62b   : > { %v5380_v19 = vunpack.i.h.bf16 %v5378_v53  ;;  %v5379_v31 = vunpack.i.l.bf16 %v5378_v53 }
 0x62d   : > { %v2018_v50 = vsel %vm2016_vm5, %v2013_v3, %v5380_v19  ;;  %v2017_v18 = vsel %vm2016_vm5, %v2012_v6, %v5379_v31  ;;  %v5581_v31 = vld [vmem:[%s6227_s16 + $0x1f4] ss:$48 sps:$4 sm:$0xff]   ;;  %v5582_v3 = vld [vmem:[%s6227_s16 + $0x190] ss:$48 sps:$4 sm:$0xff]   ;;  %v5585_v6 = vld [vmem:[%s6227_s16 + $0x24c] ss:$48 sps:$4 sm:$0xff]  }
 0x62e   : > { %5047 = vmatprep.subr.bf16.mxu0 %v5585_v6 }
 0x62f   : > { %5048 = vmatpush3.bf16.msra.mxu0 %v5585_v6 }
 0x65f   : > { %v5393_v56 = vpop.permute.xlu1 %5392 }
 0x660   : > { %v5395_v21 = vunpack.i.h.bf16 %v5393_v56  ;;  %v5394_v1 = vunpack.i.l.bf16 %v5393_v56 }
 0x662   : > { %v2025_v44 = vsel %vm2021_vm6, %v2020_v29, %v5395_v21  ;;  %v2024_v17 = vsel %vm2021_vm6, %v2019_v51, %v5394_v1  ;;  %v5579_v21 = vld [vmem:[%s6227_s16 + $0x1f0] ss:$48 sps:$4 sm:$0xff]   ;;  %v5584_v1 = vld [vmem:[%s6227_s16 + $0x194] ss:$48 sps:$4 sm:$0xff]  }
 0x663   : > { %v2027_v22 = vpack.c.bf16 %v2025_v44, %v2024_v17  ;;  %v5590_v29 = vld [vmem:[%s6227_s16 + $0xd0] ss:$48 sps:$4 sm:$0xff]   ;;  %v5592_v51 = vld [vmem:[%s6227_s16 + $0xd4] ss:$48 sps:$4 sm:$0xff]   ;;  %v5601_v17 = vld [vmem:[%s6227_s16 + $0xcc] ss:$48 sps:$4 sm:$0xff]  }
 0x664   : > { %v5600_v44 = vld [vmem:[%s6227_s16 + $0x14] ss:$48 sps:$4 sm:$0xff]  }
 0x666   : > { %v5388_v34 = vpop.permute.xlu0 %5387 }
 0x667   : > { %v5390_v60 = vunpack.i.h.bf16 %v5388_v34  ;;  %v5389_v58 = vunpack.i.l.bf16 %v5388_v34  ;;  %v5589_v34 = vld [vmem:[%s6227_s16 + $0x1ec] ss:$48 sps:$4 sm:$0xff]  }
 0x668   : > { %5049 = vmatprep.subr.bf16.mxu0 %v5589_v34 }
 0x669   : > { %v2022_v5 = vsel %vm2021_vm6, %v2017_v18, %v5389_v58  ;;  %v2023_v23 = vsel %vm2021_vm6, %v2018_v50, %v5390_v60  ;;  %v5593_v60 = vld [vmem:[%s6227_s16 + $0x18c] ss:$48 sps:$4 sm:$0xff]   ;;  %5050 = vmatpush3.bf16.msra.mxu0 %v5589_v34  ;;  %v5596_v58 = vld [vmem:[%s6227_s16 + $0x74] ss:$48 sps:$4 sm:$0xff]   ;;  %v5594_v18 = vld [vmem:[%s6227_s16 + $0x70] ss:$48 sps:$4 sm:$0xff]  }
 0x66a   : > { %v2026_v54 = vpack.c.bf16 %v2023_v23, %v2022_v5  ;;  %5051 = vmatprep.subr.bf16.mxu0 %v5593_v60  ;;  %v5597_v50 = vld [vmem:[%s6227_s16 + $0x12c] ss:$48 sps:$4 sm:$0xff]   ;;  %v5598_v5 = vld [vmem:[%s6227_s16 + $0x10] ss:$48 sps:$4 sm:$0xff]  }
 0x66b   : > { %v417_v23 = vld [vmem:[#allocation2] sm:$0xff] }
 0x66c   : > { %5041 = vmatprep.mubr.bf16.mxu1 %v2026_v54  ;;  %v418_v54 = vld [vmem:[#allocation2 + $0x8] sm:$0xff] }
 0x66d   : > { %5042 = vmatmul.mubr.bf16.vlgmr.msra.gmra.mxu1 %v2027_v22  ;;  %5052 = vmatpush3.bf16.msra.mxu0 %v5593_v60  ;;  %v421_v22 = vpack.c.bf16 %v418_v54, %v417_v23 }
 0x66e   : > { %2388 = vmatprep.mubr.bf16.mxu1 %v6057_v43  ;;  %2357 = vmatpush1.bf16.msra.mxu1 %v5573_v47 }
 0x66f   : > { %2358 = vmatprep.subr.bf16.mxu1 %v5578_v14  ;;  %5053 = vmatprep.subr.bf16.mxu0 %v5597_v50 }
 0x671   : > { %5054 = vmatpush3.bf16.msra.mxu0 %v5597_v50 }
 0x672   : > { %2359 = vmatpush1.bf16.msra.mxu1 %v5576_v46  ;;  %5055 = vmatprep.subr.bf16.mxu0 %v5601_v17  ;;  %v2179_v46 = vsub.s32 2, %v6302_v62 }
 0x673   : > { %2360 = vmatprep.subr.bf16.mxu1 %v5581_v31 }
 0x675   : > { %5056 = vmatpush3.bf16.msra.mxu0 %v5601_v17 }
 0x676   : > { %2361 = vmatpush1.bf16.msra.mxu1 %v5579_v21  ;;  %5057 = vmatprep.subr.bf16.mxu0 %v5602_v42 }
 0x677   : > { %2362 = vmatprep.subr.bf16.mxu1 %v5584_v1 }
 0x679   : > { %5058 = vmatpush3.bf16.msra.mxu0 %v5602_v42 }
 0x67a   : > { %2363 = vmatpush1.bf16.msra.mxu1 %v5582_v3 }
 0x67b   : > { %2364 = vmatprep.subr.bf16.mxu1 %v5588_v27 }
 0x67e   : > { %2365 = vmatpush1.bf16.msra.mxu1 %v5586_v41 }
 0x67f   : > { %2366 = vmatprep.subr.bf16.mxu1 %v5592_v51 }
 0x682   : > { %2367 = vmatpush1.bf16.msra.mxu1 %v5590_v29 }
 0x683   : > { %2368 = vmatprep.subr.bf16.mxu1 %v5596_v58 }
 0x686   : > { %2369 = vmatpush1.bf16.msra.mxu1 %v5594_v18 }
 0x687   : > { %2370 = vmatprep.subr.bf16.mxu1 %v5600_v44 }
 0x68a   : > { %2371 = vmatpush1.bf16.msra.mxu1 %v5598_v5 }
 0x68b   : > { %5095 = vmatprep.subr.bf16.mxu1 %v6058_v24 }
 0x68d   : > { %2389 = vmatmul.mubr.bf16.vlgmr.msra.gmra.mxu1 %v421_v22 }
 0x68e   : > { %2398 = vmatprep.mubr.bf16.mxu1 %v6057_v43 }
 0x72d   : > { %v5043_v26 = vpop.f32.mrf.mxu1 }
 0x72e   : > { %v2123_v32 = vadd.f32 %v5043_v26, %v2031_v55  ;;  %v5603_v26 = vld [vmem:[%s6227_s16 + $0xc] ss:$48 sps:$4 sm:$0xff]  }
 0x72f   : > { %v2114_v28 = vpop.f32.mrf.mxu1  ;;  %5059 = vmatprep.subr.bf16.mxu0 %v5603_v26 }
 0x730   : > { %v2115_v2 = vadd.f32 %v2114_v28, %v2031_v55  ;;  %v6687_v40 = vadd.f32 %v5878_v61, %v2123_v32  ;;  %5060 = vmatpush3.bf16.msra.mxu0 %v5603_v26  ;;  %v420_v28 = vld [vmem:[#allocation2 + $0x18] sm:$0xff] }
 0x731   : > { %v5044_v30 = vpop.f32.mrf.mxu1  ;;  %5065 = vmatprep.subr.bf16.mxu0 %v6058_v24 }
 0x732   : > { %v6684_v37 = vadd.f32 %v5877_v7, %v2115_v2  ;;  %v2126_v8 = vadd.f32 %v5044_v30, %v2031_v55 }
 0x733   : > { %v2117_v38 = vpop.f32.mrf.mxu1 }
 0x734   : > { %v2118_v39 = vadd.f32 %v2117_v38, %v2031_v55  ;;  %2133 = vadd.xlane.f32.xlu0 %v6684_v37  ;;  %v6693_v45 = vadd.f32 %v5880_v10, %v2126_v8  ;;  %v419_v55 = vld [vmem:[#allocation2 + $0x10] sm:$0xff] }
 0x735   : > { %v422_v2 = vpack.c.bf16 %v420_v28, %v419_v55 }
 0x736   : > { %v6689_v11 = vadd.f32 %v5879_v33, %v2118_v39 }
 0x737   : > { %2399 = vmatmul.mubr.bf16.gmra.mxu1 %v422_v2 }
 0x738   : > { %2135 = vadd.xlane.f32.xlu1 %v6689_v11  ;;  %2137 = vadd.xlane.f32.xlu0 %v6687_v40 }
 0x739   : > { %5097 = vmatprep.mubr.msk.bf16.mxu1 %vm6059_vm0, %v6058_v24 }
 0x73c   : > { %2139 = vadd.xlane.f32.xlu0 %v6693_v45 }
 0x7bd   : > { %v2134_v12 = vpop.xlane.xlu0 %2133 }
 0x7be   : > { %v2141_v16 = vmul.f32 0.0078125, %v2134_v12 }
 0x7c0   : > { %v6701_v49 = vsub.f32 %v6684_v37, %v2141_v16 }
 0x7c1   : > { %v2136_v13 = vpop.xlane.xlu1 %2135  ;;  %v2138_v20 = vpop.xlane.xlu0 %2137 }
 0x7c2   : > { %v2142_v35 = vmul.f32 0.0078125, %v2136_v13  ;;  %v2143_v52 = vmul.f32 0.0078125, %v2138_v20  ;;  %v2149_v53 = vmul.f32 %v6701_v49, %v6701_v49  ;;  %v2180_v13 = vrot.slane %v6681_v15, %v2179_v46 }
 0x7c3   : > { %v2187_v20 = vsub.s32 3, %v6302_v62 }
 0x7c4   : > { %v6706_v56 = vsub.f32 %v6689_v11, %v2142_v35  ;;  %v6709_v57 = vsub.f32 %v6687_v40, %v2143_v52  ;;  %2153 = vadd.xlane.f32.xlu0 %v2149_v53 }
 0x7c5   : > { %v2140_v59 = vpop.xlane.xlu0 %2139 }
 0x7c6   : > { %v2144_v25 = vmul.f32 0.0078125, %v2140_v59  ;;  %v2150_v0 = vmul.f32 %v6706_v56, %v6706_v56  ;;  %v2151_v36 = vmul.f32 %v6709_v57, %v6709_v57 }
 0x7c8   : > { %v6716_v9 = vsub.f32 %v6693_v45, %v2144_v25  ;;  %2155 = vadd.xlane.f32.xlu1 %v2150_v0  ;;  %2157 = vadd.xlane.f32.xlu0 %v2151_v36  ;;  %v2188_v25 = vrot.slane %v6681_v15, %v2187_v20  ;;  %v2390_v15 = vpop.f32.mrf.mxu1 }
 0x7ca   : > { %v2152_v19 = vmul.f32 %v6716_v9, %v6716_v9  ;;  %v6758_v34 = vpop.f32.mrf.mxu1 }
 0x7cc   : > { %2159 = vadd.xlane.f32.xlu1 %v2152_v19 }
 0x84d   : > { %v2154_v30 = vpop.xlane.xlu0 %2153 }
 0x84e   : > { %v2161_v32 = vmul.f32 0.0078125, %v2154_v30 }
 0x850   : > { %v2165_v7 = vadd.f32 1e-05, %v2161_v32 }
 0x851   : > { %v2156_v38 = vpop.xlane.xlu1 %2155  ;;  %v2158_v39 = vpop.xlane.xlu0 %2157 }
 0x852   : > { %5764 = vrsqrt.f32 %v2165_v7  ;;  %v2162_v61 = vmul.f32 0.0078125, %v2156_v38  ;;  %v2163_v8 = vmul.f32 0.0078125, %v2158_v39 }
 0x854   : > { %v2166_v33 = vadd.f32 1e-05, %v2162_v61  ;;  %v2167_v10 = vadd.f32 1e-05, %v2163_v8 }
 0x855   : > { %v2160_v47 = vpop.xlane.xlu1 %2159 }
 0x856   : > { %5766 = vrsqrt.f32 %v2166_v33  ;;  %v2164_v48 = vmul.f32 0.0078125, %v2160_v47 }
 0x857   : > { %5768 = vrsqrt.f32 %v2167_v10 }
 0x858   : > { %v2168_v14 = vadd.f32 1e-05, %v2164_v48 }
 0x85a   : > { %5770 = vrsqrt.f32 %v2168_v14 }
 0x85f   : > { %v5765_v12 = vpop.eup %5764 }
 0x860   : > { %v2173_v16 = vmul.f32 %v5765_v12, %v6701_v49 }
 0x862   : > { %v2181_v59 = vmul.f32 %v2180_v13, %v2173_v16 }
 0x863   : > { %v5767_v35 = vpop.eup %5766 }
 0x864   : > { %v5769_v52 = vpop.eup %5768  ;;  %v2174_v53 = vmul.f32 %v5767_v35, %v6706_v56  ;;  %v2189_v49 = vadd.f32 %v2188_v25, %v2181_v59 }
 0x865   : > { %v2175_v0 = vmul.f32 %v5769_v52, %v6709_v57  ;;  %v2394_v57 = vpop.f32.mrf.mxu1 }
 0x866   : > { %v2182_v36 = vmul.f32 %v2180_v13, %v2174_v53  ;;  %v5396_v29 = vpack.i.bf16 %v2394_v57, %v2390_v15  ;;  %v2497_v58 = vpack.c.bf16 %v2394_v57, %v2390_v15 }
 0x867   : > { %v5771_v19 = vpop.eup %5770  ;;  %v2183_v1 = vmul.f32 %v2180_v13, %v2175_v0  ;;  %v6760_v51 = vpop.f32.mrf.mxu1 }
 0x868   : > { %v2190_v31 = vadd.f32 %v2188_v25, %v2182_v36  ;;  %v2176_v21 = vmul.f32 %v5771_v19, %v6716_v9  ;;  %5397 = vrot.lane.b32.xlu0 %v5396_v29, %s6060_s24  ;;  %v6765_v9 = vpack.i.bf16 %v6760_v51, %v6758_v34  ;;  %v2545_v60 = vpack.c.bf16 %v6760_v51, %v6758_v34 }
 0x869   : > { %v2191_v27 = vadd.f32 %v2188_v25, %v2183_v1  ;;  %v2557_v50 = vsel %vm1030_vm1, %v2497_v58, 0  ;;  %v2400_v18 = vpop.f32.mrf.mxu1 }
 0x86a   : > { %v2193_v3 = vpack.c.bf16 %v2190_v31, %v2189_v49  ;;  %v2184_v6 = vmul.f32 %v2180_v13, %v2176_v21 }
 0x86b   : > { %v6772_v44 = vpop.f32.mrf.mxu1 }
 0x86c   : > { %5061 = vmatprep.mubr.bf16.mxu0 %v2193_v3  ;;  %v2192_v41 = vadd.f32 %v2188_v25, %v2184_v6  ;;  %5417 = vrot.lane.b32.xlu0 %v5396_v29, %s6061_s29 }
 0x86d   : > { %v2404_v23 = vpop.f32.mrf.mxu1 }
 0x86e   : > { %v2194_v56 = vpack.c.bf16 %v2192_v41, %v2191_v27  ;;  %v2498_v22 = vpack.c.bf16 %v2404_v23, %v2400_v18  ;;  %v5406_v38 = vpack.i.bf16 %v2404_v23, %v2400_v18 }
 0x870   : > { %5062 = vmatmul.mubr.bf16.vlgmr.msra.gmra.mxu0 %v2194_v56  ;;  %v2604_v2 = vsel %vm1030_vm1, %v2498_v22, 0 }
 0x871   : > { %5067 = vmatprep.mubr.msk.bf16.mxu0 %vm6059_vm0, %v6058_v24  ;;  %5066 = vmatpush3.bf16.xpose.msra.mxu0 %v2557_v50 }
 0x872   : > { %5071 = vmatprep.subr.bf16.mxu0 %v6058_v24 }
 0x8da   : > { %v5398_v28 = vpop.permute.xlu0 %5397 }
 0x8db   : > { %v5400_v30 = vunpack.i.h.bf16 %v5398_v28  ;;  %v5399_v32 = vunpack.i.l.bf16 %v5398_v28 }
 0x8dd   : > { %v2499_v39 = vpack.c.bf16 %v5400_v30, %v5399_v32 }
 0x8de   : > { %v5418_v13 = vpop.permute.xlu0 %5417 }
 0x8df   : > { %v2651_v8 = vsel %vm1030_vm1, %v2499_v39, 0  ;;  %v5420_v53 = vunpack.i.h.bf16 %v5418_v13  ;;  %v5419_v59 = vunpack.i.l.bf16 %v5418_v13 }
 0x8e1   : > { %v2501_v1 = vpack.c.bf16 %v5420_v53, %v5419_v59 }
 0x930   : > { %v5063_v17 = vpop.f32.mrf.mxu0 }
 0x932   : > { %v2261_v5 = vpop.f32.mrf.mxu0 }
 0x934   : > { %v5064_v54 = vpop.f32.mrf.mxu0 }
 0x935   : > { %v5436_v7 = vpack.i.bf16 %v5064_v54, %v5063_v17  ;;  %v2450_v61 = vpack.c.bf16 %v5064_v54, %v5063_v17 }
 0x936   : > { %v2264_v42 = vpop.f32.mrf.mxu0 }
 0x937   : > { %v2449_v26 = vpack.c.bf16 %v2264_v42, %v2261_v5  ;;  %v5431_v55 = vpack.i.bf16 %v2264_v42, %v2261_v5 }
 0x939   : > { %5432 = vrot.lane.b32.xlu0 %v5431_v55, %s6061_s29  ;;  %5402 = vrot.lane.b32.xlu1 %v5431_v55, %s6060_s24 }
 0x93a   : > { %5068 = vmatmul.mubr.msk.bf16.vlgmr.msra.gmra.mxu0 %vm1030_vm1, %v2449_v26 }
 0x93b   : > { %5072 = vmatpush3.bf16.xpose.msra.mxu0 %v2604_v2  ;;  %5073 = vmatprep.mubr.msk.bf16.mxu0 %vm6059_vm0, %v6058_v24 }
 0x93c   : > { %5077 = vmatprep.subr.bf16.mxu0 %v6058_v24 }
 0x93d   : > { %5437 = vrot.lane.b32.xlu0 %v5436_v7, %s6061_s29  ;;  %5407 = vrot.lane.b32.xlu1 %v5406_v38, %s6060_s24 }
 0x941   : > { %5447 = vrot.lane.b32.xlu0 %v5431_v55, %s6062_s19  ;;  %5412 = vrot.lane.b32.xlu1 %v5436_v7, %s6060_s24 }
 0x942   : > { %5074 = vmatmul.mubr.msk.bf16.vlgmr.msra.gmra.mxu0 %vm1030_vm1, %v2450_v61 }
 0x943   : > { %5078 = vmatpush3.bf16.xpose.msra.mxu0 %v2651_v8  ;;  %5079 = vmatprep.mubr.msk.bf16.mxu0 %vm6059_vm0, %v6058_v24  ;;  %v6815_v8 = vpop.f32.mrf.mxu1 }
 0x944   : > { %5083 = vmatprep.subr.bf16.mxu0 %v6058_v24 }
 0x945   : > { %5422 = vrot.lane.b32.xlu1 %v5406_v38, %s6061_s29 }
 0x949   : > { %5427 = vrot.lane.b32.xlu1 %v5396_v29, %s6062_s19  ;;  %v2745_v29 = vsel %vm1030_vm1, %v2501_v1, 0 }
 0x94d   : > { %5442 = vrot.lane.b32.xlu1 %v5406_v38, %s6062_s19 }
 0x951   : > { %5452 = vrot.lane.b32.xlu1 %v5436_v7, %s6062_s19 }
 0x9ab   : > { %v5403_v33 = vpop.permute.xlu1 %5402  ;;  %v5433_v25 = vpop.permute.xlu0 %5432 }
 0x9ac   : > { %v5405_v10 = vunpack.i.h.bf16 %v5403_v33  ;;  %v5404_v47 = vunpack.i.l.bf16 %v5403_v33  ;;  %v5435_v18 = vunpack.i.h.bf16 %v5433_v25  ;;  %v5434_v17 = vunpack.i.l.bf16 %v5433_v25 }
 0x9ae   : > { %v2451_v48 = vpack.c.bf16 %v5405_v10, %v5404_v47  ;;  %v2453_v55 = vpack.c.bf16 %v5435_v18, %v5434_v17  ;;  %v2546_v10 = vpack.c.bf16 %v6815_v8, %v6772_v44 }
 0x9af   : > { %v5408_v14 = vpop.permute.xlu1 %5407  ;;  %v5438_v6 = vpop.permute.xlu0 %5437 }
 0x9b0   : > { %v5410_v12 = vunpack.i.h.bf16 %v5408_v14  ;;  %v5409_v16 = vunpack.i.l.bf16 %v5408_v14  ;;  %5080 = vmatmul.mubr.msk.bf16.vlgmr.msra.gmra.mxu0 %vm1030_vm1, %v2451_v48  ;;  %v5440_v58 = vunpack.i.h.bf16 %v5438_v6  ;;  %v5439_v50 = vunpack.i.l.bf16 %v5438_v6 }
 0x9b1   : > { %5085 = vmatprep.mubr.msk.bf16.mxu0 %vm6059_vm0, %v6058_v24 }
 0x9b2   : > { %v2500_v35 = vpack.c.bf16 %v5410_v12, %v5409_v16  ;;  %v2454_v42 = vpack.c.bf16 %v5440_v58, %v5439_v50 }
 0x9b3   : > { %v5413_v52 = vpop.permute.xlu1 %5412  ;;  %v5448_v2 = vpop.permute.xlu0 %5447 }
 0x9b4   : > { %v2698_v0 = vsel %vm1030_vm1, %v2500_v35, 0  ;;  %v5415_v36 = vunpack.i.h.bf16 %v5413_v52  ;;  %v5414_v19 = vunpack.i.l.bf16 %v5413_v52  ;;  %v5450_v39 = vunpack.i.h.bf16 %v5448_v2 }
 0x9b5   : > { %5084 = vmatpush3.bf16.xpose.msra.mxu0 %v2698_v0  ;;  %v5449_v61 = vunpack.i.l.bf16 %v5448_v2 }
 0x9b6   : > { %5089 = vmatprep.subr.bf16.mxu0 %v6058_v24  ;;  %v2452_v27 = vpack.c.bf16 %v5415_v36, %v5414_v19 }
 0x9b7   : > { %v5423_v49 = vpop.permute.xlu1 %5422  ;;  %v2455_v47 = vpack.c.bf16 %v5450_v39, %v5449_v61 }
 0x9b8   : > { %v5425_v31 = vunpack.i.h.bf16 %v5423_v49  ;;  %v5424_v21 = vunpack.i.l.bf16 %v5423_v49 }
 0x9ba   : > { %v2502_v3 = vpack.c.bf16 %v5425_v31, %v5424_v21 }
 0x9bb   : > { %v5428_v41 = vpop.permute.xlu1 %5427 }
 0x9bc   : > { %v2792_v56 = vsel %vm1030_vm1, %v2502_v3, 0  ;;  %v5430_v15 = vunpack.i.h.bf16 %v5428_v41  ;;  %v5429_v57 = vunpack.i.l.bf16 %v5428_v41  ;;  %5086 = vmatmul.mubr.msk.bf16.vlgmr.msra.gmra.mxu0 %vm1030_vm1, %v2452_v27 }
 0x9bd   : > { %5096 = vmatpush3.bf16.xpose.msra.mxu1 %v2792_v56  ;;  %5090 = vmatpush3.bf16.xpose.msra.mxu0 %v2745_v29 }
 0x9be   : > { %5091 = vmatprep.mubr.msk.bf16.mxu0 %vm6059_vm0, %v6058_v24  ;;  %5101 = vmatprep.subr.bf16.mxu0 %v6058_v24  ;;  %v2503_v22 = vpack.c.bf16 %v5430_v15, %v5429_v57 }
 0x9bf   : > { %v5443_v5 = vpop.permute.xlu1 %5442  ;;  %5107 = vmatprep.subr.bf16.mxu1 %v6058_v24 }
 0x9c0   : > { %v5445_v23 = vunpack.i.h.bf16 %v5443_v5  ;;  %v5444_v54 = vunpack.i.l.bf16 %v5443_v5  ;;  %v2839_v32 = vsel %vm1030_vm1, %v2503_v22, 0 }
 0x9c2   : > { %v2504_v26 = vpack.c.bf16 %v5445_v23, %v5444_v54 }
 0x9c3   : > { %v5453_v28 = vpop.permute.xlu1 %5452 }
 0x9c4   : > { %5098 = vmatmul.mubr.msk.bf16.vlgmr.msra.gmra.mxu1 %vm1030_vm1, %v2454_v42  ;;  %v2886_v30 = vsel %vm1030_vm1, %v2504_v26, 0  ;;  %5092 = vmatmul.mubr.msk.bf16.vlgmr.msra.gmra.mxu0 %vm1030_vm1, %v2453_v55  ;;  %v5455_v7 = vunpack.i.h.bf16 %v5453_v28  ;;  %v5454_v38 = vunpack.i.l.bf16 %v5453_v28 }
 0x9c5   : > { %5108 = vmatpush3.bf16.xpose.msra.mxu1 %v2886_v30  ;;  %5102 = vmatpush3.bf16.xpose.msra.mxu0 %v2839_v32 }
 0x9c6   : > { %5103 = vmatprep.mubr.msk.bf16.mxu0 %vm6059_vm0, %v6058_v24  ;;  %5109 = vmatprep.mubr.msk.bf16.mxu1 %vm6059_vm0, %v6058_v24  ;;  %v2456_v33 = vpack.c.bf16 %v5455_v7, %v5454_v38 }
 0x9c7   : > { %5113 = vmatprep.subr.bf16.mxu0 %v6058_v24  ;;  %5119 = vmatprep.subr.bf16.mxu1 %v6058_v24 }
 0x9cc   : > { %5110 = vmatmul.mubr.msk.bf16.vlgmr.msra.gmra.mxu1 %vm1030_vm1, %v2456_v33  ;;  %5104 = vmatmul.mubr.msk.bf16.vlgmr.msra.gmra.mxu0 %vm1030_vm1, %v2455_v47 }
 0x9cd   : > { %5120 = vmatpush3.bf16.msra.mxu1 %v2546_v10  ;;  %5114 = vmatpush3.bf16.msra.mxu0 %v2545_v60 }
 0x9ce   : > { %5115 = vmatprep.mubr.msk.bf16.mxu0 %vm6059_vm0, %v6058_v24  ;;  %5121 = vmatprep.mubr.msk.bf16.mxu1 %vm6059_vm0, %v6058_v24 }
 0x9cf   : > { %5131 = vmatprep.subr.bf16.mxu1 %v6058_v24  ;;  %5125 = vmatprep.subr.bf16.mxu0 %v6058_v24 }
 0x9fa   : > { %v2593_v48 = vpop.f32.mrf.mxu0 }
 0x9fb   : > { %v2929_v14 = vsel %vm1427_vm3, %v2593_v48, -inf }
 0x9fc   : > { %2930 = vmax.xlane.f32.xlu0 %v2929_v14  ;;  %v5069_v12 = vpop.f32.mrf.mxu0 }
 0x9fe   : > { %v2596_v16 = vpop.f32.mrf.mxu0 }
 0x9ff   : > { %v2932_v13 = vsel %vm1427_vm3, %v2596_v16, -inf }
 0xa00   : > { %2933 = vmax.xlane.f32.xlu1 %v2932_v13  ;;  %v5070_v34 = vpop.f32.mrf.mxu0 }
 0xa02   : > { %v2640_v51 = vpop.f32.mrf.mxu0 }
 0xa03   : > { %v2935_v60 = vsel %vm1427_vm3, %v2640_v51, -inf }
 0xa04   : > { %2936 = vmax.xlane.f32.xlu0 %v2935_v60  ;;  %v5075_v35 = vpop.f32.mrf.mxu0 }
 0xa06   : > { %v6834_v52 = vpop.f32.mrf.mxu0 }
 0xa07   : > { %v2938_v53 = vsel %vm1427_vm3, %v6834_v52, -inf }
 0xa08   : > { %2939 = vmax.xlane.f32.xlu0 %v2938_v53  ;;  %v5076_v59 = vpop.f32.mrf.mxu0 }
 0xa70   : > { %v6838_v25 = vpop.f32.mrf.mxu0 }
 0xa71   : > { %v2941_v0 = vsel %vm1427_vm3, %v6838_v25, -inf }
 0xa72   : > { %2942 = vmax.xlane.f32.xlu0 %v2941_v0  ;;  %v5081_v36 = vpop.f32.mrf.mxu0 }
 0xa74   : > { %v6842_v19 = vpop.f32.mrf.mxu0 }
 0xa75   : > { %v2944_v49 = vsel %vm1427_vm3, %v6842_v19, -inf }
 0xa76   : > { %2945 = vmax.xlane.f32.xlu1 %v2944_v49  ;;  %v5082_v31 = vpop.f32.mrf.mxu0 }
 0xa7c   : > { %v6846_v21 = vpop.f32.mrf.mxu0 }
 0xa7d   : > { %v2947_v1 = vsel %vm1427_vm3, %v6846_v21, -inf }
 0xa7e   : > { %2948 = vmax.xlane.f32.xlu0 %v2947_v1  ;;  %v5087_v3 = vpop.f32.mrf.mxu0 }
 0xa80   : > { %v6850_v6 = vpop.f32.mrf.mxu0 }
 0xa81   : > { %v2950_v27 = vsel %vm1427_vm3, %v6850_v6, -inf }
 0xa82   : > { %2951 = vmax.xlane.f32.xlu1 %v2950_v27  ;;  %v5088_v41 = vpop.f32.mrf.mxu0 }
 0xa84   : > { %v6854_v56 = vpop.f32.mrf.mxu1  ;;  %v6856_v57 = vpop.f32.mrf.mxu0 }
 0xa85   : > { %v2931_v15 = vpop.xlane.xlu0 %2930  ;;  %v2953_v50 = vsel %vm1427_vm3, %v6856_v57, -inf  ;;  %v2959_v55 = vsel %vm1427_vm3, %v6854_v56, -inf }
 0xa86   : > { %v2977_v29 = vsub.f32 %v2593_v48, %v2931_v15  ;;  %v5099_v58 = vpop.f32.mrf.mxu1  ;;  %2954 = vmax.xlane.f32.xlu0 %v2953_v50  ;;  %v5093_v18 = vpop.f32.mrf.mxu0 }
 0xa88   : > { %v2993_v17 = vmul.f32 1.442695, %v2977_v29  ;;  %v6860_v5 = vpop.f32.mrf.mxu1  ;;  %v6862_v54 = vpop.f32.mrf.mxu0 }
 0xa89   : > { %v2934_v23 = vpop.xlane.xlu1 %2933  ;;  %v2962_v22 = vsel %vm1427_vm3, %v6860_v5, -inf  ;;  %v2956_v38 = vsel %vm1427_vm3, %v6862_v54, -inf }
 0xa8a   : > { %5772 = vpow2.f32 %v2993_v17  ;;  %v2978_v42 = vsub.f32 %v2596_v16, %v2934_v23  ;;  %v5100_v26 = vpop.f32.mrf.mxu1  ;;  %2963 = vmax.xlane.f32.xlu1 %v2962_v22  ;;  %2960 = vmax.xlane.f32.xlu0 %v2959_v55  ;;  %v5094_v28 = vpop.f32.mrf.mxu0 }
 0xa8c   : > { %v2995_v2 = vmul.f32 1.442695, %v2978_v42  ;;  %v6868_v30 = vpop.f32.mrf.mxu1  ;;  %v6870_v7 = vpop.f32.mrf.mxu0 }
 0xa8d   : > { %v2937_v32 = vpop.xlane.xlu0 %2936  ;;  %v2965_v33 = vsel %vm1427_vm3, %v6870_v7, -inf }
 0xa8e   : > { %5774 = vpow2.f32 %v2995_v2  ;;  %v2979_v39 = vsub.f32 %v2640_v51, %v2937_v32  ;;  %v5111_v61 = vpop.f32.mrf.mxu1  ;;  %2957 = vmax.xlane.f32.xlu1 %v2956_v38  ;;  %2966 = vmax.xlane.f32.xlu0 %v2965_v33  ;;  %v5105_v10 = vpop.f32.mrf.mxu0  ;;  %v2971_v51 = vsel %vm1427_vm3, %v6868_v30, -inf }
 0xa90   : > { %v2997_v47 = vmul.f32 1.442695, %v2979_v39  ;;  %v6876_v48 = vpop.f32.mrf.mxu1  ;;  %v6878_v12 = vpop.f32.mrf.mxu0 }
 0xa91   : > { %v2940_v14 = vpop.xlane.xlu0 %2939  ;;  %v2974_v16 = vsel %vm1427_vm3, %v6876_v48, -inf  ;;  %v2968_v53 = vsel %vm1427_vm3, %v6878_v12, -inf }
 0xa92   : > { %5776 = vpow2.f32 %v2997_v47  ;;  %v2980_v13 = vsub.f32 %v6834_v52, %v2940_v14  ;;  %v5112_v34 = vpop.f32.mrf.mxu1  ;;  %2975 = vmax.xlane.f32.xlu1 %v2974_v16  ;;  %2972 = vmax.xlane.f32.xlu0 %v2971_v51  ;;  %v5106_v60 = vpop.f32.mrf.mxu0 }
 0xa94   : > { %v2999_v35 = vmul.f32 1.442695, %v2980_v13 }
 0xa96   : > { %5778 = vpow2.f32 %v2999_v35  ;;  %2969 = vmax.xlane.f32.xlu1 %v2968_v53 }
 0xa97   : > { %v6887_v59 = vpop.eup %5772 }
 0xa98   : > { %v3025_v0 = vsel %vm1427_vm3, %v6887_v59, 0.0 }
 0xa99   : > { %3026 = vadd.xlane.f32.xlu0 %v3025_v0 }
 0xa9b   : > { %v6891_v52 = vpop.eup %5774 }
 0xa9c   : > { %v3028_v36 = vsel %vm1427_vm3, %v6891_v52, 0.0 }
 0xa9d   : > { %3029 = vadd.xlane.f32.xlu1 %v3028_v36 }
 0xa9f   : > { %v6895_v49 = vpop.eup %5776 }
 0xaa0   : > { %v3031_v31 = vsel %vm1427_vm3, %v6895_v49, 0.0 }
 0xaa1   : > { %3032 = vadd.xlane.f32.xlu0 %v3031_v31 }
 0xaa3   : > { %v6899_v1 = vpop.eup %5778 }
 0xaa4   : > { %v3034_v3 = vsel %vm1427_vm3, %v6899_v1, 0.0 }
 0xaa5   : > { %3035 = vadd.xlane.f32.xlu1 %v3034_v3 }
 0xafb   : > { %v2943_v27 = vpop.xlane.xlu0 %2942 }
 0xafc   : > { %v2981_v18 = vsub.f32 %v6838_v25, %v2943_v27 }
 0xafe   : > { %v3001_v28 = vmul.f32 1.442695, %v2981_v18 }
 0xaff   : > { %v2946_v41 = vpop.xlane.xlu1 %2945 }
 0xb00   : > { %v2982_v50 = vsub.f32 %v6842_v19, %v2946_v41 }
 0xb02   : > { %v3003_v26 = vmul.f32 1.442695, %v2982_v50 }
 0xb07   : > { %v2949_v15 = vpop.xlane.xlu0 %2948 }
 0xb08   : > { %v2983_v25 = vsub.f32 %v6846_v21, %v2949_v15 }
 0xb0a   : > { %v3005_v61 = vmul.f32 1.442695, %v2983_v25 }
 0xb0b   : > { %v6903_v29 = vpop.xlane.xlu1 %2951 }
 0xb0f   : > { %v6905_v58 = vpop.xlane.xlu0 %2954 }
 0xb13   : > { %v2964_v17 = vpop.xlane.xlu1 %2963  ;;  %v2961_v22 = vpop.xlane.xlu0 %2960 }
 0xb14   : > { %v2988_v23 = vsub.f32 %v6860_v5, %v2964_v17  ;;  %v2987_v42 = vsub.f32 %v6854_v56, %v2961_v22 }
 0xb16   : > { %v3015_v55 = vmul.f32 1.442695, %v2988_v23  ;;  %v3013_v2 = vmul.f32 1.442695, %v2987_v42  ;;  %v5461_v23 = vpack.i.bf16 %v6815_v8, %v6772_v44  ;;  %v2985_v8 = vsub.f32 %v6856_v57, %v6905_v58 }
 0xb17   : > { %v6911_v32 = vpop.xlane.xlu1 %2957  ;;  %v6913_v38 = vpop.xlane.xlu0 %2966 }
 0xb18   : > { %5780 = vpow2.f32 %v3015_v55  ;;  %v2989_v55 = vsub.f32 %v6870_v7, %v6913_v38 }
 0xb19   : > { %5782 = vpow2.f32 %v3013_v2  ;;  %v2986_v2 = vsub.f32 %v6862_v54, %v6911_v32 }
 0xb1a   : > { %5784 = vpow2.f32 %v3003_v26  ;;  %v3017_v25 = vmul.f32 1.442695, %v2989_v55 }
 0xb1b   : > { %5786 = vpow2.f32 %v3001_v28  ;;  %v2976_v19 = vpop.xlane.xlu1 %2975  ;;  %v2973_v39 = vpop.xlane.xlu0 %2972 }
 0xb1c   : > { %v2991_v5 = vsub.f32 %v6868_v30, %v2973_v39  ;;  %v2992_v44 = vsub.f32 %v6876_v48, %v2976_v19  ;;  %v3011_v48 = vmul.f32 1.442695, %v2986_v2 }
 0xb1e   : > { %v3021_v56 = vmul.f32 1.442695, %v2991_v5 }
 0xb1f   : > { %v6917_v33 = vpop.xlane.xlu1 %2969 }
 0xb20   : > { %5788 = vpow2.f32 %v3021_v56  ;;  %v2990_v57 = vsub.f32 %v6878_v12, %v6917_v33 }
 0xb21   : > { %5790 = vpow2.f32 %v3005_v61 }
 0xb22   : > { %v3027_v10 = vpop.xlane.xlu0 %3026 }
 0xb23   : > { %5792 = vrcp.f32 %v3027_v10 }
 0xb25   : > { %v6919_v47 = vpop.eup %5780 }
 0xb26   : > { %v6921_v14 = vpop.eup %5782  ;;  %v3030_v16 = vpop.xlane.xlu1 %3029  ;;  %v3058_v21 = vsel %vm1427_vm3, %v6919_v47, 0.0 }
 0xb27   : > { %v6925_v13 = vpop.eup %5784  ;;  %5794 = vrcp.f32 %v3030_v16  ;;  %v3055_v30 = vsel %vm1427_vm3, %v6921_v14, 0.0  ;;  %3059 = vadd.xlane.f32.xlu1 %v3058_v21 }
 0xb28   : > { %v6929_v34 = vpop.eup %5786  ;;  %3056 = vadd.xlane.f32.xlu0 %v3055_v30  ;;  %v3040_v60 = vsel %vm1427_vm3, %v6925_v13, 0.0 }
 0xb29   : > { %v3037_v35 = vsel %vm1427_vm3, %v6929_v34, 0.0 }
 0xb2a   : > { %v3033_v51 = vpop.xlane.xlu0 %3032 }
 0xb2b   : > { %3041 = vadd.xlane.f32.xlu1 %v3040_v60  ;;  %5796 = vrcp.f32 %v3033_v51 }
 0xb2c   : > { %3038 = vadd.xlane.f32.xlu0 %v3037_v35 }
 0xb2d   : > { %v6935_v53 = vpop.eup %5788 }
 0xb2e   : > { %v3036_v0 = vpop.xlane.xlu1 %3035  ;;  %v3067_v36 = vsel %vm1427_vm3, %v6935_v53, 0.0  ;;  %v6939_v31 = vpop.eup %5790 }
 0xb2f   : > { %5798 = vrcp.f32 %v3036_v0  ;;  %v3043_v27 = vsel %vm1427_vm3, %v6939_v31, 0.0 }
 0xb30   : > { %3068 = vadd.xlane.f32.xlu0 %v3067_v36  ;;  %v5793_v3 = vpop.eup %5792 }
 0xb31   : > { %v3089_v15 = vmul.f32 %v5793_v3, %v6887_v59 }
 0xb34   : > { %v5795_v41 = vpop.eup %5794  ;;  %3044 = vadd.xlane.f32.xlu0 %v3043_v27 }
 0xb35   : > { %v3090_v50 = vmul.f32 %v5795_v41, %v6891_v52  ;;  %v2984_v52 = vsub.f32 %v6850_v6, %v6903_v29  ;;  %v3019_v6 = vmul.f32 1.442695, %v2990_v57 }
 0xb37   : > { %v3105_v18 = vpack.c.bf16 %v3090_v50, %v3089_v15  ;;  %v3007_v28 = vmul.f32 1.442695, %v2984_v52 }
 0xb38   : > { %v5797_v17 = vpop.eup %5796 }
 0xb39   : > { %5116 = vmatmul.mubr.msk.bf16.vlgmr.msra.gmra.mxu0 %vm1427_vm3, %v3105_v18  ;;  %v3091_v42 = vmul.f32 %v5797_v17, %v6895_v49  ;;  %v3023_v49 = vmul.f32 1.442695, %v2992_v44 }
 0xb3a   : > { %5127 = vmatprep.mubr.msk.bf16.mxu0 %vm6059_vm0, %v6058_v24 }
 0xb3b   : > { %5800 = vpow2.f32 %v3023_v49 }
 0xb3c   : > { %v5799_v22 = vpop.eup %5798  ;;  %5462 = vrot.lane.b32.xlu1 %v5461_v23, %s6060_s24 }
 0xb3d   : > { %v3092_v26 = vmul.f32 %v5799_v22, %v6899_v1  ;;  %v3009_v1 = vmul.f32 1.442695, %v2985_v8 }
 0xb3f   : > { %v3106_v59 = vpack.c.bf16 %v3092_v26, %v3091_v42  ;;  %5802 = vpow2.f32 %v3009_v1 }
 0xb40   : > { %5467 = vrot.lane.b32.xlu1 %v6765_v9, %s6061_s29  ;;  %5804 = vpow2.f32 %v3007_v28 }
 0xb41   : > { %5122 = vmatmul.mubr.msk.bf16.vlgmr.msra.gmra.mxu1 %vm1427_vm3, %v3106_v59  ;;  %5806 = vpow2.f32 %v3017_v25 }
 0xb42   : > { %5133 = vmatprep.mubr.msk.bf16.mxu1 %vm6059_vm0, %v6058_v24  ;;  %5808 = vpow2.f32 %v3011_v48 }
 0xb43   : > { %5810 = vpow2.f32 %v3019_v6 }
 0xb44   : > { %5472 = vrot.lane.b32.xlu1 %v5461_v23, %s6061_s29 }
 0xb48   : > { %v6972_v29 = vpop.eup %5800 }
 0xb49   : > { %v3070_v7 = vsel %vm1427_vm3, %v6972_v29, 0.0 }
 0xb4a   : > { %5457 = vrot.lane.b32.xlu0 %v6765_v9, %s6060_s24 }
 0xb4c   : > { %v6974_v58 = vpop.eup %5802 }
 0xb4d   : > { %v6978_v54 = vpop.eup %5804  ;;  %v3049_v32 = vsel %vm1427_vm3, %v6974_v58, 0.0 }
 0xb4e   : > { %v6982_v38 = vpop.eup %5806  ;;  %v3046_v12 = vsel %vm1427_vm3, %v6978_v54, 0.0 }
 0xb4f   : > { %v6986_v19 = vpop.eup %5808  ;;  %v3061_v39 = vsel %vm1427_vm3, %v6982_v38, 0.0 }
 0xb50   : > { %v3052_v5 = vsel %vm1427_vm3, %v6986_v19, 0.0  ;;  %v6992_v61 = vpop.eup %5810 }
 0xb51   : > { %v3064_v56 = vsel %vm1427_vm3, %v6992_v61, 0.0 }
 0xb68   : > { %3071 = vadd.xlane.f32.xlu1 %v3070_v7 }
 0xb69   : > { %3050 = vadd.xlane.f32.xlu0 %v3049_v32 }
 0xb6c   : > { %3047 = vadd.xlane.f32.xlu1 %v3046_v12 }
 0xb6d   : > { %3062 = vadd.xlane.f32.xlu0 %v3061_v39 }
 0xb70   : > { %3053 = vadd.xlane.f32.xlu1 %v3052_v5 }
 0xb74   : > { %3065 = vadd.xlane.f32.xlu1 %v3064_v56 }
 0xb83   : > { %5477 = vrot.lane.b32.xlu0 %v6765_v9, %s6062_s19 }
 0xb85   : > { %5482 = vrot.lane.b32.xlu1 %v5461_v23, %s6062_s19 }
 0xbb0   : > { %v3060_v33 = vpop.xlane.xlu1 %3059 }
 0xbb1   : > { %v3057_v10 = vpop.xlane.xlu0 %3056  ;;  %5812 = vrcp.f32 %v3060_v33 }
 0xbb2   : > { %5814 = vrcp.f32 %v3057_v10 }
 0xbb4   : > { %v3042_v16 = vpop.xlane.xlu1 %3041 }
 0xbb5   : > { %v3039_v21 = vpop.xlane.xlu0 %3038  ;;  %5816 = vrcp.f32 %v3042_v16 }
 0xbb6   : > { %5818 = vrcp.f32 %v3039_v21 }
 0xbb8   : > { %v5463_v30 = vpop.permute.xlu1 %5462 }
 0xbb9   : > { %v3069_v51 = vpop.xlane.xlu0 %3068  ;;  %v5465_v60 = vunpack.i.h.bf16 %v5463_v30  ;;  %v5464_v35 = vunpack.i.l.bf16 %v5463_v30 }
 0xbbb   : > { %v2548_v0 = vpack.c.bf16 %v5465_v60, %v5464_v35 }
 0xbbc   : > { %v5468_v15 = vpop.permute.xlu1 %5467 }
 0xbbd   : > { %v3045_v36 = vpop.xlane.xlu0 %3044  ;;  %5132 = vmatpush3.bf16.msra.mxu1 %v2548_v0  ;;  %v5470_v59 = vunpack.i.h.bf16 %v5468_v15  ;;  %v5469_v44 = vunpack.i.l.bf16 %v5468_v15 }
 0xbbe   : > { %v5813_v3 = vpop.eup %5812  ;;  %5143 = vmatprep.subr.bf16.mxu1 %v6058_v24  ;;  %5820 = vrcp.f32 %v3045_v36 }
 0xbbf   : > { %v5815_v9 = vpop.eup %5814  ;;  %v7001_v27 = vmul.f32 %v5813_v3, %v6919_v47 }
 0xbc0   : > { %v7004_v41 = vmul.f32 %v5815_v9, %v6921_v14  ;;  %v2549_v14 = vpack.c.bf16 %v5470_v59, %v5469_v44  ;;  %v5473_v49 = vpop.permute.xlu1 %5472 }
 0xbc1   : > { %v5458_v50 = vpop.permute.xlu0 %5457  ;;  %v5475_v39 = vunpack.i.h.bf16 %v5473_v49  ;;  %v5474_v5 = vunpack.i.l.bf16 %v5473_v49  ;;  %v5607_v49 = vld [vmem:[%s6227_s16 + $0x19c] ss:$48 sps:$4 sm:$0xff]  }
 0xbc2   : > { %v5817_v18 = vpop.eup %5816  ;;  %v5460_v17 = vunpack.i.h.bf16 %v5458_v50  ;;  %v5459_v23 = vunpack.i.l.bf16 %v5458_v50  ;;  %v3110_v22 = vpack.c.bf16 %v7001_v27, %v7004_v41  ;;  %v5605_v27 = vld [vmem:[%s6227_s16 + $0x25c] ss:$48 sps:$4 sm:$0xff]  }
 0xbc3   : > { %v5819_v42 = vpop.eup %5818  ;;  %v3094_v26 = vmul.f32 %v5817_v18, %v6925_v13  ;;  %v2550_v0 = vpack.c.bf16 %v5475_v39, %v5474_v5 }
 0xbc4   : > { %v2547_v8 = vpack.c.bf16 %v5460_v17, %v5459_v23  ;;  %v3093_v47 = vmul.f32 %v5819_v42, %v6929_v34 }
 0xbc6   : > { %5126 = vmatpush3.bf16.msra.mxu0 %v2547_v8  ;;  %v3107_v52 = vpack.c.bf16 %v3094_v26, %v3093_v47 }
 0xbc7   : > { %5137 = vmatprep.subr.bf16.mxu0 %v6058_v24 }
 0xbc9   : > { %5128 = vmatmul.mubr.msk.bf16.vlgmr.msra.gmra.mxu0 %vm1427_vm3, %v3107_v52 }
 0xbca   : > { %5138 = vmatpush3.bf16.msra.mxu0 %v2549_v14  ;;  %5139 = vmatprep.mubr.msk.bf16.mxu0 %vm6059_vm0, %v6058_v24 }
 0xbcb   : > { %5149 = vmatprep.subr.bf16.mxu0 %v6058_v24  ;;  %v5821_v7 = vpop.eup %5820 }
 0xbcc   : > { %v3095_v10 = vmul.f32 %v5821_v7, %v6939_v31 }
 0xbf1   : > { %v3072_v13 = vpop.xlane.xlu1 %3071 }
 0xbf2   : > { %v3051_v1 = vpop.xlane.xlu0 %3050 }
 0xbf5   : > { %v3048_v55 = vpop.xlane.xlu1 %3047 }
 0xbf6   : > { %5822 = vrcp.f32 %v3048_v55  ;;  %v3063_v25 = vpop.xlane.xlu0 %3062 }
 0xbf7   : > { %5824 = vrcp.f32 %v3051_v1 }
 0xbf9   : > { %v7015_v34 = vpop.f32.mrf.mxu0  ;;  %v3054_v28 = vpop.xlane.xlu1 %3053 }
 0xbfa   : > { %5826 = vrcp.f32 %v3054_v28  ;;  %v5478_v33 = vpop.permute.xlu0 %5477  ;;  %v5609_v28 = vld [vmem:[%s6227_s16 + $0xdc] ss:$48 sps:$4 sm:$0xff]  }
 0xbfb   : > { %v5117_v2 = vpop.f32.mrf.mxu0  ;;  %v5480_v36 = vunpack.i.h.bf16 %v5478_v33  ;;  %v5479_v3 = vunpack.i.l.bf16 %v5478_v33 }
 0xbfd   : > { %v7017_v48 = vpop.f32.mrf.mxu0  ;;  %v3066_v57 = vpop.xlane.xlu1 %3065  ;;  %v2551_v18 = vpack.c.bf16 %v5480_v36, %v5479_v3 }
 0xbfe   : > { %5828 = vrcp.f32 %v3066_v57 }
 0xbff   : > { %v5118_v6 = vpop.f32.mrf.mxu0  ;;  %5830 = vrcp.f32 %v3063_v25 }
 0xc00   : > { %5832 = vrcp.f32 %v3072_v13  ;;  %v5608_v13 = vld [vmem:[%s6227_s16 + $0x13c] ss:$48 sps:$4 sm:$0xff]  }
 0xc01   : > { %v7019_v32 = vpop.f32.mrf.mxu1  ;;  %5834 = vrcp.f32 %v3069_v51  ;;  %v5483_v15 = vpop.permute.xlu1 %5482 }
 0xc02   : > { %v5485_v17 = vunpack.i.h.bf16 %v5483_v15  ;;  %v5484_v23 = vunpack.i.l.bf16 %v5483_v15 }
 0xc03   : > { %v5823_v12 = vpop.eup %5822  ;;  %v5123_v56 = vpop.f32.mrf.mxu1 }
 0xc04   : > { %v3096_v16 = vmul.f32 %v5823_v12, %v6978_v54  ;;  %v5825_v21 = vpop.eup %5824  ;;  %v2552_v26 = vpack.c.bf16 %v5485_v17, %v5484_v23  ;;  %v5610_v12 = vld [vmem:[%s6227_s16 + $0x7c] ss:$48 sps:$4 sm:$0xff]  }
 0xc05   : > { %v7023_v30 = vpop.f32.mrf.mxu1  ;;  %v3097_v50 = vmul.f32 %v5825_v21, %v6974_v58 }
 0xc06   : > { %v3108_v60 = vpack.c.bf16 %v3096_v16, %v3095_v10  ;;  %v5611_v16 = vld [vmem:[%s6227_s16 + $0x1c] ss:$48 sps:$4 sm:$0xff]  }
 0xc07   : > { %v5827_v35 = vpop.eup %5826  ;;  %v5124_v9 = vpop.f32.mrf.mxu1 }
 0xc08   : > { %5134 = vmatmul.mubr.msk.bf16.vlgmr.msra.gmra.mxu1 %vm1427_vm3, %v3108_v60  ;;  %v3098_v51 = vmul.f32 %v5827_v35, %v6986_v19 }
 0xc09   : > { %5144 = vmatpush3.bf16.msra.mxu1 %v2550_v0  ;;  %5145 = vmatprep.mubr.msk.bf16.mxu1 %vm6059_vm0, %v6058_v24 }
 0xc0a   : > { %v3109_v31 = vpack.c.bf16 %v3098_v51, %v3097_v50  ;;  %5155 = vmatprep.subr.bf16.mxu1 %v6058_v24 }
 0xc0b   : > { %v5829_v54 = vpop.eup %5828 }
 0xc0c   : > { %5140 = vmatmul.mubr.msk.bf16.vlgmr.msra.gmra.mxu0 %vm1427_vm3, %v3109_v31  ;;  %v5831_v42 = vpop.eup %5830  ;;  %v3102_v58 = vmul.f32 %v5829_v54, %v6992_v61 }
 0xc0d   : > { %5150 = vmatpush3.bf16.msra.mxu0 %v2551_v18  ;;  %5151 = vmatprep.mubr.msk.bf16.mxu0 %vm6059_vm0, %v6058_v24  ;;  %v5833_v19 = vpop.eup %5832  ;;  %v3101_v59 = vmul.f32 %v5831_v42, %v6982_v38  ;;  %v5604_v38 = vld [vmem:[%s6227_s16 + $0x2bc] ss:$48 sps:$4 sm:$0xff]  }
 0xc0e   : > { %v5835_v44 = vpop.eup %5834  ;;  %v3104_v47 = vmul.f32 %v5833_v19, %v6972_v29  ;;  %5161 = vmatprep.subr.bf16.mxu0 %v5604_v38 }
 0xc0f   : > { %v3111_v8 = vpack.c.bf16 %v3102_v58, %v3101_v59  ;;  %v3103_v61 = vmul.f32 %v5835_v44, %v6935_v53 }
 0xc10   : > { %5146 = vmatmul.mubr.msk.bf16.vlgmr.msra.gmra.mxu1 %vm1427_vm3, %v3110_v22 }
 0xc11   : > { %5156 = vmatpush3.bf16.msra.mxu1 %v2552_v26  ;;  %5157 = vmatprep.mubr.msk.bf16.mxu1 %vm6059_vm0, %v6058_v24  ;;  %v3112_v52 = vpack.c.bf16 %v3104_v47, %v3103_v61  ;;  %v5606_v24 = vld [vmem:[%s6227_s16 + $0x1fc] ss:$48 sps:$4 sm:$0xff]  }
 0xc14   : > { %5152 = vmatmul.mubr.msk.bf16.vlgmr.msra.gmra.mxu0 %vm1427_vm3, %v3111_v8 }
 0xc15   : > { %5162 = vmatpush3.bf16.msra.mxu0 %v5604_v38 }
 0xc16   : > { %5163 = vmatprep.subr.bf16.mxu0 %v5605_v27 }
 0xc18   : > { %5158 = vmatmul.mubr.msk.bf16.vlgmr.msra.gmra.mxu1 %vm1427_vm3, %v3112_v52 }
 0xc19   : > { %3891 = vmatprep.mubr.bf16.mxu1 %v6057_v43  ;;  %5164 = vmatpush3.bf16.msra.mxu0 %v5605_v27 }
 0xc1a   : > { %5165 = vmatprep.subr.bf16.mxu0 %v5606_v24 }
 0xc1d   : > { %5166 = vmatpush3.bf16.msra.mxu0 %v5606_v24 }
 0xc1e   : > { %5167 = vmatprep.subr.bf16.mxu0 %v5607_v49 }
 0xc21   : > { %5168 = vmatpush3.bf16.msra.mxu0 %v5607_v49 }
 0xc22   : > { %5169 = vmatprep.subr.bf16.mxu0 %v5608_v13 }
 0xc25   : > { %5170 = vmatpush3.bf16.msra.mxu0 %v5608_v13 }
 0xc26   : > { %5171 = vmatprep.subr.bf16.mxu0 %v5609_v28 }
 0xc29   : > { %5172 = vmatpush3.bf16.msra.mxu0 %v5609_v28 }
 0xc2a   : > { %5173 = vmatprep.subr.bf16.mxu0 %v5610_v12 }
 0xc2d   : > { %5174 = vmatpush3.bf16.msra.mxu0 %v5610_v12 }
 0xc2e   : > { %5175 = vmatprep.subr.bf16.mxu0 %v5611_v16 }
 0xc31   : > { %5176 = vmatpush3.bf16.msra.mxu0 %v5611_v16 }
 0xc89   : > { %v3238_v41 = vpop.f32.mrf.mxu0 }
 0xc8b   : > { %v5129_v22 = vpop.f32.mrf.mxu0 }
 0xc8d   : > { %v3241_v29 = vpop.f32.mrf.mxu0 }
 0xc8e   : > { %v5486_v53 = vpack.i.bf16 %v3241_v29, %v3238_v41 }
 0xc8f   : > { %v5130_v14 = vpop.f32.mrf.mxu0 }
 0xc90   : > { %5487 = vrot.lane.b32.xlu0 %v5486_v53, %s6062_s19 }
 0xcc8   : > { %v3282_v1 = vpop.f32.mrf.mxu1 }
 0xcca   : > { %v5135_v55 = vpop.f32.mrf.mxu1 }
 0xccc   : > { %v3285_v2 = vpop.f32.mrf.mxu1  ;;  %v3326_v25 = vpop.f32.mrf.mxu0 }
 0xccd   : > { %v5491_v57 = vpack.i.bf16 %v3285_v2, %v3282_v1 }
 0xcce   : > { %v5136_v6 = vpop.f32.mrf.mxu1  ;;  %v5141_v7 = vpop.f32.mrf.mxu0 }
 0xccf   : > { %5492 = vrot.lane.b32.xlu1 %v5491_v57, %s6062_s19 }
 0xcd0   : > { %v3329_v39 = vpop.f32.mrf.mxu0  ;;  %v3370_v5 = vpop.f32.mrf.mxu1 }
 0xcd1   : > { %v5496_v56 = vpack.i.bf16 %v3329_v39, %v3326_v25  ;;  %v7080_v39 = vld [vmem:[%s6238_s28] sm:$0xff] }
 0xcd2   : > { %v5142_v33 = vpop.f32.mrf.mxu0  ;;  %v5147_v10 = vpop.f32.mrf.mxu1 }
 0xcd3   : > { %5497 = vrot.lane.b32.xlu0 %v5496_v56, %s6061_s29 }
 0xcd4   : > { %v3373_v21 = vpop.f32.mrf.mxu1  ;;  %v3414_v60 = vpop.f32.mrf.mxu0 }
 0xcd5   : > { %v5501_v35 = vpack.i.bf16 %v3373_v21, %v3370_v5 }
 0xcd6   : > { %v5148_v0 = vpop.f32.mrf.mxu1  ;;  %v5153_v36 = vpop.f32.mrf.mxu0 }
 0xcd7   : > { %5502 = vrot.lane.b32.xlu1 %v5501_v35, %s6061_s29 }
 0xcd8   : > { %v3417_v3 = vpop.f32.mrf.mxu0  ;;  %v3458_v9 = vpop.f32.mrf.mxu1 }
 0xcd9   : > { %v5506_v15 = vpack.i.bf16 %v3417_v3, %v3414_v60 }
 0xcda   : > { %v5154_v50 = vpop.f32.mrf.mxu0  ;;  %v5159_v51 = vpop.f32.mrf.mxu1 }
 0xcdb   : > { %5507 = vrot.lane.b32.xlu0 %v5506_v15, %s6060_s24  ;;  %v5615_v15 = vld [vmem:[%s6227_s16 + $0x2c8] ss:$48 sps:$4 sm:$0xff]   ;;  %v5617_v50 = vld [vmem:[%s6227_s16 + $0x2cc] ss:$48 sps:$4 sm:$0xff]  }
 0xcdc   : > { %v3461_v31 = vpop.f32.mrf.mxu1  ;;  %3912 = vmatprep.subr.bf16.mxu0 %v5617_v50 }
 0xcdd   : > { %v5511_v54 = vpack.i.bf16 %v3461_v31, %v3458_v9  ;;  %v5614_v9 = vld [vmem:[%s6227_s16 + $0x2c4] ss:$48 sps:$4 sm:$0xff]  }
 0xcde   : > { %v5160_v18 = vpop.f32.mrf.mxu1  ;;  %3859 = vmatprep.subr.bf16.mxu1 %v5614_v9 }
 0xcdf   : > { %5512 = vrot.lane.b32.xlu1 %v5511_v54, %s6060_s24 }
 0xd02   : > { %v5488_v17 = vpop.permute.xlu0 %5487 }
 0xd03   : > { %v5490_v58 = vunpack.i.h.bf16 %v5488_v17  ;;  %v5489_v19 = vunpack.i.l.bf16 %v5488_v17 }
 0xd05   : > { %v3514_v8 = vsel %vm1030_vm1, %v7017_v48, %v5490_v58  ;;  %v3513_v47 = vsel %vm1030_vm1, %v7015_v34, %v5489_v19 }
 0xd41   : > { %v5493_v23 = vpop.permute.xlu1 %5492 }
 0xd42   : > { %v5495_v52 = vunpack.i.h.bf16 %v5493_v23  ;;  %v5494_v38 = vunpack.i.l.bf16 %v5493_v23 }
 0xd44   : > { %v3516_v34 = vsel %vm1030_vm1, %v7023_v30, %v5495_v52  ;;  %v3515_v1 = vsel %vm1030_vm1, %v7019_v32, %v5494_v38  ;;  %v3529_v30 = vsub.s32 7, %v6302_v62  ;;  %v5618_v52 = vld [vmem:[%s6227_s16 + $0x260] ss:$48 sps:$4 sm:$0xff]   ;;  %v5621_v38 = vld [vmem:[%s6227_s16 + $0x268] ss:$48 sps:$4 sm:$0xff]  }
 0xd45   : > { %v5498_v42 = vpop.permute.xlu0 %5497 }
 0xd46   : > { %v5500_v26 = vunpack.i.h.bf16 %v5498_v42  ;;  %v5499_v59 = vunpack.i.l.bf16 %v5498_v42  ;;  %v3530_v32 = vrot.slane %v7080_v39, %v3529_v30  ;;  %v5651_v30 = vld [vmem:[%s6227_s16 + $0x88] ss:$48 sps:$4 sm:$0xff]  }
 0xd48   : > { %v3518_v24 = vsel %vm2016_vm5, %v3514_v8, %v5500_v26  ;;  %v3517_v22 = vsel %vm2016_vm5, %v3513_v47, %v5499_v59  ;;  %v5620_v47 = vld [vmem:[%s6227_s16 + $0x264] ss:$48 sps:$4 sm:$0xff]  }
 0xd49   : > { %v5503_v44 = vpop.permute.xlu1 %5502 }
 0xd4a   : > { %v5505_v29 = vunpack.i.h.bf16 %v5503_v44  ;;  %v5504_v53 = vunpack.i.l.bf16 %v5503_v44 }
 0xd4c   : > { %v3520_v2 = vsel %vm2016_vm5, %v3516_v34, %v5505_v29  ;;  %v3519_v25 = vsel %vm2016_vm5, %v3515_v1, %v5504_v53  ;;  %v5632_v29 = vld [vmem:[%s6227_s16 + $0x1a4] ss:$48 sps:$4 sm:$0xff]   ;;  %v5635_v53 = vld [vmem:[%s6227_s16 + $0x1ac] ss:$48 sps:$4 sm:$0xff]   ;;  %v5639_v34 = vld [vmem:[%s6227_s16 + $0x148] ss:$48 sps:$4 sm:$0xff]  }
 0xd4d   : > { %v5508_v61 = vpop.permute.xlu0 %5507  ;;  %v5641_v1 = vld [vmem:[%s6227_s16 + $0x14c] ss:$48 sps:$4 sm:$0xff]  }
 0xd4e   : > { %v5510_v27 = vunpack.i.h.bf16 %v5508_v61  ;;  %v5509_v41 = vunpack.i.l.bf16 %v5508_v61  ;;  %v5623_v61 = vld [vmem:[%s6227_s16 + $0x26c] ss:$48 sps:$4 sm:$0xff]  }
 0xd50   : > { %v3521_v14 = vsel %vm2021_vm6, %v3517_v22, %v5509_v41  ;;  %v3522_v49 = vsel %vm2021_vm6, %v3518_v24, %v5510_v27  ;;  %v5626_v27 = vld [vmem:[%s6227_s16 + $0x204] ss:$48 sps:$4 sm:$0xff]   ;;  %v5629_v41 = vld [vmem:[%s6227_s16 + $0x20c] ss:$48 sps:$4 sm:$0xff]   ;;  %v5624_v24 = vld [vmem:[%s6227_s16 + $0x200] ss:$48 sps:$4 sm:$0xff]  }
 0xd51   : > { %v5513_v13 = vpop.permute.xlu1 %5512  ;;  %v3525_v48 = vpack.c.bf16 %v3522_v49, %v3521_v14  ;;  %v5627_v22 = vld [vmem:[%s6227_s16 + $0x208] ss:$48 sps:$4 sm:$0xff]   ;;  %v5630_v14 = vld [vmem:[%s6227_s16 + $0x1a0] ss:$48 sps:$4 sm:$0xff]  }
 0xd52   : > { %v5515_v55 = vunpack.i.h.bf16 %v5513_v13  ;;  %v5514_v28 = vunpack.i.l.bf16 %v5513_v13  ;;  %v5633_v49 = vld [vmem:[%s6227_s16 + $0x1a8] ss:$48 sps:$4 sm:$0xff]   ;;  %v5638_v13 = vld [vmem:[%s6227_s16 + $0x144] ss:$48 sps:$4 sm:$0xff]  }
 0xd53   : > { %5177 = vmatprep.mubr.bf16.mxu0 %v3525_v48  ;;  %v5636_v48 = vld [vmem:[%s6227_s16 + $0x140] ss:$48 sps:$4 sm:$0xff]  }
 0xd54   : > { %v3524_v57 = vsel %vm2021_vm6, %v3520_v2, %v5515_v55  ;;  %v3523_v6 = vsel %vm2021_vm6, %v3519_v25, %v5514_v28  ;;  %v5644_v55 = vld [vmem:[%s6227_s16 + $0xe4] ss:$48 sps:$4 sm:$0xff]   ;;  %v5647_v28 = vld [vmem:[%s6227_s16 + $0xec] ss:$48 sps:$4 sm:$0xff]   ;;  %v5642_v2 = vld [vmem:[%s6227_s16 + $0xe0] ss:$48 sps:$4 sm:$0xff]  }
 0xd55   : > { %v3526_v7 = vpack.c.bf16 %v3524_v57, %v3523_v6  ;;  %v5645_v25 = vld [vmem:[%s6227_s16 + $0xe8] ss:$48 sps:$4 sm:$0xff]   ;;  %v5650_v57 = vld [vmem:[%s6227_s16 + $0x84] ss:$48 sps:$4 sm:$0xff]   ;;  %v5653_v6 = vld [vmem:[%s6227_s16 + $0x8c] ss:$48 sps:$4 sm:$0xff]  }
 0xd57   : > { %5178 = vmatmul.mubr.bf16.vlgmr.msra.gmra.mxu0 %v3526_v7  ;;  %v5648_v7 = vld [vmem:[%s6227_s16 + $0x80] ss:$48 sps:$4 sm:$0xff]  }
 0xd58   : > { %3944 = vmatprep.mubr.bf16.mxu0 %v6057_v43  ;;  %3913 = vmatpush1.bf16.msra.mxu0 %v5615_v15 }
 0xd59   : > { %3914 = vmatprep.subr.bf16.mxu0 %v5623_v61 }
 0xd5c   : > { %3915 = vmatpush1.bf16.msra.mxu0 %v5621_v38 }
 0xd5d   : > { %3916 = vmatprep.subr.bf16.mxu0 %v5629_v41 }
 0xd60   : > { %3917 = vmatpush1.bf16.msra.mxu0 %v5627_v22 }
 0xd61   : > { %3918 = vmatprep.subr.bf16.mxu0 %v5635_v53  ;;  %v5661_v53 = vld [vmem:[%s6245_s30 + $0xf8] sm:$0xff]  }
 0xd64   : > { %3919 = vmatpush1.bf16.msra.mxu0 %v5633_v49  ;;  %v5663_v49 = vld [vmem:[%s6245_s30 + $0xb8] sm:$0xff]  }
 0xd65   : > { %3920 = vmatprep.subr.bf16.mxu0 %v5641_v1  ;;  %v5668_v1 = vld [vmem:[%s6245_s30 + $0x68] sm:$0xff]  }
 0xd68   : > { %3921 = vmatpush1.bf16.msra.mxu0 %v5639_v34  ;;  %v5667_v34 = vld [vmem:[%s6245_s30 + $0xb0] sm:$0xff]  }
 0xd69   : > { %3922 = vmatprep.subr.bf16.mxu0 %v5647_v28  ;;  %v5670_v28 = vld [vmem:[%s6245_s30 + $0x28] sm:$0xff]  }
 0xd6c   : > { %3923 = vmatpush1.bf16.msra.mxu0 %v5645_v25  ;;  %v5672_v25 = vld [vmem:[%s6245_s30 + $0x60] sm:$0xff]  }
 0xd6d   : > { %3924 = vmatprep.subr.bf16.mxu0 %v5653_v6  ;;  %v5674_v6 = vld [vmem:[%s6245_s30 + $0x20] sm:$0xff]  }
 0xd70   : > { %3925 = vmatpush1.bf16.msra.mxu0 %v5651_v30  ;;  %v5676_v30 = vld [vmem:[%s6245_s30 + $0x58] sm:$0xff]  }
 0xe17   : > { %v5179_v12 = vpop.f32.mrf.mxu0 }
 0xe18   : > { %v3606_v10 = vadd.f32 %v5179_v12, %v3530_v32  ;;  %v5656_v12 = vld [vmem:[%s6227_s16 + $0x24] ss:$48 sps:$4 sm:$0xff]  }
 0xe19   : > { %v3597_v5 = vpop.f32.mrf.mxu0 }
 0xe1a   : > { %v3598_v56 = vadd.f32 %v3597_v5, %v3530_v32  ;;  %v7088_v35 = vadd.f32 %v3606_v10, %v6687_v40  ;;  %v5654_v5 = vld [vmem:[%s6227_s16 + $0x20] ss:$48 sps:$4 sm:$0xff]  }
 0xe1b   : > { %v5180_v33 = vpop.f32.mrf.mxu0 }
 0xe1c   : > { %v7084_v16 = vadd.f32 %v3598_v56, %v6684_v37  ;;  %v3609_v0 = vadd.f32 %v5180_v33, %v3530_v32  ;;  %v5612_v37 = vld [vmem:[%s6227_s16 + $0x2c0] ss:$48 sps:$4 sm:$0xff]   ;;  %v5657_v56 = vld [vmem:[%s6227_s16 + $0x28] ss:$48 sps:$4 sm:$0xff]  }
 0xe1d   : > { %v3600_v21 = vpop.f32.mrf.mxu0  ;;  %3860 = vmatpush1.bf16.msra.mxu1 %v5612_v37 }
 0xe1e   : > { %v3601_v60 = vadd.f32 %v3600_v21, %v3530_v32  ;;  %3616 = vadd.xlane.f32.xlu0 %v7084_v16  ;;  %v7096_v3 = vadd.f32 %v3609_v0, %v6693_v45  ;;  %3861 = vmatprep.subr.bf16.mxu1 %v5620_v47  ;;  %v5659_v32 = vld [vmem:[%s6227_s16 + $0x2c] ss:$48 sps:$4 sm:$0xff]   ;;  %s6063_s16 = smov [#allocation8]  }
 0xe1f   : > { %3926 = vmatprep.subr.bf16.mxu0 %v5659_v32  ;;  %v5678_v32 = vld [vmem:[%s6245_s30 + $0x18] sm:$0xff]  }
 0xe20   : > { %v7091_v36 = vadd.f32 %v3601_v60, %v6689_v11  ;;  %3927 = vmatpush1.bf16.msra.mxu0 %v5657_v56  ;;  %v5680_v56 = vld [vmem:[%s6245_s30 + $0x50] sm:$0xff]  }
 0xe21   : > { %3862 = vmatpush1.bf16.msra.mxu1 %v5618_v52  ;;  %4881 = vmatprep.subr.bf16.mxu0 %v5661_v53 }
 0xe22   : > { %3618 = vadd.xlane.f32.xlu1 %v7091_v36  ;;  %3620 = vadd.xlane.f32.xlu0 %v7088_v35 }
 0xe23   : > { %3863 = vmatprep.subr.bf16.mxu1 %v5626_v27 }
 0xe25   : > { %3864 = vmatpush1.bf16.msra.mxu1 %v5624_v24 }
 0xe26   : > { %3622 = vadd.xlane.f32.xlu0 %v7096_v3  ;;  %3865 = vmatprep.subr.bf16.mxu1 %v5632_v29 }
 0xe29   : > { %3866 = vmatpush1.bf16.msra.mxu1 %v5630_v14  ;;  %v5662_v14 = vld [vmem:[%s6245_s30 + $0x38] sm:$0xff]  }
 0xe2a   : > { %3867 = vmatprep.subr.bf16.mxu1 %v5638_v13  ;;  %v5665_v13 = vld [vmem:[%s6245_s30 + $0xf0] sm:$0xff]  }
 0xe2d   : > { %3868 = vmatpush1.bf16.msra.mxu1 %v5636_v48  ;;  %v5666_v48 = vld [vmem:[%s6245_s30 + $0x30] sm:$0xff]  }
 0xe2e   : > { %3869 = vmatprep.subr.bf16.mxu1 %v5644_v55  ;;  %v5669_v55 = vld [vmem:[%s6245_s30 + $0xe8] sm:$0xff]  }
 0xe31   : > { %3870 = vmatpush1.bf16.msra.mxu1 %v5642_v2  ;;  %v5671_v2 = vld [vmem:[%s6245_s30 + $0xa8] sm:$0xff]  }
 0xe32   : > { %3871 = vmatprep.subr.bf16.mxu1 %v5650_v57  ;;  %v5673_v57 = vld [vmem:[%s6245_s30 + $0xe0] sm:$0xff]  }
 0xe35   : > { %3872 = vmatpush1.bf16.msra.mxu1 %v5648_v7  ;;  %v5675_v7 = vld [vmem:[%s6245_s30 + $0xa0] sm:$0xff]  }
 0xe36   : > { %3873 = vmatprep.subr.bf16.mxu1 %v5656_v12  ;;  %v5677_v12 = vld [vmem:[%s6245_s30 + $0xd8] sm:$0xff]  }
 0xe39   : > { %3874 = vmatpush1.bf16.msra.mxu1 %v5654_v5  ;;  %v5679_v5 = vld [vmem:[%s6245_s30 + $0x98] sm:$0xff]  }
 0xea7   : > { %v3617_v40 = vpop.xlane.xlu0 %3616 }
 0xea8   : > { %v3624_v11 = vmul.f32 0.0078125, %v3617_v40 }
 0xeaa   : > { %v7104_v51 = vsub.f32 %v7084_v16, %v3624_v11 }
 0xeab   : > { %v3619_v31 = vpop.xlane.xlu1 %3618  ;;  %v3621_v54 = vpop.xlane.xlu0 %3620 }
 0xeac   : > { %v3625_v45 = vmul.f32 0.0078125, %v3619_v31  ;;  %v3626_v18 = vmul.f32 0.0078125, %v3621_v54  ;;  %v3632_v17 = vmul.f32 %v7104_v51, %v7104_v51  ;;  %v3662_v54 = vsub.s32 4, %v6302_v62 }
 0xeae   : > { %v7109_v23 = vsub.f32 %v7091_v36, %v3625_v45  ;;  %v7112_v42 = vsub.f32 %v7088_v35, %v3626_v18  ;;  %3636 = vadd.xlane.f32.xlu0 %v3632_v17  ;;  %v3663_v17 = vrot.slane %v7080_v39, %v3662_v54 }
 0xeaf   : > { %v3623_v58 = vpop.xlane.xlu0 %3622 }
 0xeb0   : > { %v3627_v19 = vmul.f32 0.0078125, %v3623_v58  ;;  %v3633_v26 = vmul.f32 %v7109_v23, %v7109_v23  ;;  %v3634_v59 = vmul.f32 %v7112_v42, %v7112_v42  ;;  %v3670_v58 = vsub.s32 5, %v6302_v62 }
 0xeb2   : > { %v7119_v44 = vsub.f32 %v7096_v3, %v3627_v19  ;;  %3638 = vadd.xlane.f32.xlu1 %v3633_v26  ;;  %3640 = vadd.xlane.f32.xlu0 %v3634_v59 }
 0xeb4   : > { %v3635_v8 = vmul.f32 %v7119_v44, %v7119_v44 }
 0xeb6   : > { %3642 = vadd.xlane.f32.xlu1 %v3635_v8  ;;  %v3671_v8 = vrot.slane %v7080_v39, %v3670_v58 }
 0xf37   : > { %v3637_v33 = vpop.xlane.xlu0 %3636 }
 0xf38   : > { %v3644_v10 = vmul.f32 0.0078125, %v3637_v33  ;;  %v5681_v33 = vld [vmem:[%s6245_s30 + $0xd0] sm:$0xff]  }
 0xf3a   : > { %v3648_v21 = vadd.f32 1e-05, %v3644_v10  ;;  %v5682_v10 = vld [vmem:[%s6245_s30 + $0x10] sm:$0xff]  }
 0xf3b   : > { %v3639_v60 = vpop.xlane.xlu1 %3638  ;;  %v3641_v0 = vpop.xlane.xlu0 %3640 }
 0xf3c   : > { %5836 = vrsqrt.f32 %v3648_v21  ;;  %v3645_v37 = vmul.f32 0.0078125, %v3639_v60  ;;  %v3646_v9 = vmul.f32 0.0078125, %v3641_v0  ;;  %v5683_v21 = vld [vmem:[%s6245_s30 + $0x90] sm:$0xff]   ;;  %v5684_v60 = vld [vmem:[%s6245_s30 + $0x48] sm:$0xff]  }
 0xf3d   : > { %v5685_v0 = vld [vmem:[%s6245_s30 + $0xc8] sm:$0xff]  }
 0xf3e   : > { %v3649_v15 = vadd.f32 1e-05, %v3645_v37  ;;  %v3650_v50 = vadd.f32 1e-05, %v3646_v9  ;;  %v5686_v37 = vld [vmem:[%s6245_s30 + $0x8] sm:$0xff]  }
 0xf3f   : > { %v3643_v40 = vpop.xlane.xlu1 %3642  ;;  %v5687_v9 = vld [vmem:[%s6245_s30 + $0x88] sm:$0xff]  }
 0xf40   : > { %5838 = vrsqrt.f32 %v3649_v15  ;;  %v3647_v11 = vmul.f32 0.0078125, %v3643_v40  ;;  %v5688_v15 = vld [vmem:[%s6245_s30 + $0x40] sm:$0xff]  }
 0xf41   : > { %5840 = vrsqrt.f32 %v3650_v50  ;;  %v5689_v50 = vld [vmem:[%s6245_s30 + $0xc0] sm:$0xff]  }
 0xf42   : > { %v3651_v31 = vadd.f32 1e-05, %v3647_v11  ;;  %v5690_v40 = vld [vmem:[%s6245_s30] sm:$0xff]  }
 0xf43   : > { %v5691_v11 = vld [vmem:[%s6245_s30 + $0x80] sm:$0xff]  }
 0xf44   : > { %5842 = vrsqrt.f32 %v3651_v31  ;;  %v585_v31 = vld [vmem:[%s6243_s13] sm:$0xf] }
 0xf45   : > { %v7196_v54 = vrot.slane %v585_v31, %v640_v63  ;;  %v7204_v58 = vrot.slane %v585_v31, %v648_v4 }
 0xf49   : > { %v5837_v45 = vpop.eup %5836 }
 0xf4a   : > { %v3656_v18 = vmul.f32 %v5837_v45, %v7104_v51  ;;  %v7200_v45 = vrot.slane %v585_v31, %v2179_v46 }
 0xf4c   : > { %v3664_v59 = vmul.f32 %v3663_v17, %v3656_v18 }
 0xf4d   : > { %v5839_v19 = vpop.eup %5838 }
 0xf4e   : > { %v3657_v26 = vmul.f32 %v5839_v19, %v7109_v23  ;;  %v5841_v47 = vpop.eup %5840  ;;  %v3672_v38 = vadd.f32 %v3671_v8, %v3664_v59  ;;  %v7208_v19 = vrot.slane %v585_v31, %v2187_v20 }
 0xf4f   : > { %v3658_v41 = vmul.f32 %v5841_v47, %v7112_v42 }
 0xf50   : > { %v3665_v61 = vmul.f32 %v3663_v17, %v3657_v26 }
 0xf51   : > { %v5843_v52 = vpop.eup %5842  ;;  %v3666_v23 = vmul.f32 %v3663_v17, %v3658_v41 }
 0xf52   : > { %v3673_v27 = vadd.f32 %v3671_v8, %v3665_v61  ;;  %v3659_v51 = vmul.f32 %v5843_v52, %v7119_v44  ;;  %v5660_v44 = vld [vmem:[%s6245_s30 + $0x78] sm:$0xff]  }
 0xf53   : > { %v3674_v29 = vadd.f32 %v3671_v8, %v3666_v23  ;;  %4853 = vmatprep.subr.bf16.mxu1 %v5660_v44 }
 0xf54   : > { %v3676_v24 = vpack.c.bf16 %v3673_v27, %v3672_v38  ;;  %v3667_v22 = vmul.f32 %v3663_v17, %v3659_v51 }
 0xf56   : > { %3892 = vmatmul.mubr.bf16.vlgmr.msra.gmra.mxu1 %v3676_v24  ;;  %3945 = vmatmul.mubr.bf16.vlgmr.msra.gmra.mxu0 %v3676_v24  ;;  %v3675_v39 = vadd.f32 %v3671_v8, %v3667_v22 }
 0xf57   : > { %3901 = vmatprep.mubr.bf16.mxu1 %v6057_v43  ;;  %3954 = vmatprep.mubr.bf16.mxu0 %v6057_v43  ;;  %v5664_v43 = vld [vmem:[%s6245_s30 + $0x70] sm:$0xff]  }
 0xf58   : > { %v3677_v42 = vpack.c.bf16 %v3675_v39, %v3674_v29  ;;  %4854 = vmatpush3.bf16.msra.mxu1 %v5662_v14  ;;  %4882 = vmatpush3.bf16.msra.mxu0 %v5663_v49 }
 0xf59   : > { %4855 = vmatprep.subr.bf16.mxu1 %v5664_v43  ;;  %4883 = vmatprep.subr.bf16.mxu0 %v5665_v13 }
 0xf5c   : > { %4856 = vmatpush3.bf16.msra.mxu1 %v5666_v48  ;;  %4884 = vmatpush3.bf16.msra.mxu0 %v5667_v34 }
 0xf5d   : > { %4857 = vmatprep.subr.bf16.mxu1 %v5668_v1  ;;  %4885 = vmatprep.subr.bf16.mxu0 %v5669_v55 }
 0xf5e   : > { %3902 = vmatmul.mubr.bf16.gmra.mxu1 %v3677_v42  ;;  %3955 = vmatmul.mubr.bf16.gmra.mxu0 %v3677_v42 }
 0xf60   : > { %4858 = vmatpush3.bf16.msra.mxu1 %v5670_v28  ;;  %4886 = vmatpush3.bf16.msra.mxu0 %v5671_v2 }
 0xf61   : > { %4859 = vmatprep.subr.bf16.mxu1 %v5672_v25  ;;  %4887 = vmatprep.subr.bf16.mxu0 %v5673_v57 }
 0xf64   : > { %4860 = vmatpush3.bf16.msra.mxu1 %v5674_v6  ;;  %4888 = vmatpush3.bf16.msra.mxu0 %v5675_v7 }
 0xf65   : > { %4861 = vmatprep.subr.bf16.mxu1 %v5676_v30  ;;  %4889 = vmatprep.subr.bf16.mxu0 %v5677_v12 }
 0xf68   : > { %4862 = vmatpush3.bf16.msra.mxu1 %v5678_v32  ;;  %4890 = vmatpush3.bf16.msra.mxu0 %v5679_v5 }
 0xf69   : > { %4863 = vmatprep.subr.bf16.mxu1 %v5680_v56  ;;  %4891 = vmatprep.subr.bf16.mxu0 %v5681_v33 }
 0xf6c   : > { %4864 = vmatpush3.bf16.msra.mxu1 %v5682_v10  ;;  %4892 = vmatpush3.bf16.msra.mxu0 %v5683_v21 }
 0xf6d   : > { %4865 = vmatprep.subr.bf16.mxu1 %v5684_v60  ;;  %4893 = vmatprep.subr.bf16.mxu0 %v5685_v0 }
 0xf70   : > { %4866 = vmatpush3.bf16.msra.mxu1 %v5686_v37  ;;  %4894 = vmatpush3.bf16.msra.mxu0 %v5687_v9 }
 0xf71   : > { %4867 = vmatprep.subr.bf16.mxu1 %v5688_v15  ;;  %4895 = vmatprep.subr.bf16.mxu0 %v5689_v50 }
 0xf74   : > { %4868 = vmatpush3.bf16.msra.mxu1 %v5690_v40  ;;  %4896 = vmatpush3.bf16.msra.mxu0 %v5691_v11 }
0x1016   : > { %v3893_v18 = vpop.f32.mrf.mxu1  ;;  %v3946_v17 = vpop.f32.mrf.mxu0 }
0x1017   : > { %v7211_v26 = vadd.f32 %v3893_v18, %v7196_v54  ;;  %v7214_v63 = vadd.f32 %v3946_v17, %v7200_v45 }
0x1018   : > { %v3895_v59 = vpop.f32.mrf.mxu1  ;;  %v3948_v8 = vpop.f32.mrf.mxu0 }
0x1019   : > { %v3981_v46 = vmul.f32 0.044715, %v7211_v26  ;;  %v3983_v47 = vmul.f32 0.044715, %v7214_v63  ;;  %v7219_v61 = vadd.f32 %v3895_v59, %v7204_v58  ;;  %v7222_v4 = vadd.f32 %v3948_v8, %v7208_v19 }
0x101a   : > { %v3897_v62 = vpop.f32.mrf.mxu1  ;;  %v3950_v20 = vpop.f32.mrf.mxu0 }
0x101b   : > { %v3997_v52 = vmul.f32 %v3981_v46, %v7211_v26  ;;  %v3999_v38 = vmul.f32 %v3983_v47, %v7214_v63  ;;  %v7227_v27 = vadd.f32 %v3897_v62, %v7196_v54  ;;  %v7230_v41 = vadd.f32 %v3950_v20, %v7200_v45 }
0x101c   : > { %v3899_v51 = vpop.f32.mrf.mxu1  ;;  %v3952_v24 = vpop.f32.mrf.mxu0  ;;  %v3982_v39 = vmul.f32 0.044715, %v7219_v61  ;;  %v3984_v42 = vmul.f32 0.044715, %v7222_v4 }
0x101d   : > { %v4013_v22 = vmul.f32 %v3997_v52, %v7211_v26  ;;  %v4015_v23 = vmul.f32 %v3999_v38, %v7214_v63  ;;  %v3985_v29 = vmul.f32 0.044715, %v7227_v27  ;;  %v3987_v44 = vmul.f32 0.044715, %v7230_v41 }
0x101e   : > { %v3903_v53 = vpop.f32.mrf.mxu1  ;;  %v3956_v14 = vpop.f32.mrf.mxu0  ;;  %v7241_v13 = vadd.f32 %v3899_v51, %v7204_v58  ;;  %v7245_v34 = vadd.f32 %v3952_v24, %v7208_v19  ;;  %v3998_v2 = vmul.f32 %v3982_v39, %v7219_v61  ;;  %v4000_v6 = vmul.f32 %v3984_v42, %v7222_v4 }
0x101f   : > { %v4029_v49 = vadd.f32 %v4013_v22, %v7211_v26  ;;  %v4001_v43 = vmul.f32 %v3985_v29, %v7227_v27  ;;  %v4003_v48 = vmul.f32 %v3987_v44, %v7230_v41  ;;  %v4031_v28 = vadd.f32 %v4015_v23, %v7214_v63 }
0x1020   : > { %v3905_v1 = vpop.f32.mrf.mxu1  ;;  %v3958_v55 = vpop.f32.mrf.mxu0  ;;  %v3986_v57 = vmul.f32 0.044715, %v7241_v13  ;;  %v3988_v30 = vmul.f32 0.044715, %v7245_v34  ;;  %v7255_v12 = vadd.f32 %v3903_v53, %v7196_v54  ;;  %v4014_v37 = vmul.f32 %v3998_v2, %v7219_v61 }
0x1021   : > { %v4017_v25 = vmul.f32 %v4001_v43, %v7227_v27  ;;  %v4019_v7 = vmul.f32 %v4003_v48, %v7230_v41  ;;  %v4045_v5 = vmul.f32 0.7978846, %v4029_v49  ;;  %v7260_v10 = vadd.f32 %v3905_v1, %v7204_v58 }
0x1022   : > { %v3907_v32 = vpop.f32.mrf.mxu1  ;;  %v4002_v33 = vmul.f32 %v3986_v57, %v7241_v13  ;;  %v3960_v21 = vpop.f32.mrf.mxu0  ;;  %v4047_v0 = vmul.f32 0.7978846, %v4031_v28  ;;  %v7265_v9 = vadd.f32 %v3956_v14, %v7200_v45  ;;  %v4016_v50 = vmul.f32 %v4000_v6, %v7222_v4 }
0x1023   : > { %v4033_v56 = vadd.f32 %v4017_v25, %v7227_v27  ;;  %v4035_v60 = vadd.f32 %v4019_v7, %v7230_v41  ;;  %v3990_v15 = vmul.f32 0.044715, %v7260_v10  ;;  %v4004_v40 = vmul.f32 %v3988_v30, %v7245_v34 }
0x1024   : > { %v3989_v11 = vmul.f32 0.044715, %v7255_v12  ;;  %v7272_v31 = vadd.f32 %v3958_v55, %v7208_v19  ;;  %v3909_v18 = vpop.f32.mrf.mxu1  ;;  %5844 = vtanh.f32 %v4045_v5  ;;  %v4018_v59 = vmul.f32 %v4002_v33, %v7241_v13  ;;  %v3962_v46 = vpop.f32.mrf.mxu0 }
0x1025   : > { %v4049_v17 = vmul.f32 0.7978846, %v4033_v56  ;;  %v7276_v8 = vadd.f32 %v3907_v32, %v7196_v54  ;;  %v4051_v47 = vmul.f32 0.7978846, %v4035_v60  ;;  %v4006_v62 = vmul.f32 %v3990_v15, %v7260_v10 }
0x1026   : > { %v3992_v20 = vmul.f32 0.044715, %v7272_v31  ;;  %v7281_v52 = vadd.f32 %v3960_v21, %v7200_v45  ;;  %5846 = vtanh.f32 %v4047_v0  ;;  %v3991_v38 = vmul.f32 0.044715, %v7265_v9 }
0x1027   : > { %v3993_v51 = vmul.f32 0.044715, %v7276_v8  ;;  %v7286_v24 = vadd.f32 %v3909_v18, %v7204_v58  ;;  %v4020_v54 = vmul.f32 %v4004_v40, %v7245_v34  ;;  %v4005_v22 = vmul.f32 %v3989_v11, %v7255_v12 }
0x1028   : > { %v4008_v23 = vmul.f32 %v3992_v20, %v7272_v31  ;;  %v7292_v39 = vadd.f32 %v3962_v46, %v7208_v19  ;;  %5848 = vtanh.f32 %v4049_v17  ;;  %v4030_v29 = vadd.f32 %v4014_v37, %v7219_v61 }
0x1029   : > { %v3994_v45 = vmul.f32 0.044715, %v7286_v24  ;;  %v4034_v42 = vadd.f32 %v4018_v59, %v7241_v13  ;;  %5850 = vtanh.f32 %v4051_v47  ;;  %v4022_v58 = vmul.f32 %v4006_v62, %v7260_v10 }
0x102a   : > { %v3995_v44 = vmul.f32 0.044715, %v7281_v52  ;;  %v3996_v53 = vmul.f32 0.044715, %v7292_v39  ;;  %v4009_v14 = vmul.f32 %v3993_v51, %v7276_v8  ;;  %v4046_v19 = vmul.f32 0.7978846, %v4030_v29 }
0x102b   : > { %v4010_v49 = vmul.f32 %v3994_v45, %v7286_v24  ;;  %v4050_v43 = vmul.f32 0.7978846, %v4034_v42  ;;  %v4024_v48 = vmul.f32 %v4008_v23, %v7272_v31  ;;  %v4032_v55 = vadd.f32 %v4016_v50, %v7222_v4 }
0x102c   : > { %v4012_v1 = vmul.f32 %v3996_v53, %v7292_v39  ;;  %v4036_v28 = vadd.f32 %v4020_v54, %v7245_v34  ;;  %v4007_v2 = vmul.f32 %v3991_v38, %v7265_v9  ;;  %5852 = vtanh.f32 %v4046_v19 }
0x102d   : > { %v4026_v25 = vmul.f32 %v4010_v49, %v7286_v24  ;;  %5854 = vtanh.f32 %v4050_v43  ;;  %v4048_v6 = vmul.f32 0.7978846, %v4032_v55  ;;  %v4021_v30 = vmul.f32 %v4005_v22, %v7255_v12 }
0x102e   : > { %v4028_v57 = vmul.f32 %v4012_v1, %v7292_v39  ;;  %v4052_v7 = vmul.f32 0.7978846, %v4036_v28  ;;  %v4011_v32 = vmul.f32 %v3995_v44, %v7281_v52  ;;  %v4038_v5 = vadd.f32 %v4022_v58, %v7260_v10 }
0x102f   : > { %v4042_v56 = vadd.f32 %v4026_v25, %v7286_v24  ;;  %v4025_v33 = vmul.f32 %v4009_v14, %v7276_v8  ;;  %5856 = vtanh.f32 %v4048_v6  ;;  %v4040_v21 = vadd.f32 %v4024_v48, %v7272_v31 }
0x1030   : > { %5858 = vtanh.f32 %v4052_v7  ;;  %v4054_v60 = vmul.f32 0.7978846, %v4038_v5  ;;  %v4044_v15 = vadd.f32 %v4028_v57, %v7292_v39  ;;  %v4023_v40 = vmul.f32 %v4007_v2, %v7265_v9 }
0x1031   : > { %v4058_v0 = vmul.f32 0.7978846, %v4042_v56  ;;  %v5845_v37 = vpop.eup %5844  ;;  %v4056_v50 = vmul.f32 0.7978846, %v4040_v21  ;;  %v4027_v11 = vmul.f32 %v4011_v32, %v7281_v52  ;;  %v4037_v18 = vadd.f32 %v4021_v30, %v7255_v12 }
0x1032   : > { %5860 = vtanh.f32 %v4054_v60  ;;  %v4060_v59 = vmul.f32 0.7978846, %v4044_v15  ;;  %v4041_v46 = vadd.f32 %v4025_v33, %v7276_v8  ;;  %v4039_v51 = vadd.f32 %v4023_v40, %v7265_v9 }
0x1033   : > { %v5847_v17 = vpop.eup %5846  ;;  %5862 = vtanh.f32 %v4058_v0  ;;  %v4053_v47 = vmul.f32 0.7978846, %v4037_v18  ;;  %v4043_v54 = vadd.f32 %v4027_v11, %v7281_v52  ;;  %v3966_v42 = vmul.f32 0.5, %v7219_v61 }
0x1034   : > { %5864 = vtanh.f32 %v4056_v50  ;;  %v4057_v20 = vmul.f32 0.7978846, %v4041_v46  ;;  %v4055_v23 = vmul.f32 0.7978846, %v4039_v51  ;;  %v3969_v44 = vmul.f32 0.5, %v7227_v27 }
0x1035   : > { %v5849_v62 = vpop.eup %5848  ;;  %5866 = vtanh.f32 %v4060_v59  ;;  %v4059_v45 = vmul.f32 0.7978846, %v4043_v54  ;;  %v4077_v14 = vadd.f32 1.0, %v5845_v37  ;;  %v3970_v49 = vmul.f32 0.5, %v7241_v13 }
0x1036   : > { %v5851_v38 = vpop.eup %5850  ;;  %5868 = vtanh.f32 %v4053_v47  ;;  %v4081_v22 = vadd.f32 1.0, %v5849_v62  ;;  %v3965_v1 = vmul.f32 0.5, %v7211_v26  ;;  %v3971_v55 = vmul.f32 0.5, %v7230_v41 }
0x1037   : > { %5870 = vtanh.f32 %v4057_v20  ;;  %v4083_v43 = vadd.f32 1.0, %v5851_v38  ;;  %v4079_v6 = vadd.f32 1.0, %v5847_v17  ;;  %v3968_v27 = vmul.f32 0.5, %v7222_v4 }
0x1038   : > { %5872 = vtanh.f32 %v4055_v23  ;;  %v4097_v28 = vmul.f32 %v4081_v22, %v3969_v44  ;;  %v3972_v7 = vmul.f32 0.5, %v7245_v34  ;;  %v4093_v13 = vmul.f32 %v4077_v14, %v3965_v1  ;;  %v4710_v1 = vld [vmem:[%s6238_s28 + $0x8] ss:$0 sm:$0xff]  ;;  %s4429_s28 = sshll.u32 %s6063_s16, 4  ;;  %s4430_s28 = int_to_ptr.vmem [resolvable:$true] %s4429_s28 }
0x1039   : > { %v5853_v29 = vpop.eup %5852  ;;  %5874 = vtanh.f32 %v4059_v45  ;;  %v3967_v5 = vmul.f32 0.5, %v7214_v63  ;;  %v4099_v33 = vmul.f32 %v4083_v43, %v3971_v55  ;;  %v3974_v50 = vmul.f32 0.5, %v7260_v10  ;;  %s5964_s7 = scalar_lea.vmem %s4430_s28, 512  ;;  %p5971_p9 = scmp.lt.s32.totalorder %s4430_s28, %s4430_s28 }
0x103a   : > { %v5855_v58 = vpop.eup %5854  ;;  %v4078_v53 = vadd.f32 1.0, %v5853_v29  ;;  %v4109_v60 = vpack.c.bf16 %v4097_v28, %v4093_v13  ;;  %v3978_v4 = vmul.f32 0.5, %v7286_v24  ;;  %v3976_v63 = vmul.f32 0.5, %v7272_v31  ;;  %p5965_p5 = scmp.ne.s32.totalorder %s4430_s28, %s5964_s7  ;;  %p5972_p11 = scmp.lt.s32.totalorder %s5964_s7, %s5964_s7 }
0x103b   : > { %v4082_v19 = vadd.f32 1.0, %v5855_v58  ;;  %v4095_v15 = vmul.f32 %v4079_v6, %v3967_v5  ;;  %v3980_v18 = vmul.f32 0.5, %v7292_v39  ;;  %v3973_v10 = vmul.f32 0.5, %v7255_v12 }
0x103c   : > { %v5857_v48 = vpop.eup %5856  ;;  %v4094_v25 = vmul.f32 %v4078_v53, %v3966_v42  ;;  %v3977_v24 = vmul.f32 0.5, %v7276_v8  ;;  %v3975_v12 = vmul.f32 0.5, %v7265_v9  ;;  %v3979_v8 = vmul.f32 0.5, %v7281_v52  ;;  %p5966_p8 = pnand %p5965_p5, %p5210_p2  ;;  %p5973_p12 = por %p5972_p11, %p5971_p9 }
0x103d   : > { %v5859_v2 = vpop.eup %5858  ;;  %v4098_v61 = vmul.f32 %v4082_v19, %v3970_v49  ;;  %v4080_v57 = vadd.f32 1.0, %v5857_v48  ;;  %v4111_v46 = vpack.c.bf16 %v4099_v33, %v4095_v15 }
0x103e   : > { %v4084_v30 = vadd.f32 1.0, %v5859_v2  ;;  %p5967_p10 = pneg %p5966_p8 }
0x103f   : > { %v5861_v32 = vpop.eup %5860  ;;  %v4110_v56 = vpack.c.bf16 %v4098_v61, %v4094_v25  ;;  %v4096_v21 = vmul.f32 %v4080_v57, %v3968_v27 }
0x1040   : > { %v5863_v26 = vpop.eup %5862  ;;  %v4100_v41 = vmul.f32 %v4084_v30, %v3972_v7  ;;  %v4086_v0 = vadd.f32 1.0, %v5861_v32  ;;  %p5974_p13 = pnand %p5973_p12, %p5967_p10 }
0x1041   : > { %v5865_v37 = vpop.eup %5864  ;;  %4345 = vmatprep.mubr.bf16.mxu1 %v4110_v56  ;;  %v4090_v34 = vadd.f32 1.0, %v5863_v26 }
0x1042   : > { %v5867_v40 = vpop.eup %5866  ;;  %v4112_v11 = vpack.c.bf16 %v4100_v41, %v4096_v21  ;;  %4346 = vmatmul.mubr.bf16.vlgmr.msra.gmra.mxu1 %v4109_v60  ;;  %v4088_v17 = vadd.f32 1.0, %v5865_v37  ;;  %v4102_v47 = vmul.f32 %v4086_v0, %v3974_v50 }
0x1043   : > { %v5869_v59 = vpop.eup %5868  ;;  %v4106_v62 = vmul.f32 %v4090_v34, %v3978_v4  ;;  %v4092_v20 = vadd.f32 1.0, %v5867_v40 }
0x1044   : > { %v5871_v38 = vpop.eup %5870  ;;  %4394 = vmatprep.mubr.bf16.mxu0 %v4112_v11  ;;  %v4085_v51 = vadd.f32 1.0, %v5869_v59  ;;  %v4104_v22 = vmul.f32 %v4088_v17, %v3976_v63 }
0x1045   : > { %4395 = vmatmul.mubr.bf16.vlgmr.msra.gmra.mxu0 %v4111_v46  ;;  %v4114_v54 = vpack.c.bf16 %v4106_v62, %v4102_v47  ;;  %v4108_v23 = vmul.f32 %v4092_v20, %v3980_v18  ;;  %v4089_v31 = vadd.f32 1.0, %v5871_v38  ;;  %v5873_v45 = vpop.eup %5872 }
0x1046   : > { %v4101_v29 = vmul.f32 %v4085_v51, %v3973_v10  ;;  %v5875_v58 = vpop.eup %5874  ;;  %v4087_v44 = vadd.f32 1.0, %v5873_v45 }
0x1047   : > { %4353 = vmatprep.mubr.bf16.mxu1 %v4114_v54  ;;  %v4116_v39 = vpack.c.bf16 %v4108_v23, %v4104_v22  ;;  %v4105_v42 = vmul.f32 %v4089_v31, %v3977_v24  ;;  %v4091_v14 = vadd.f32 1.0, %v5875_v58 }
0x1048   : > { %v4103_v49 = vmul.f32 %v4087_v44, %v3975_v12 }
0x1049   : > { %4402 = vmatprep.mubr.bf16.mxu0 %v4116_v39  ;;  %v4113_v53 = vpack.c.bf16 %v4105_v42, %v4101_v29  ;;  %v4107_v19 = vmul.f32 %v4091_v14, %v3979_v8 }
0x104b   : > { %4354 = vmatmul.mubr.bf16.gmra.mxu1 %v4113_v53  ;;  %v4115_v43 = vpack.c.bf16 %v4107_v19, %v4103_v49 }
0x104d   : > { %4403 = vmatmul.mubr.bf16.gmra.mxu0 %v4115_v43 }
0x1102   : > { %v4869_v48 = vpop.f32.mrf.mxu1 }
0x1104   : > { %v4870_v55 = vpop.f32.mrf.mxu1 }
0x1105   : > { %v4897_v28 = vpop.f32.mrf.mxu0  ;;  %v4871_v2 = vadd.f32 %v4870_v55, %v4869_v48 }
0x1106   : > { %v4872_v25 = vpop.f32.mrf.mxu1 }
0x1107   : > { %v4348_v61 = vadd.f32 %v4871_v2, %v4710_v1  ;;  %v4898_v57 = vpop.f32.mrf.mxu0 }
0x1108   : > { %v4899_v6 = vadd.f32 %v4898_v57, %v4897_v28  ;;  %v4873_v27 = vpop.f32.mrf.mxu1 }
0x1109   : > { %v4900_v7 = vpop.f32.mrf.mxu0  ;;  %v4874_v9 = vadd.f32 %v4873_v27, %v4872_v25 }
0x110a   : > { %v4397_v30 = vadd.f32 %v4899_v6, %v4348_v61 }
0x110b   : > { %v4351_v52 = vadd.f32 %v4874_v9, %v4710_v1  ;;  %v4901_v13 = vpop.f32.mrf.mxu0  ;;  %v4875_v32 = vpop.f32.mrf.mxu1 }
0x110c   : > { %v4411_v5 = vadd.f32 %v4397_v30, %v7084_v16  ;;  %v4902_v56 = vadd.f32 %v4901_v13, %v4900_v7 }
0x110d   : > { %v4876_v33 = vpop.f32.mrf.mxu1  ;;  %v4903_v41 = vpop.f32.mrf.mxu0 }
0x110e   : > { %4415 = vst [vmem:[#allocation8] sm:$0xff] %v4411_v5  ;;  %v4400_v26 = vadd.f32 %v4902_v56, %v4351_v52  ;;  %v4877_v21 = vadd.f32 %v4876_v33, %v4875_v32 }
0x110f   : > { %v4878_v60 = vpop.f32.mrf.mxu1  ;;  %v4904_v15 = vpop.f32.mrf.mxu0 }
0x1110   : > { %v4412_v0 = vadd.f32 %v4400_v26, %v7091_v36  ;;  %v4356_v37 = vadd.f32 %v4877_v21, %v4710_v1  ;;  %v4905_v4 = vadd.f32 %v4904_v15, %v4903_v41 }
0x1111   : > { %v4879_v50 = vpop.f32.mrf.mxu1  ;;  %v4906_v40 = vpop.f32.mrf.mxu0 }
0x1112   : > { %4416 = vst [vmem:[#allocation8 + $0x8] sm:$0xff] %v4412_v0  ;;  %v4880_v34 = vadd.f32 %v4879_v50, %v4878_v60  ;;  %v4405_v11 = vadd.f32 %v4905_v4, %v4356_v37 }
0x1113   : > { %v4907_v63 = vpop.f32.mrf.mxu0 }
0x1114   : > { %v4359_v16 = vadd.f32 %v4880_v34, %v4710_v1  ;;  %v4413_v18 = vadd.f32 %v4405_v11, %v7088_v35  ;;  %v4908_v17 = vadd.f32 %v4907_v63, %v4906_v40 }
0x1116   : > { %4417 = vst [vmem:[#allocation8 + $0x10] sm:$0xff] %v4413_v18  ;;  %v4408_v59 = vadd.f32 %v4908_v17, %v4359_v16 }
0x1118   : > { %v4414_v36 = vadd.f32 %v4408_v59, %v7096_v3 }
0x111a   : > { %4418 = vst [vmem:[#allocation8 + $0x18] sm:$0xff] %v4414_v36 }
0x111b   : > { %5977 = shalt.err (!%p5974_p13)
}
0x111c   : > { %s6064_s21 = smov 128   ;;  %s6065_s13 = smov 8  }
0x111d   : > { %5193 = dma.vmem_to_hbm [thread:$0]  (%p5210_p2), %s4430_s28, 512, %s7379_s6, [#allocation4], %s6064_s21, %s6064_s21, %s6065_s13  }
0x111e   : > { %6021 = dma.done.wait (%p5210_p2), [#allocation4], 512  }
0x111f   : > { %6023 = vsyncadd (%p5210_p2), [#allocation4], 4294966784 }
0x1120 PF: > { %s21_s26 = sadd.s32 1, %s6046_s26   ;;  %s7388_s21 = smov %s6030_s22 }
0x1121   : > { %p18_p0 = scmp.ge.s32.totalorder %s21_s26, 4   ;;  %s7389_s22 = smov %s6034_s23 }
0x1122   : > { %s7390_s23 = smov %s6145_s9  ;;  %s7391_s24 = smov %s6042_s25 }
0x1123   : > { %s7392_s25 = smov %s7394_s27  ;;  %20 = sbr.rel (!%p18_p0) target bundleno = 6 (0x6), region = 112 }
0x1128   :  { %4445 = vsyncpa [#allocation3], 1 }
0x1129   :  { %4447 = vsyncpa [#allocation3 + $0x1], 1 }
0x112a   :  { %4448 = vsyncpa [#allocation6], 1 }
0x112b   :  { %4450 = vsyncpa [#allocation6 + $0x1], 1 }
0x112c   :  { %4451 = vsyncpa [#allocation4], 1 }
0x112d   :  { %4453 = vsyncpa [#allocation4 + $0x1], 1 }

</bundles_post_ra>
